<compile_context>
chip_gen: v6e
topology: v6e:2x2x1
jax: 0.10.0
libtpu: 0.0.40
codegen_flags: <defaults>
</compile_context>

<pallas_src>
import functools

import jax
import jax.numpy as jnp
from jax.experimental import pallas as pl
from jax.experimental.pallas import tpu as pltpu


def _gru_fused_kernel(num_layers, x_ref, *rest):
    """Fused multi-layer GRU over the full sequence, single invocation.

    x_ref   : (B, T, Din)                input sequence, batch_first
    rest    : per layer l: wih_ref (3, Din_l, H)  gate-major W_ih^T
                           whh_ref (3, H, H)      gate-major W_hh^T
                           bprec_ref (3, 1, H)    [b_ir+b_hr, b_iz+b_hz, b_in]
                           bhn_ref  (1, H)        b_hn (needed inside r * (.))
              then out_ref (B, T, H)
    Intermediate layer outputs are staged through out_ref's VMEM buffer (each layer
    fully loads its input sequence before overwriting it).
    """
    w_refs = rest[: 4 * num_layers]
    out_ref = rest[4 * num_layers]
    B, T, H = out_ref.shape

    for layer in range(num_layers):
        wih_ref, whh_ref, bprec_ref, bhn_ref = w_refs[4 * layer: 4 * layer + 4]

        # Load the whole input sequence for this layer (values, taken before any
        # writes of this layer land in out_ref).
        src_ref = x_ref if layer == 0 else out_ref
        x_seq = src_ref[...]                       # (B, T, Din_l)
        d_in = x_seq.shape[-1]
        x2 = x_seq.reshape(B * T, d_in)            # row b*T + t == x_seq[b, t, :]

        # Hoisted, non-recurrent input-side matmuls: one MXU call per gate over the
        # whole sequence, with the r/z biases already folded in.
        gi_r = (jnp.dot(x2, wih_ref[0], preferred_element_type=jnp.float32)
                + bprec_ref[0]).reshape(B, T, H)
        gi_z = (jnp.dot(x2, wih_ref[1], preferred_element_type=jnp.float32)
                + bprec_ref[1]).reshape(B, T, H)
        gi_n = (jnp.dot(x2, wih_ref[2], preferred_element_type=jnp.float32)
                + bprec_ref[2]).reshape(B, T, H)

        # Loop-invariant recurrent weights / bias: loaded once per layer.
        w_hr = whh_ref[0]
        w_hz = whh_ref[1]
        w_hn = whh_ref[2]
        b_hn = bhn_ref[...]                        # (1, H)

        # h_0 = ones (the reference module passes torch.ones explicitly).
        h = jnp.ones((B, H), dtype=jnp.float32)

        # Fully unrolled time recurrence (T small & static) — gives the scheduler
        # visibility to overlap step-t MXU work with step-(t-1) EUP/VPU work.
        for t in range(T):
            gh_r = jnp.dot(h, w_hr, preferred_element_type=jnp.float32)
            gh_z = jnp.dot(h, w_hz, preferred_element_type=jnp.float32)
            gh_n = jnp.dot(h, w_hn, preferred_element_type=jnp.float32)
            r = jax.nn.sigmoid(gi_r[:, t, :] + gh_r)
            z = jax.nn.sigmoid(gi_z[:, t, :] + gh_z)
            n = jnp.tanh(gi_n[:, t, :] + r * (gh_n + b_hn))
            h = (1.0 - z) * n + z * h
            out_ref[:, t, :] = h                   # VMEM store; HBM write-back is once


def _prepare_layer(w_ih, w_hh, b_ih, b_hh):
    """PyTorch (3H, Din)/(3H, H)/(3H,) layout -> gate-major kernel layout."""
    H = w_hh.shape[1]
    d_in = w_ih.shape[1]
    wih_g = jnp.transpose(w_ih.reshape(3, H, d_in), (0, 2, 1)).astype(jnp.float32)  # (3, Din, H)
    whh_g = jnp.transpose(w_hh.reshape(3, H, H), (0, 2, 1)).astype(jnp.float32)     # (3, H, H)
    bi = b_ih.reshape(3, H).astype(jnp.float32)
    bh = b_hh.reshape(3, H).astype(jnp.float32)
    # r/z biases folded together (go into the hoisted input-side precompute),
    # n gate keeps b_in in the precompute and b_hn separate (inside r * (.)).
    b_prec = jnp.concatenate([bi[0:2] + bh[0:2], bi[2:3]], axis=0).reshape(3, 1, H)
    b_hn = bh[2:3]                                                                   # (1, H)
    return wih_g, whh_g, b_prec, b_hn


@jax.jit
def gru_forward(x_btd, params):
    """Mirrors GRU.forward: x (B, T, Din) batch_first -> output (B, T, H) of last layer.

    params: tuple of per-layer (w_ih, w_hh, b_ih, b_hh) in PyTorch nn.GRU layout.
    dropout=0, bidirectional=False (the reference module's defaults).
    """
    B, T, _ = x_btd.shape
    num_layers = len(params)
    H = params[0][1].shape[1]

    kernel_inputs = [x_btd.astype(jnp.float32)]
    for layer_params in params:
        kernel_inputs.extend(_prepare_layer(*layer_params))

    return pl.pallas_call(
        functools.partial(_gru_fused_kernel, num_layers),
        out_shape=jax.ShapeDtypeStruct((B, T, H), jnp.float32),
        in_specs=[pl.BlockSpec(memory_space=pltpu.MemorySpace.VMEM)] * len(kernel_inputs),
        out_specs=pl.BlockSpec(memory_space=pltpu.MemorySpace.VMEM),
    )(*kernel_inputs)


def init_gru_params(key, input_size, hidden_size, num_layers):
    """Deterministic PyTorch-style uniform init: U(-1/sqrt(H), 1/sqrt(H))."""
    bound = 1.0 / jnp.sqrt(jnp.float32(hidden_size))
    params = []
    for layer in range(num_layers):
        d_in = input_size if layer == 0 else hidden_size
        key, k1, k2, k3, k4 = jax.random.split(key, 5)
        w_ih = jax.random.uniform(k1, (3 * hidden_size, d_in), jnp.float32, -bound, bound)
        w_hh = jax.random.uniform(k2, (3 * hidden_size, hidden_size), jnp.float32, -bound, bound)
        b_ih = jax.random.uniform(k3, (3 * hidden_size,), jnp.float32, -bound, bound)
        b_hh = jax.random.uniform(k4, (3 * hidden_size,), jnp.float32, -bound, bound)
        params.append((w_ih, w_hh, b_ih, b_hh))
    return tuple(params)


def gru_reference(x, params):
    """Pure-JAX reference implementing torch.nn.GRU math with h_0 = ones."""
    h_seq = x.astype(jnp.float32)
    B, T, _ = x.shape
    for (w_ih, w_hh, b_ih, b_hh) in params:
        H = w_hh.shape[1]
        h = jnp.ones((B, H), jnp.float32)
        outs = []
        for t in range(T):
            xt = h_seq[:, t, :]
            gi = xt @ w_ih.T + b_ih
            gh = h @ w_hh.T + b_hh
            i_r, i_z, i_n = jnp.split(gi, 3, axis=-1)
            h_r, h_z, h_n = jnp.split(gh, 3, axis=-1)
            r = jax.nn.sigmoid(i_r + h_r)
            z = jax.nn.sigmoid(i_z + h_z)
            n = jnp.tanh(i_n + r * h_n)
            h = (1.0 - z) * n + z * h
            outs.append(h)
        h_seq = jnp.stack(outs, axis=1)
    return h_seq


if __name__ == "__main__":
    input_size = 4
    hidden_size = 32
    num_layers = 2
    seq_len = 8
    batch = 2

    key = jax.random.PRNGKey(0)
    key, kx, kp = jax.random.split(key, 3)

    x = jax.random.normal(kx, (batch, seq_len, input_size), jnp.float32)
    params = init_gru_params(kp, input_size, hidden_size, num_layers)

    out = gru_forward(x, params)
    out = jax.block_until_ready(out)

    assert out.shape == (batch, seq_len, hidden_size), out.shape
    assert out.dtype == jnp.float32

    ref = jax.block_until_ready(gru_reference(x, params))
    max_err = float(jnp.max(jnp.abs(out - ref)))
    assert max_err < 5e-2, f"numerical mismatch vs reference: {max_err}"

    print("KERNEL_OK")
</pallas_src>

<mosaic_0001>
module attributes {stable_mosaic.version = 11 : i64} {
  func.func @_gru_fused_kernel(%arg0: memref<2x8x4xf32, #tpu.memory_space<vmem>>, %arg1: memref<3x4x32xf32, #tpu.memory_space<vmem>>, %arg2: memref<3x32x32xf32, #tpu.memory_space<vmem>>, %arg3: memref<3x1x32xf32, #tpu.memory_space<vmem>>, %arg4: memref<1x32xf32, #tpu.memory_space<vmem>>, %arg5: memref<3x32x32xf32, #tpu.memory_space<vmem>>, %arg6: memref<3x32x32xf32, #tpu.memory_space<vmem>>, %arg7: memref<3x1x32xf32, #tpu.memory_space<vmem>>, %arg8: memref<1x32xf32, #tpu.memory_space<vmem>>, %arg9: memref<2x8x32xf32, #tpu.memory_space<vmem>>) attributes {dimension_semantics = [], scalar_prefetch = 0 : i64, scratch_operands = 0 : i64, tpu.core_type = #tpu.core_type<tc>} {
    %c0 = arith.constant 0 : index
    %c0_0 = arith.constant 0 : index
    %c0_1 = arith.constant 0 : index
    %0 = vector.load %arg0[%c0, %c0_0, %c0_1] : memref<2x8x4xf32, #tpu.memory_space<vmem>>, vector<2x8x4xf32>
    %1 = vector.shape_cast %0 : vector<2x8x4xf32> to vector<16x4xf32>
    %c0_2 = arith.constant 0 : index
    %c0_3 = arith.constant 0 : index
    %c0_4 = arith.constant 0 : index
    %2 = vector.load %arg1[%c0_2, %c0_3, %c0_4] : memref<3x4x32xf32, #tpu.memory_space<vmem>>, vector<1x4x32xf32>
    %3 = vector.shape_cast %2 : vector<1x4x32xf32> to vector<4x32xf32>
    %cst = arith.constant dense<0.000000e+00> : vector<16x32xf32>
    %4 = tpu.matmul %1, %3, %cst {dimension_numbers = #tpu.dot_dimension_numbers<[1], [0], [0], [1], [0, 0, 1, 1], [], []>} : vector<16x4xf32>, vector<4x32xf32>, vector<16x32xf32> -> vector<16x32xf32>
    %c0_5 = arith.constant 0 : index
    %c0_6 = arith.constant 0 : index
    %c0_7 = arith.constant 0 : index
    %5 = vector.load %arg3[%c0_5, %c0_6, %c0_7] : memref<3x1x32xf32, #tpu.memory_space<vmem>>, vector<1x1x32xf32>
    %6 = vector.shape_cast %5 : vector<1x1x32xf32> to vector<1x32xf32>
    %7 = vector.broadcast %6 : vector<1x32xf32> to vector<16x32xf32>
    %8 = arith.addf %4, %7 : vector<16x32xf32>
    %9 = vector.shape_cast %8 : vector<16x32xf32> to vector<2x8x32xf32>
    %c1 = arith.constant 1 : index
    %c0_8 = arith.constant 0 : index
    %c0_9 = arith.constant 0 : index
    %10 = vector.load %arg1[%c1, %c0_8, %c0_9] : memref<3x4x32xf32, #tpu.memory_space<vmem>>, vector<1x4x32xf32>
    %11 = vector.shape_cast %10 : vector<1x4x32xf32> to vector<4x32xf32>
    %cst_10 = arith.constant dense<0.000000e+00> : vector<16x32xf32>
    %12 = tpu.matmul %1, %11, %cst_10 {dimension_numbers = #tpu.dot_dimension_numbers<[1], [0], [0], [1], [0, 0, 1, 1], [], []>} : vector<16x4xf32>, vector<4x32xf32>, vector<16x32xf32> -> vector<16x32xf32>
    %c1_11 = arith.constant 1 : index
    %c0_12 = arith.constant 0 : index
    %c0_13 = arith.constant 0 : index
    %13 = vector.load %arg3[%c1_11, %c0_12, %c0_13] : memref<3x1x32xf32, #tpu.memory_space<vmem>>, vector<1x1x32xf32>
    %14 = vector.shape_cast %13 : vector<1x1x32xf32> to vector<1x32xf32>
    %15 = vector.broadcast %14 : vector<1x32xf32> to vector<16x32xf32>
    %16 = arith.addf %12, %15 : vector<16x32xf32>
    %17 = vector.shape_cast %16 : vector<16x32xf32> to vector<2x8x32xf32>
    %c2 = arith.constant 2 : index
    %c0_14 = arith.constant 0 : index
    %c0_15 = arith.constant 0 : index
    %18 = vector.load %arg1[%c2, %c0_14, %c0_15] : memref<3x4x32xf32, #tpu.memory_space<vmem>>, vector<1x4x32xf32>
    %19 = vector.shape_cast %18 : vector<1x4x32xf32> to vector<4x32xf32>
    %cst_16 = arith.constant dense<0.000000e+00> : vector<16x32xf32>
    %20 = tpu.matmul %1, %19, %cst_16 {dimension_numbers = #tpu.dot_dimension_numbers<[1], [0], [0], [1], [0, 0, 1, 1], [], []>} : vector<16x4xf32>, vector<4x32xf32>, vector<16x32xf32> -> vector<16x32xf32>
    %c2_17 = arith.constant 2 : index
    %c0_18 = arith.constant 0 : index
    %c0_19 = arith.constant 0 : index
    %21 = vector.load %arg3[%c2_17, %c0_18, %c0_19] : memref<3x1x32xf32, #tpu.memory_space<vmem>>, vector<1x1x32xf32>
    %22 = vector.shape_cast %21 : vector<1x1x32xf32> to vector<1x32xf32>
    %23 = vector.broadcast %22 : vector<1x32xf32> to vector<16x32xf32>
    %24 = arith.addf %20, %23 : vector<16x32xf32>
    %25 = vector.shape_cast %24 : vector<16x32xf32> to vector<2x8x32xf32>
    %c0_20 = arith.constant 0 : index
    %c0_21 = arith.constant 0 : index
    %c0_22 = arith.constant 0 : index
    %26 = vector.load %arg2[%c0_20, %c0_21, %c0_22] : memref<3x32x32xf32, #tpu.memory_space<vmem>>, vector<1x32x32xf32>
    %27 = vector.shape_cast %26 : vector<1x32x32xf32> to vector<32x32xf32>
    %c1_23 = arith.constant 1 : index
    %c0_24 = arith.constant 0 : index
    %c0_25 = arith.constant 0 : index
    %28 = vector.load %arg2[%c1_23, %c0_24, %c0_25] : memref<3x32x32xf32, #tpu.memory_space<vmem>>, vector<1x32x32xf32>
    %29 = vector.shape_cast %28 : vector<1x32x32xf32> to vector<32x32xf32>
    %c2_26 = arith.constant 2 : index
    %c0_27 = arith.constant 0 : index
    %c0_28 = arith.constant 0 : index
    %30 = vector.load %arg2[%c2_26, %c0_27, %c0_28] : memref<3x32x32xf32, #tpu.memory_space<vmem>>, vector<1x32x32xf32>
    %31 = vector.shape_cast %30 : vector<1x32x32xf32> to vector<32x32xf32>
    %c0_29 = arith.constant 0 : index
    %c0_30 = arith.constant 0 : index
    %32 = vector.load %arg4[%c0_29, %c0_30] : memref<1x32xf32, #tpu.memory_space<vmem>>, vector<1x32xf32>
    %cst_31 = arith.constant 1.000000e+00 : f32
    %33 = vector.broadcast %cst_31 : f32 to vector<2x32xf32>
    %cst_32 = arith.constant dense<0.000000e+00> : vector<2x32xf32>
    %34 = tpu.matmul %33, %27, %cst_32 {dimension_numbers = #tpu.dot_dimension_numbers<[1], [0], [0], [1], [0, 0, 1, 1], [], []>} : vector<2x32xf32>, vector<32x32xf32>, vector<2x32xf32> -> vector<2x32xf32>
    %cst_33 = arith.constant dense<0.000000e+00> : vector<2x32xf32>
    %35 = tpu.matmul %33, %29, %cst_33 {dimension_numbers = #tpu.dot_dimension_numbers<[1], [0], [0], [1], [0, 0, 1, 1], [], []>} : vector<2x32xf32>, vector<32x32xf32>, vector<2x32xf32> -> vector<2x32xf32>
    %cst_34 = arith.constant dense<0.000000e+00> : vector<2x32xf32>
    %36 = tpu.matmul %33, %31, %cst_34 {dimension_numbers = #tpu.dot_dimension_numbers<[1], [0], [0], [1], [0, 0, 1, 1], [], []>} : vector<2x32xf32>, vector<32x32xf32>, vector<2x32xf32> -> vector<2x32xf32>
    %37 = vector.extract_strided_slice %9 {offsets = [0, 0, 0], sizes = [2, 1, 32], strides = [1, 1, 1]} : vector<2x8x32xf32> to vector<2x1x32xf32>
    %38 = vector.shape_cast %37 : vector<2x1x32xf32> to vector<2x32xf32>
    %39 = arith.addf %38, %34 : vector<2x32xf32>
    %40 = arith.negf %39 : vector<2x32xf32>
    %41 = math.exp %40 : vector<2x32xf32>
    %cst_35 = arith.constant 1.000000e+00 : f32
    %42 = vector.broadcast %cst_35 : f32 to vector<2x32xf32>
    %43 = arith.addf %42, %41 : vector<2x32xf32>
    %44 = arith.divf %42, %43 : vector<2x32xf32>
    %45 = vector.extract_strided_slice %17 {offsets = [0, 0, 0], sizes = [2, 1, 32], strides = [1, 1, 1]} : vector<2x8x32xf32> to vector<2x1x32xf32>
    %46 = vector.shape_cast %45 : vector<2x1x32xf32> to vector<2x32xf32>
    %47 = arith.addf %46, %35 : vector<2x32xf32>
    %48 = arith.negf %47 : vector<2x32xf32>
    %49 = math.exp %48 : vector<2x32xf32>
    %cst_36 = arith.constant 1.000000e+00 : f32
    %50 = vector.broadcast %cst_36 : f32 to vector<2x32xf32>
    %51 = arith.addf %50, %49 : vector<2x32xf32>
    %52 = arith.divf %50, %51 : vector<2x32xf32>
    %53 = vector.extract_strided_slice %25 {offsets = [0, 0, 0], sizes = [2, 1, 32], strides = [1, 1, 1]} : vector<2x8x32xf32> to vector<2x1x32xf32>
    %54 = vector.shape_cast %53 : vector<2x1x32xf32> to vector<2x32xf32>
    %55 = vector.broadcast %32 : vector<1x32xf32> to vector<2x32xf32>
    %56 = arith.addf %36, %55 : vector<2x32xf32>
    %57 = arith.mulf %44, %56 : vector<2x32xf32>
    %58 = arith.addf %54, %57 : vector<2x32xf32>
    %59 = math.tanh %58 : vector<2x32xf32>
    %cst_37 = arith.constant 1.000000e+00 : f32
    %60 = vector.broadcast %cst_37 : f32 to vector<2x32xf32>
    %61 = arith.subf %60, %52 : vector<2x32xf32>
    %62 = arith.mulf %61, %59 : vector<2x32xf32>
    %63 = arith.mulf %52, %33 : vector<2x32xf32>
    %64 = arith.addf %62, %63 : vector<2x32xf32>
    %c0_38 = arith.constant 0 : index
    %c0_39 = arith.constant 0 : index
    %c0_40 = arith.constant 0 : index
    %65 = vector.load %arg9[%c0_38, %c0_39, %c0_40] : memref<2x8x32xf32, #tpu.memory_space<vmem>>, vector<2x1x32xf32>
    %66 = vector.shape_cast %65 : vector<2x1x32xf32> to vector<2x32xf32>
    %67 = vector.shape_cast %64 : vector<2x32xf32> to vector<2x1x32xf32>
    tpu.vector_store %arg9[%c0_38, %c0_39, %c0_40], %67 {strides = array<i32>} : memref<2x8x32xf32, #tpu.memory_space<vmem>>, vector<2x1x32xf32>,
    %cst_41 = arith.constant dense<0.000000e+00> : vector<2x32xf32>
    %68 = tpu.matmul %64, %27, %cst_41 {dimension_numbers = #tpu.dot_dimension_numbers<[1], [0], [0], [1], [0, 0, 1, 1], [], []>} : vector<2x32xf32>, vector<32x32xf32>, vector<2x32xf32> -> vector<2x32xf32>
    %cst_42 = arith.constant dense<0.000000e+00> : vector<2x32xf32>
    %69 = tpu.matmul %64, %29, %cst_42 {dimension_numbers = #tpu.dot_dimension_numbers<[1], [0], [0], [1], [0, 0, 1, 1], [], []>} : vector<2x32xf32>, vector<32x32xf32>, vector<2x32xf32> -> vector<2x32xf32>
    %cst_43 = arith.constant dense<0.000000e+00> : vector<2x32xf32>
    %70 = tpu.matmul %64, %31, %cst_43 {dimension_numbers = #tpu.dot_dimension_numbers<[1], [0], [0], [1], [0, 0, 1, 1], [], []>} : vector<2x32xf32>, vector<32x32xf32>, vector<2x32xf32> -> vector<2x32xf32>
    %71 = vector.extract_strided_slice %9 {offsets = [0, 1, 0], sizes = [2, 1, 32], strides = [1, 1, 1]} : vector<2x8x32xf32> to vector<2x1x32xf32>
    %72 = vector.shape_cast %71 : vector<2x1x32xf32> to vector<2x32xf32>
    %73 = arith.addf %72, %68 : vector<2x32xf32>
    %74 = arith.negf %73 : vector<2x32xf32>
    %75 = math.exp %74 : vector<2x32xf32>
    %cst_44 = arith.constant 1.000000e+00 : f32
    %76 = vector.broadcast %cst_44 : f32 to vector<2x32xf32>
    %77 = arith.addf %76, %75 : vector<2x32xf32>
    %78 = arith.divf %76, %77 : vector<2x32xf32>
    %79 = vector.extract_strided_slice %17 {offsets = [0, 1, 0], sizes = [2, 1, 32], strides = [1, 1, 1]} : vector<2x8x32xf32> to vector<2x1x32xf32>
    %80 = vector.shape_cast %79 : vector<2x1x32xf32> to vector<2x32xf32>
    %81 = arith.addf %80, %69 : vector<2x32xf32>
    %82 = arith.negf %81 : vector<2x32xf32>
    %83 = math.exp %82 : vector<2x32xf32>
    %cst_45 = arith.constant 1.000000e+00 : f32
    %84 = vector.broadcast %cst_45 : f32 to vector<2x32xf32>
    %85 = arith.addf %84, %83 : vector<2x32xf32>
    %86 = arith.divf %84, %85 : vector<2x32xf32>
    %87 = vector.extract_strided_slice %25 {offsets = [0, 1, 0], sizes = [2, 1, 32], strides = [1, 1, 1]} : vector<2x8x32xf32> to vector<2x1x32xf32>
    %88 = vector.shape_cast %87 : vector<2x1x32xf32> to vector<2x32xf32>
    %89 = vector.broadcast %32 : vector<1x32xf32> to vector<2x32xf32>
    %90 = arith.addf %70, %89 : vector<2x32xf32>
    %91 = arith.mulf %78, %90 : vector<2x32xf32>
    %92 = arith.addf %88, %91 : vector<2x32xf32>
    %93 = math.tanh %92 : vector<2x32xf32>
    %cst_46 = arith.constant 1.000000e+00 : f32
    %94 = vector.broadcast %cst_46 : f32 to vector<2x32xf32>
    %95 = arith.subf %94, %86 : vector<2x32xf32>
    %96 = arith.mulf %95, %93 : vector<2x32xf32>
    %97 = arith.mulf %86, %64 : vector<2x32xf32>
    %98 = arith.addf %96, %97 : vector<2x32xf32>
    %c0_47 = arith.constant 0 : index
    %c1_48 = arith.constant 1 : index
    %c0_49 = arith.constant 0 : index
    %99 = vector.load %arg9[%c0_47, %c1_48, %c0_49] : memref<2x8x32xf32, #tpu.memory_space<vmem>>, vector<2x1x32xf32>
    %100 = vector.shape_cast %99 : vector<2x1x32xf32> to vector<2x32xf32>
    %101 = vector.shape_cast %98 : vector<2x32xf32> to vector<2x1x32xf32>
    tpu.vector_store %arg9[%c0_47, %c1_48, %c0_49], %101 {strides = array<i32>} : memref<2x8x32xf32, #tpu.memory_space<vmem>>, vector<2x1x32xf32>,
    %cst_50 = arith.constant dense<0.000000e+00> : vector<2x32xf32>
    %102 = tpu.matmul %98, %27, %cst_50 {dimension_numbers = #tpu.dot_dimension_numbers<[1], [0], [0], [1], [0, 0, 1, 1], [], []>} : vector<2x32xf32>, vector<32x32xf32>, vector<2x32xf32> -> vector<2x32xf32>
    %cst_51 = arith.constant dense<0.000000e+00> : vector<2x32xf32>
    %103 = tpu.matmul %98, %29, %cst_51 {dimension_numbers = #tpu.dot_dimension_numbers<[1], [0], [0], [1], [0, 0, 1, 1], [], []>} : vector<2x32xf32>, vector<32x32xf32>, vector<2x32xf32> -> vector<2x32xf32>
    %cst_52 = arith.constant dense<0.000000e+00> : vector<2x32xf32>
    %104 = tpu.matmul %98, %31, %cst_52 {dimension_numbers = #tpu.dot_dimension_numbers<[1], [0], [0], [1], [0, 0, 1, 1], [], []>} : vector<2x32xf32>, vector<32x32xf32>, vector<2x32xf32> -> vector<2x32xf32>
    %105 = vector.extract_strided_slice %9 {offsets = [0, 2, 0], sizes = [2, 1, 32], strides = [1, 1, 1]} : vector<2x8x32xf32> to vector<2x1x32xf32>
    %106 = vector.shape_cast %105 : vector<2x1x32xf32> to vector<2x32xf32>
    %107 = arith.addf %106, %102 : vector<2x32xf32>
    %108 = arith.negf %107 : vector<2x32xf32>
    %109 = math.exp %108 : vector<2x32xf32>
    %cst_53 = arith.constant 1.000000e+00 : f32
    %110 = vector.broadcast %cst_53 : f32 to vector<2x32xf32>
    %111 = arith.addf %110, %109 : vector<2x32xf32>
    %112 = arith.divf %110, %111 : vector<2x32xf32>
    %113 = vector.extract_strided_slice %17 {offsets = [0, 2, 0], sizes = [2, 1, 32], strides = [1, 1, 1]} : vector<2x8x32xf32> to vector<2x1x32xf32>
    %114 = vector.shape_cast %113 : vector<2x1x32xf32> to vector<2x32xf32>
    %115 = arith.addf %114, %103 : vector<2x32xf32>
    %116 = arith.negf %115 : vector<2x32xf32>
    %117 = math.exp %116 : vector<2x32xf32>
    %cst_54 = arith.constant 1.000000e+00 : f32
    %118 = vector.broadcast %cst_54 : f32 to vector<2x32xf32>
    %119 = arith.addf %118, %117 : vector<2x32xf32>
    %120 = arith.divf %118, %119 : vector<2x32xf32>
    %121 = vector.extract_strided_slice %25 {offsets = [0, 2, 0], sizes = [2, 1, 32], strides = [1, 1, 1]} : vector<2x8x32xf32> to vector<2x1x32xf32>
    %122 = vector.shape_cast %121 : vector<2x1x32xf32> to vector<2x32xf32>
    %123 = vector.broadcast %32 : vector<1x32xf32> to vector<2x32xf32>
    %124 = arith.addf %104, %123 : vector<2x32xf32>
    %125 = arith.mulf %112, %124 : vector<2x32xf32>
    %126 = arith.addf %122, %125 : vector<2x32xf32>
    %127 = math.tanh %126 : vector<2x32xf32>
    %cst_55 = arith.constant 1.000000e+00 : f32
    %128 = vector.broadcast %cst_55 : f32 to vector<2x32xf32>
    %129 = arith.subf %128, %120 : vector<2x32xf32>
    %130 = arith.mulf %129, %127 : vector<2x32xf32>
    %131 = arith.mulf %120, %98 : vector<2x32xf32>
    %132 = arith.addf %130, %131 : vector<2x32xf32>
    %c0_56 = arith.constant 0 : index
    %c2_57 = arith.constant 2 : index
    %c0_58 = arith.constant 0 : index
    %133 = vector.load %arg9[%c0_56, %c2_57, %c0_58] : memref<2x8x32xf32, #tpu.memory_space<vmem>>, vector<2x1x32xf32>
    %134 = vector.shape_cast %133 : vector<2x1x32xf32> to vector<2x32xf32>
    %135 = vector.shape_cast %132 : vector<2x32xf32> to vector<2x1x32xf32>
    tpu.vector_store %arg9[%c0_56, %c2_57, %c0_58], %135 {strides = array<i32>} : memref<2x8x32xf32, #tpu.memory_space<vmem>>, vector<2x1x32xf32>,
    %cst_59 = arith.constant dense<0.000000e+00> : vector<2x32xf32>
    %136 = tpu.matmul %132, %27, %cst_59 {dimension_numbers = #tpu.dot_dimension_numbers<[1], [0], [0], [1], [0, 0, 1, 1], [], []>} : vector<2x32xf32>, vector<32x32xf32>, vector<2x32xf32> -> vector<2x32xf32>
    %cst_60 = arith.constant dense<0.000000e+00> : vector<2x32xf32>
    %137 = tpu.matmul %132, %29, %cst_60 {dimension_numbers = #tpu.dot_dimension_numbers<[1], [0], [0], [1], [0, 0, 1, 1], [], []>} : vector<2x32xf32>, vector<32x32xf32>, vector<2x32xf32> -> vector<2x32xf32>
    %cst_61 = arith.constant dense<0.000000e+00> : vector<2x32xf32>
    %138 = tpu.matmul %132, %31, %cst_61 {dimension_numbers = #tpu.dot_dimension_numbers<[1], [0], [0], [1], [0, 0, 1, 1], [], []>} : vector<2x32xf32>, vector<32x32xf32>, vector<2x32xf32> -> vector<2x32xf32>
    %139 = vector.extract_strided_slice %9 {offsets = [0, 3, 0], sizes = [2, 1, 32], strides = [1, 1, 1]} : vector<2x8x32xf32> to vector<2x1x32xf32>
    %140 = vector.shape_cast %139 : vector<2x1x32xf32> to vector<2x32xf32>
    %141 = arith.addf %140, %136 : vector<2x32xf32>
    %142 = arith.negf %141 : vector<2x32xf32>
    %143 = math.exp %142 : vector<2x32xf32>
    %cst_62 = arith.constant 1.000000e+00 : f32
    %144 = vector.broadcast %cst_62 : f32 to vector<2x32xf32>
    %145 = arith.addf %144, %143 : vector<2x32xf32>
    %146 = arith.divf %144, %145 : vector<2x32xf32>
    %147 = vector.extract_strided_slice %17 {offsets = [0, 3, 0], sizes = [2, 1, 32], strides = [1, 1, 1]} : vector<2x8x32xf32> to vector<2x1x32xf32>
    %148 = vector.shape_cast %147 : vector<2x1x32xf32> to vector<2x32xf32>
    %149 = arith.addf %148, %137 : vector<2x32xf32>
    %150 = arith.negf %149 : vector<2x32xf32>
    %151 = math.exp %150 : vector<2x32xf32>
    %cst_63 = arith.constant 1.000000e+00 : f32
    %152 = vector.broadcast %cst_63 : f32 to vector<2x32xf32>
    %153 = arith.addf %152, %151 : vector<2x32xf32>
    %154 = arith.divf %152, %153 : vector<2x32xf32>
    %155 = vector.extract_strided_slice %25 {offsets = [0, 3, 0], sizes = [2, 1, 32], strides = [1, 1, 1]} : vector<2x8x32xf32> to vector<2x1x32xf32>
    %156 = vector.shape_cast %155 : vector<2x1x32xf32> to vector<2x32xf32>
    %157 = vector.broadcast %32 : vector<1x32xf32> to vector<2x32xf32>
    %158 = arith.addf %138, %157 : vector<2x32xf32>
    %159 = arith.mulf %146, %158 : vector<2x32xf32>
    %160 = arith.addf %156, %159 : vector<2x32xf32>
    %161 = math.tanh %160 : vector<2x32xf32>
    %cst_64 = arith.constant 1.000000e+00 : f32
    %162 = vector.broadcast %cst_64 : f32 to vector<2x32xf32>
    %163 = arith.subf %162, %154 : vector<2x32xf32>
    %164 = arith.mulf %163, %161 : vector<2x32xf32>
    %165 = arith.mulf %154, %132 : vector<2x32xf32>
    %166 = arith.addf %164, %165 : vector<2x32xf32>
    %c0_65 = arith.constant 0 : index
    %c3 = arith.constant 3 : index
    %c0_66 = arith.constant 0 : index
    %167 = vector.load %arg9[%c0_65, %c3, %c0_66] : memref<2x8x32xf32, #tpu.memory_space<vmem>>, vector<2x1x32xf32>
    %168 = vector.shape_cast %167 : vector<2x1x32xf32> to vector<2x32xf32>
    %169 = vector.shape_cast %166 : vector<2x32xf32> to vector<2x1x32xf32>
    tpu.vector_store %arg9[%c0_65, %c3, %c0_66], %169 {strides = array<i32>} : memref<2x8x32xf32, #tpu.memory_space<vmem>>, vector<2x1x32xf32>,
    %cst_67 = arith.constant dense<0.000000e+00> : vector<2x32xf32>
    %170 = tpu.matmul %166, %27, %cst_67 {dimension_numbers = #tpu.dot_dimension_numbers<[1], [0], [0], [1], [0, 0, 1, 1], [], []>} : vector<2x32xf32>, vector<32x32xf32>, vector<2x32xf32> -> vector<2x32xf32>
    %cst_68 = arith.constant dense<0.000000e+00> : vector<2x32xf32>
    %171 = tpu.matmul %166, %29, %cst_68 {dimension_numbers = #tpu.dot_dimension_numbers<[1], [0], [0], [1], [0, 0, 1, 1], [], []>} : vector<2x32xf32>, vector<32x32xf32>, vector<2x32xf32> -> vector<2x32xf32>
    %cst_69 = arith.constant dense<0.000000e+00> : vector<2x32xf32>
    %172 = tpu.matmul %166, %31, %cst_69 {dimension_numbers = #tpu.dot_dimension_numbers<[1], [0], [0], [1], [0, 0, 1, 1], [], []>} : vector<2x32xf32>, vector<32x32xf32>, vector<2x32xf32> -> vector<2x32xf32>
    %173 = vector.extract_strided_slice %9 {offsets = [0, 4, 0], sizes = [2, 1, 32], strides = [1, 1, 1]} : vector<2x8x32xf32> to vector<2x1x32xf32>
    %174 = vector.shape_cast %173 : vector<2x1x32xf32> to vector<2x32xf32>
    %175 = arith.addf %174, %170 : vector<2x32xf32>
    %176 = arith.negf %175 : vector<2x32xf32>
    %177 = math.exp %176 : vector<2x32xf32>
    %cst_70 = arith.constant 1.000000e+00 : f32
    %178 = vector.broadcast %cst_70 : f32 to vector<2x32xf32>
    %179 = arith.addf %178, %177 : vector<2x32xf32>
    %180 = arith.divf %178, %179 : vector<2x32xf32>
    %181 = vector.extract_strided_slice %17 {offsets = [0, 4, 0], sizes = [2, 1, 32], strides = [1, 1, 1]} : vector<2x8x32xf32> to vector<2x1x32xf32>
    %182 = vector.shape_cast %181 : vector<2x1x32xf32> to vector<2x32xf32>
    %183 = arith.addf %182, %171 : vector<2x32xf32>
    %184 = arith.negf %183 : vector<2x32xf32>
    %185 = math.exp %184 : vector<2x32xf32>
    %cst_71 = arith.constant 1.000000e+00 : f32
    %186 = vector.broadcast %cst_71 : f32 to vector<2x32xf32>
    %187 = arith.addf %186, %185 : vector<2x32xf32>
    %188 = arith.divf %186, %187 : vector<2x32xf32>
    %189 = vector.extract_strided_slice %25 {offsets = [0, 4, 0], sizes = [2, 1, 32], strides = [1, 1, 1]} : vector<2x8x32xf32> to vector<2x1x32xf32>
    %190 = vector.shape_cast %189 : vector<2x1x32xf32> to vector<2x32xf32>
    %191 = vector.broadcast %32 : vector<1x32xf32> to vector<2x32xf32>
    %192 = arith.addf %172, %191 : vector<2x32xf32>
    %193 = arith.mulf %180, %192 : vector<2x32xf32>
    %194 = arith.addf %190, %193 : vector<2x32xf32>
    %195 = math.tanh %194 : vector<2x32xf32>
    %cst_72 = arith.constant 1.000000e+00 : f32
    %196 = vector.broadcast %cst_72 : f32 to vector<2x32xf32>
    %197 = arith.subf %196, %188 : vector<2x32xf32>
    %198 = arith.mulf %197, %195 : vector<2x32xf32>
    %199 = arith.mulf %188, %166 : vector<2x32xf32>
    %200 = arith.addf %198, %199 : vector<2x32xf32>
    %c0_73 = arith.constant 0 : index
    %c4 = arith.constant 4 : index
    %c0_74 = arith.constant 0 : index
    %201 = vector.load %arg9[%c0_73, %c4, %c0_74] : memref<2x8x32xf32, #tpu.memory_space<vmem>>, vector<2x1x32xf32>
    %202 = vector.shape_cast %201 : vector<2x1x32xf32> to vector<2x32xf32>
    %203 = vector.shape_cast %200 : vector<2x32xf32> to vector<2x1x32xf32>
    tpu.vector_store %arg9[%c0_73, %c4, %c0_74], %203 {strides = array<i32>} : memref<2x8x32xf32, #tpu.memory_space<vmem>>, vector<2x1x32xf32>,
    %cst_75 = arith.constant dense<0.000000e+00> : vector<2x32xf32>
    %204 = tpu.matmul %200, %27, %cst_75 {dimension_numbers = #tpu.dot_dimension_numbers<[1], [0], [0], [1], [0, 0, 1, 1], [], []>} : vector<2x32xf32>, vector<32x32xf32>, vector<2x32xf32> -> vector<2x32xf32>
    %cst_76 = arith.constant dense<0.000000e+00> : vector<2x32xf32>
    %205 = tpu.matmul %200, %29, %cst_76 {dimension_numbers = #tpu.dot_dimension_numbers<[1], [0], [0], [1], [0, 0, 1, 1], [], []>} : vector<2x32xf32>, vector<32x32xf32>, vector<2x32xf32> -> vector<2x32xf32>
    %cst_77 = arith.constant dense<0.000000e+00> : vector<2x32xf32>
    %206 = tpu.matmul %200, %31, %cst_77 {dimension_numbers = #tpu.dot_dimension_numbers<[1], [0], [0], [1], [0, 0, 1, 1], [], []>} : vector<2x32xf32>, vector<32x32xf32>, vector<2x32xf32> -> vector<2x32xf32>
    %207 = vector.extract_strided_slice %9 {offsets = [0, 5, 0], sizes = [2, 1, 32], strides = [1, 1, 1]} : vector<2x8x32xf32> to vector<2x1x32xf32>
    %208 = vector.shape_cast %207 : vector<2x1x32xf32> to vector<2x32xf32>
    %209 = arith.addf %208, %204 : vector<2x32xf32>
    %210 = arith.negf %209 : vector<2x32xf32>
    %211 = math.exp %210 : vector<2x32xf32>
    %cst_78 = arith.constant 1.000000e+00 : f32
    %212 = vector.broadcast %cst_78 : f32 to vector<2x32xf32>
    %213 = arith.addf %212, %211 : vector<2x32xf32>
    %214 = arith.divf %212, %213 : vector<2x32xf32>
    %215 = vector.extract_strided_slice %17 {offsets = [0, 5, 0], sizes = [2, 1, 32], strides = [1, 1, 1]} : vector<2x8x32xf32> to vector<2x1x32xf32>
    %216 = vector.shape_cast %215 : vector<2x1x32xf32> to vector<2x32xf32>
    %217 = arith.addf %216, %205 : vector<2x32xf32>
    %218 = arith.negf %217 : vector<2x32xf32>
    %219 = math.exp %218 : vector<2x32xf32>
    %cst_79 = arith.constant 1.000000e+00 : f32
    %220 = vector.broadcast %cst_79 : f32 to vector<2x32xf32>
    %221 = arith.addf %220, %219 : vector<2x32xf32>
    %222 = arith.divf %220, %221 : vector<2x32xf32>
    %223 = vector.extract_strided_slice %25 {offsets = [0, 5, 0], sizes = [2, 1, 32], strides = [1, 1, 1]} : vector<2x8x32xf32> to vector<2x1x32xf32>
    %224 = vector.shape_cast %223 : vector<2x1x32xf32> to vector<2x32xf32>
    %225 = vector.broadcast %32 : vector<1x32xf32> to vector<2x32xf32>
    %226 = arith.addf %206, %225 : vector<2x32xf32>
    %227 = arith.mulf %214, %226 : vector<2x32xf32>
    %228 = arith.addf %224, %227 : vector<2x32xf32>
    %229 = math.tanh %228 : vector<2x32xf32>
    %cst_80 = arith.constant 1.000000e+00 : f32
    %230 = vector.broadcast %cst_80 : f32 to vector<2x32xf32>
    %231 = arith.subf %230, %222 : vector<2x32xf32>
    %232 = arith.mulf %231, %229 : vector<2x32xf32>
    %233 = arith.mulf %222, %200 : vector<2x32xf32>
    %234 = arith.addf %232, %233 : vector<2x32xf32>
    %c0_81 = arith.constant 0 : index
    %c5 = arith.constant 5 : index
    %c0_82 = arith.constant 0 : index
    %235 = vector.load %arg9[%c0_81, %c5, %c0_82] : memref<2x8x32xf32, #tpu.memory_space<vmem>>, vector<2x1x32xf32>
    %236 = vector.shape_cast %235 : vector<2x1x32xf32> to vector<2x32xf32>
    %237 = vector.shape_cast %234 : vector<2x32xf32> to vector<2x1x32xf32>
    tpu.vector_store %arg9[%c0_81, %c5, %c0_82], %237 {strides = array<i32>} : memref<2x8x32xf32, #tpu.memory_space<vmem>>, vector<2x1x32xf32>,
    %cst_83 = arith.constant dense<0.000000e+00> : vector<2x32xf32>
    %238 = tpu.matmul %234, %27, %cst_83 {dimension_numbers = #tpu.dot_dimension_numbers<[1], [0], [0], [1], [0, 0, 1, 1], [], []>} : vector<2x32xf32>, vector<32x32xf32>, vector<2x32xf32> -> vector<2x32xf32>
    %cst_84 = arith.constant dense<0.000000e+00> : vector<2x32xf32>
    %239 = tpu.matmul %234, %29, %cst_84 {dimension_numbers = #tpu.dot_dimension_numbers<[1], [0], [0], [1], [0, 0, 1, 1], [], []>} : vector<2x32xf32>, vector<32x32xf32>, vector<2x32xf32> -> vector<2x32xf32>
    %cst_85 = arith.constant dense<0.000000e+00> : vector<2x32xf32>
    %240 = tpu.matmul %234, %31, %cst_85 {dimension_numbers = #tpu.dot_dimension_numbers<[1], [0], [0], [1], [0, 0, 1, 1], [], []>} : vector<2x32xf32>, vector<32x32xf32>, vector<2x32xf32> -> vector<2x32xf32>
    %241 = vector.extract_strided_slice %9 {offsets = [0, 6, 0], sizes = [2, 1, 32], strides = [1, 1, 1]} : vector<2x8x32xf32> to vector<2x1x32xf32>
    %242 = vector.shape_cast %241 : vector<2x1x32xf32> to vector<2x32xf32>
    %243 = arith.addf %242, %238 : vector<2x32xf32>
    %244 = arith.negf %243 : vector<2x32xf32>
    %245 = math.exp %244 : vector<2x32xf32>
    %cst_86 = arith.constant 1.000000e+00 : f32
    %246 = vector.broadcast %cst_86 : f32 to vector<2x32xf32>
    %247 = arith.addf %246, %245 : vector<2x32xf32>
    %248 = arith.divf %246, %247 : vector<2x32xf32>
    %249 = vector.extract_strided_slice %17 {offsets = [0, 6, 0], sizes = [2, 1, 32], strides = [1, 1, 1]} : vector<2x8x32xf32> to vector<2x1x32xf32>
    %250 = vector.shape_cast %249 : vector<2x1x32xf32> to vector<2x32xf32>
    %251 = arith.addf %250, %239 : vector<2x32xf32>
    %252 = arith.negf %251 : vector<2x32xf32>
    %253 = math.exp %252 : vector<2x32xf32>
    %cst_87 = arith.constant 1.000000e+00 : f32
    %254 = vector.broadcast %cst_87 : f32 to vector<2x32xf32>
    %255 = arith.addf %254, %253 : vector<2x32xf32>
    %256 = arith.divf %254, %255 : vector<2x32xf32>
    %257 = vector.extract_strided_slice %25 {offsets = [0, 6, 0], sizes = [2, 1, 32], strides = [1, 1, 1]} : vector<2x8x32xf32> to vector<2x1x32xf32>
    %258 = vector.shape_cast %257 : vector<2x1x32xf32> to vector<2x32xf32>
    %259 = vector.broadcast %32 : vector<1x32xf32> to vector<2x32xf32>
    %260 = arith.addf %240, %259 : vector<2x32xf32>
    %261 = arith.mulf %248, %260 : vector<2x32xf32>
    %262 = arith.addf %258, %261 : vector<2x32xf32>
    %263 = math.tanh %262 : vector<2x32xf32>
    %cst_88 = arith.constant 1.000000e+00 : f32
    %264 = vector.broadcast %cst_88 : f32 to vector<2x32xf32>
    %265 = arith.subf %264, %256 : vector<2x32xf32>
    %266 = arith.mulf %265, %263 : vector<2x32xf32>
    %267 = arith.mulf %256, %234 : vector<2x32xf32>
    %268 = arith.addf %266, %267 : vector<2x32xf32>
    %c0_89 = arith.constant 0 : index
    %c6 = arith.constant 6 : index
    %c0_90 = arith.constant 0 : index
    %269 = vector.load %arg9[%c0_89, %c6, %c0_90] : memref<2x8x32xf32, #tpu.memory_space<vmem>>, vector<2x1x32xf32>
    %270 = vector.shape_cast %269 : vector<2x1x32xf32> to vector<2x32xf32>
    %271 = vector.shape_cast %268 : vector<2x32xf32> to vector<2x1x32xf32>
    tpu.vector_store %arg9[%c0_89, %c6, %c0_90], %271 {strides = array<i32>} : memref<2x8x32xf32, #tpu.memory_space<vmem>>, vector<2x1x32xf32>,
    %cst_91 = arith.constant dense<0.000000e+00> : vector<2x32xf32>
    %272 = tpu.matmul %268, %27, %cst_91 {dimension_numbers = #tpu.dot_dimension_numbers<[1], [0], [0], [1], [0, 0, 1, 1], [], []>} : vector<2x32xf32>, vector<32x32xf32>, vector<2x32xf32> -> vector<2x32xf32>
    %cst_92 = arith.constant dense<0.000000e+00> : vector<2x32xf32>
    %273 = tpu.matmul %268, %29, %cst_92 {dimension_numbers = #tpu.dot_dimension_numbers<[1], [0], [0], [1], [0, 0, 1, 1], [], []>} : vector<2x32xf32>, vector<32x32xf32>, vector<2x32xf32> -> vector<2x32xf32>
    %cst_93 = arith.constant dense<0.000000e+00> : vector<2x32xf32>
    %274 = tpu.matmul %268, %31, %cst_93 {dimension_numbers = #tpu.dot_dimension_numbers<[1], [0], [0], [1], [0, 0, 1, 1], [], []>} : vector<2x32xf32>, vector<32x32xf32>, vector<2x32xf32> -> vector<2x32xf32>
    %275 = vector.extract_strided_slice %9 {offsets = [0, 7, 0], sizes = [2, 1, 32], strides = [1, 1, 1]} : vector<2x8x32xf32> to vector<2x1x32xf32>
    %276 = vector.shape_cast %275 : vector<2x1x32xf32> to vector<2x32xf32>
    %277 = arith.addf %276, %272 : vector<2x32xf32>
    %278 = arith.negf %277 : vector<2x32xf32>
    %279 = math.exp %278 : vector<2x32xf32>
    %cst_94 = arith.constant 1.000000e+00 : f32
    %280 = vector.broadcast %cst_94 : f32 to vector<2x32xf32>
    %281 = arith.addf %280, %279 : vector<2x32xf32>
    %282 = arith.divf %280, %281 : vector<2x32xf32>
    %283 = vector.extract_strided_slice %17 {offsets = [0, 7, 0], sizes = [2, 1, 32], strides = [1, 1, 1]} : vector<2x8x32xf32> to vector<2x1x32xf32>
    %284 = vector.shape_cast %283 : vector<2x1x32xf32> to vector<2x32xf32>
    %285 = arith.addf %284, %273 : vector<2x32xf32>
    %286 = arith.negf %285 : vector<2x32xf32>
    %287 = math.exp %286 : vector<2x32xf32>
    %cst_95 = arith.constant 1.000000e+00 : f32
    %288 = vector.broadcast %cst_95 : f32 to vector<2x32xf32>
    %289 = arith.addf %288, %287 : vector<2x32xf32>
    %290 = arith.divf %288, %289 : vector<2x32xf32>
    %291 = vector.extract_strided_slice %25 {offsets = [0, 7, 0], sizes = [2, 1, 32], strides = [1, 1, 1]} : vector<2x8x32xf32> to vector<2x1x32xf32>
    %292 = vector.shape_cast %291 : vector<2x1x32xf32> to vector<2x32xf32>
    %293 = vector.broadcast %32 : vector<1x32xf32> to vector<2x32xf32>
    %294 = arith.addf %274, %293 : vector<2x32xf32>
    %295 = arith.mulf %282, %294 : vector<2x32xf32>
    %296 = arith.addf %292, %295 : vector<2x32xf32>
    %297 = math.tanh %296 : vector<2x32xf32>
    %cst_96 = arith.constant 1.000000e+00 : f32
    %298 = vector.broadcast %cst_96 : f32 to vector<2x32xf32>
    %299 = arith.subf %298, %290 : vector<2x32xf32>
    %300 = arith.mulf %299, %297 : vector<2x32xf32>
    %301 = arith.mulf %290, %268 : vector<2x32xf32>
    %302 = arith.addf %300, %301 : vector<2x32xf32>
    %c0_97 = arith.constant 0 : index
    %c7 = arith.constant 7 : index
    %c0_98 = arith.constant 0 : index
    %303 = vector.load %arg9[%c0_97, %c7, %c0_98] : memref<2x8x32xf32, #tpu.memory_space<vmem>>, vector<2x1x32xf32>
    %304 = vector.shape_cast %303 : vector<2x1x32xf32> to vector<2x32xf32>
    %305 = vector.shape_cast %302 : vector<2x32xf32> to vector<2x1x32xf32>
    tpu.vector_store %arg9[%c0_97, %c7, %c0_98], %305 {strides = array<i32>} : memref<2x8x32xf32, #tpu.memory_space<vmem>>, vector<2x1x32xf32>,
    %c0_99 = arith.constant 0 : index
    %c0_100 = arith.constant 0 : index
    %c0_101 = arith.constant 0 : index
    %306 = vector.load %arg9[%c0_99, %c0_100, %c0_101] : memref<2x8x32xf32, #tpu.memory_space<vmem>>, vector<2x8x32xf32>
    %307 = vector.shape_cast %306 : vector<2x8x32xf32> to vector<16x32xf32>
    %c0_102 = arith.constant 0 : index
    %c0_103 = arith.constant 0 : index
    %c0_104 = arith.constant 0 : index
    %308 = vector.load %arg5[%c0_102, %c0_103, %c0_104] : memref<3x32x32xf32, #tpu.memory_space<vmem>>, vector<1x32x32xf32>
    %309 = vector.shape_cast %308 : vector<1x32x32xf32> to vector<32x32xf32>
    %cst_105 = arith.constant dense<0.000000e+00> : vector<16x32xf32>
    %310 = tpu.matmul %307, %309, %cst_105 {dimension_numbers = #tpu.dot_dimension_numbers<[1], [0], [0], [1], [0, 0, 1, 1], [], []>} : vector<16x32xf32>, vector<32x32xf32>, vector<16x32xf32> -> vector<16x32xf32>
    %c0_106 = arith.constant 0 : index
    %c0_107 = arith.constant 0 : index
    %c0_108 = arith.constant 0 : index
    %311 = vector.load %arg7[%c0_106, %c0_107, %c0_108] : memref<3x1x32xf32, #tpu.memory_space<vmem>>, vector<1x1x32xf32>
    %312 = vector.shape_cast %311 : vector<1x1x32xf32> to vector<1x32xf32>
    %313 = vector.broadcast %312 : vector<1x32xf32> to vector<16x32xf32>
    %314 = arith.addf %310, %313 : vector<16x32xf32>
    %315 = vector.shape_cast %314 : vector<16x32xf32> to vector<2x8x32xf32>
    %c1_109 = arith.constant 1 : index
    %c0_110 = arith.constant 0 : index
    %c0_111 = arith.constant 0 : index
    %316 = vector.load %arg5[%c1_109, %c0_110, %c0_111] : memref<3x32x32xf32, #tpu.memory_space<vmem>>, vector<1x32x32xf32>
    %317 = vector.shape_cast %316 : vector<1x32x32xf32> to vector<32x32xf32>
    %cst_112 = arith.constant dense<0.000000e+00> : vector<16x32xf32>
    %318 = tpu.matmul %307, %317, %cst_112 {dimension_numbers = #tpu.dot_dimension_numbers<[1], [0], [0], [1], [0, 0, 1, 1], [], []>} : vector<16x32xf32>, vector<32x32xf32>, vector<16x32xf32> -> vector<16x32xf32>
    %c1_113 = arith.constant 1 : index
    %c0_114 = arith.constant 0 : index
    %c0_115 = arith.constant 0 : index
    %319 = vector.load %arg7[%c1_113, %c0_114, %c0_115] : memref<3x1x32xf32, #tpu.memory_space<vmem>>, vector<1x1x32xf32>
    %320 = vector.shape_cast %319 : vector<1x1x32xf32> to vector<1x32xf32>
    %321 = vector.broadcast %320 : vector<1x32xf32> to vector<16x32xf32>
    %322 = arith.addf %318, %321 : vector<16x32xf32>
    %323 = vector.shape_cast %322 : vector<16x32xf32> to vector<2x8x32xf32>
    %c2_116 = arith.constant 2 : index
    %c0_117 = arith.constant 0 : index
    %c0_118 = arith.constant 0 : index
    %324 = vector.load %arg5[%c2_116, %c0_117, %c0_118] : memref<3x32x32xf32, #tpu.memory_space<vmem>>, vector<1x32x32xf32>
    %325 = vector.shape_cast %324 : vector<1x32x32xf32> to vector<32x32xf32>
    %cst_119 = arith.constant dense<0.000000e+00> : vector<16x32xf32>
    %326 = tpu.matmul %307, %325, %cst_119 {dimension_numbers = #tpu.dot_dimension_numbers<[1], [0], [0], [1], [0, 0, 1, 1], [], []>} : vector<16x32xf32>, vector<32x32xf32>, vector<16x32xf32> -> vector<16x32xf32>
    %c2_120 = arith.constant 2 : index
    %c0_121 = arith.constant 0 : index
    %c0_122 = arith.constant 0 : index
    %327 = vector.load %arg7[%c2_120, %c0_121, %c0_122] : memref<3x1x32xf32, #tpu.memory_space<vmem>>, vector<1x1x32xf32>
    %328 = vector.shape_cast %327 : vector<1x1x32xf32> to vector<1x32xf32>
    %329 = vector.broadcast %328 : vector<1x32xf32> to vector<16x32xf32>
    %330 = arith.addf %326, %329 : vector<16x32xf32>
    %331 = vector.shape_cast %330 : vector<16x32xf32> to vector<2x8x32xf32>
    %c0_123 = arith.constant 0 : index
    %c0_124 = arith.constant 0 : index
    %c0_125 = arith.constant 0 : index
    %332 = vector.load %arg6[%c0_123, %c0_124, %c0_125] : memref<3x32x32xf32, #tpu.memory_space<vmem>>, vector<1x32x32xf32>
    %333 = vector.shape_cast %332 : vector<1x32x32xf32> to vector<32x32xf32>
    %c1_126 = arith.constant 1 : index
    %c0_127 = arith.constant 0 : index
    %c0_128 = arith.constant 0 : index
    %334 = vector.load %arg6[%c1_126, %c0_127, %c0_128] : memref<3x32x32xf32, #tpu.memory_space<vmem>>, vector<1x32x32xf32>
    %335 = vector.shape_cast %334 : vector<1x32x32xf32> to vector<32x32xf32>
    %c2_129 = arith.constant 2 : index
    %c0_130 = arith.constant 0 : index
    %c0_131 = arith.constant 0 : index
    %336 = vector.load %arg6[%c2_129, %c0_130, %c0_131] : memref<3x32x32xf32, #tpu.memory_space<vmem>>, vector<1x32x32xf32>
    %337 = vector.shape_cast %336 : vector<1x32x32xf32> to vector<32x32xf32>
    %c0_132 = arith.constant 0 : index
    %c0_133 = arith.constant 0 : index
    %338 = vector.load %arg8[%c0_132, %c0_133] : memref<1x32xf32, #tpu.memory_space<vmem>>, vector<1x32xf32>
    %cst_134 = arith.constant 1.000000e+00 : f32
    %339 = vector.broadcast %cst_134 : f32 to vector<2x32xf32>
    %cst_135 = arith.constant dense<0.000000e+00> : vector<2x32xf32>
    %340 = tpu.matmul %339, %333, %cst_135 {dimension_numbers = #tpu.dot_dimension_numbers<[1], [0], [0], [1], [0, 0, 1, 1], [], []>} : vector<2x32xf32>, vector<32x32xf32>, vector<2x32xf32> -> vector<2x32xf32>
    %cst_136 = arith.constant dense<0.000000e+00> : vector<2x32xf32>
    %341 = tpu.matmul %339, %335, %cst_136 {dimension_numbers = #tpu.dot_dimension_numbers<[1], [0], [0], [1], [0, 0, 1, 1], [], []>} : vector<2x32xf32>, vector<32x32xf32>, vector<2x32xf32> -> vector<2x32xf32>
    %cst_137 = arith.constant dense<0.000000e+00> : vector<2x32xf32>
    %342 = tpu.matmul %339, %337, %cst_137 {dimension_numbers = #tpu.dot_dimension_numbers<[1], [0], [0], [1], [0, 0, 1, 1], [], []>} : vector<2x32xf32>, vector<32x32xf32>, vector<2x32xf32> -> vector<2x32xf32>
    %343 = vector.extract_strided_slice %315 {offsets = [0, 0, 0], sizes = [2, 1, 32], strides = [1, 1, 1]} : vector<2x8x32xf32> to vector<2x1x32xf32>
    %344 = vector.shape_cast %343 : vector<2x1x32xf32> to vector<2x32xf32>
    %345 = arith.addf %344, %340 : vector<2x32xf32>
    %346 = arith.negf %345 : vector<2x32xf32>
    %347 = math.exp %346 : vector<2x32xf32>
    %cst_138 = arith.constant 1.000000e+00 : f32
    %348 = vector.broadcast %cst_138 : f32 to vector<2x32xf32>
    %349 = arith.addf %348, %347 : vector<2x32xf32>
    %350 = arith.divf %348, %349 : vector<2x32xf32>
    %351 = vector.extract_strided_slice %323 {offsets = [0, 0, 0], sizes = [2, 1, 32], strides = [1, 1, 1]} : vector<2x8x32xf32> to vector<2x1x32xf32>
    %352 = vector.shape_cast %351 : vector<2x1x32xf32> to vector<2x32xf32>
    %353 = arith.addf %352, %341 : vector<2x32xf32>
    %354 = arith.negf %353 : vector<2x32xf32>
    %355 = math.exp %354 : vector<2x32xf32>
    %cst_139 = arith.constant 1.000000e+00 : f32
    %356 = vector.broadcast %cst_139 : f32 to vector<2x32xf32>
    %357 = arith.addf %356, %355 : vector<2x32xf32>
    %358 = arith.divf %356, %357 : vector<2x32xf32>
    %359 = vector.extract_strided_slice %331 {offsets = [0, 0, 0], sizes = [2, 1, 32], strides = [1, 1, 1]} : vector<2x8x32xf32> to vector<2x1x32xf32>
    %360 = vector.shape_cast %359 : vector<2x1x32xf32> to vector<2x32xf32>
    %361 = vector.broadcast %338 : vector<1x32xf32> to vector<2x32xf32>
    %362 = arith.addf %342, %361 : vector<2x32xf32>
    %363 = arith.mulf %350, %362 : vector<2x32xf32>
    %364 = arith.addf %360, %363 : vector<2x32xf32>
    %365 = math.tanh %364 : vector<2x32xf32>
    %cst_140 = arith.constant 1.000000e+00 : f32
    %366 = vector.broadcast %cst_140 : f32 to vector<2x32xf32>
    %367 = arith.subf %366, %358 : vector<2x32xf32>
    %368 = arith.mulf %367, %365 : vector<2x32xf32>
    %369 = arith.mulf %358, %339 : vector<2x32xf32>
    %370 = arith.addf %368, %369 : vector<2x32xf32>
    %c0_141 = arith.constant 0 : index
    %c0_142 = arith.constant 0 : index
    %c0_143 = arith.constant 0 : index
    %371 = vector.load %arg9[%c0_141, %c0_142, %c0_143] : memref<2x8x32xf32, #tpu.memory_space<vmem>>, vector<2x1x32xf32>
    %372 = vector.shape_cast %371 : vector<2x1x32xf32> to vector<2x32xf32>
    %373 = vector.shape_cast %370 : vector<2x32xf32> to vector<2x1x32xf32>
    tpu.vector_store %arg9[%c0_141, %c0_142, %c0_143], %373 {strides = array<i32>} : memref<2x8x32xf32, #tpu.memory_space<vmem>>, vector<2x1x32xf32>,
    %cst_144 = arith.constant dense<0.000000e+00> : vector<2x32xf32>
    %374 = tpu.matmul %370, %333, %cst_144 {dimension_numbers = #tpu.dot_dimension_numbers<[1], [0], [0], [1], [0, 0, 1, 1], [], []>} : vector<2x32xf32>, vector<32x32xf32>, vector<2x32xf32> -> vector<2x32xf32>
    %cst_145 = arith.constant dense<0.000000e+00> : vector<2x32xf32>
    %375 = tpu.matmul %370, %335, %cst_145 {dimension_numbers = #tpu.dot_dimension_numbers<[1], [0], [0], [1], [0, 0, 1, 1], [], []>} : vector<2x32xf32>, vector<32x32xf32>, vector<2x32xf32> -> vector<2x32xf32>
    %cst_146 = arith.constant dense<0.000000e+00> : vector<2x32xf32>
    %376 = tpu.matmul %370, %337, %cst_146 {dimension_numbers = #tpu.dot_dimension_numbers<[1], [0], [0], [1], [0, 0, 1, 1], [], []>} : vector<2x32xf32>, vector<32x32xf32>, vector<2x32xf32> -> vector<2x32xf32>
    %377 = vector.extract_strided_slice %315 {offsets = [0, 1, 0], sizes = [2, 1, 32], strides = [1, 1, 1]} : vector<2x8x32xf32> to vector<2x1x32xf32>
    %378 = vector.shape_cast %377 : vector<2x1x32xf32> to vector<2x32xf32>
    %379 = arith.addf %378, %374 : vector<2x32xf32>
    %380 = arith.negf %379 : vector<2x32xf32>
    %381 = math.exp %380 : vector<2x32xf32>
    %cst_147 = arith.constant 1.000000e+00 : f32
    %382 = vector.broadcast %cst_147 : f32 to vector<2x32xf32>
    %383 = arith.addf %382, %381 : vector<2x32xf32>
    %384 = arith.divf %382, %383 : vector<2x32xf32>
    %385 = vector.extract_strided_slice %323 {offsets = [0, 1, 0], sizes = [2, 1, 32], strides = [1, 1, 1]} : vector<2x8x32xf32> to vector<2x1x32xf32>
    %386 = vector.shape_cast %385 : vector<2x1x32xf32> to vector<2x32xf32>
    %387 = arith.addf %386, %375 : vector<2x32xf32>
    %388 = arith.negf %387 : vector<2x32xf32>
    %389 = math.exp %388 : vector<2x32xf32>
    %cst_148 = arith.constant 1.000000e+00 : f32
    %390 = vector.broadcast %cst_148 : f32 to vector<2x32xf32>
    %391 = arith.addf %390, %389 : vector<2x32xf32>
    %392 = arith.divf %390, %391 : vector<2x32xf32>
    %393 = vector.extract_strided_slice %331 {offsets = [0, 1, 0], sizes = [2, 1, 32], strides = [1, 1, 1]} : vector<2x8x32xf32> to vector<2x1x32xf32>
    %394 = vector.shape_cast %393 : vector<2x1x32xf32> to vector<2x32xf32>
    %395 = vector.broadcast %338 : vector<1x32xf32> to vector<2x32xf32>
    %396 = arith.addf %376, %395 : vector<2x32xf32>
    %397 = arith.mulf %384, %396 : vector<2x32xf32>
    %398 = arith.addf %394, %397 : vector<2x32xf32>
    %399 = math.tanh %398 : vector<2x32xf32>
    %cst_149 = arith.constant 1.000000e+00 : f32
    %400 = vector.broadcast %cst_149 : f32 to vector<2x32xf32>
    %401 = arith.subf %400, %392 : vector<2x32xf32>
    %402 = arith.mulf %401, %399 : vector<2x32xf32>
    %403 = arith.mulf %392, %370 : vector<2x32xf32>
    %404 = arith.addf %402, %403 : vector<2x32xf32>
    %c0_150 = arith.constant 0 : index
    %c1_151 = arith.constant 1 : index
    %c0_152 = arith.constant 0 : index
    %405 = vector.load %arg9[%c0_150, %c1_151, %c0_152] : memref<2x8x32xf32, #tpu.memory_space<vmem>>, vector<2x1x32xf32>
    %406 = vector.shape_cast %405 : vector<2x1x32xf32> to vector<2x32xf32>
    %407 = vector.shape_cast %404 : vector<2x32xf32> to vector<2x1x32xf32>
    tpu.vector_store %arg9[%c0_150, %c1_151, %c0_152], %407 {strides = array<i32>} : memref<2x8x32xf32, #tpu.memory_space<vmem>>, vector<2x1x32xf32>,
    %cst_153 = arith.constant dense<0.000000e+00> : vector<2x32xf32>
    %408 = tpu.matmul %404, %333, %cst_153 {dimension_numbers = #tpu.dot_dimension_numbers<[1], [0], [0], [1], [0, 0, 1, 1], [], []>} : vector<2x32xf32>, vector<32x32xf32>, vector<2x32xf32> -> vector<2x32xf32>
    %cst_154 = arith.constant dense<0.000000e+00> : vector<2x32xf32>
    %409 = tpu.matmul %404, %335, %cst_154 {dimension_numbers = #tpu.dot_dimension_numbers<[1], [0], [0], [1], [0, 0, 1, 1], [], []>} : vector<2x32xf32>, vector<32x32xf32>, vector<2x32xf32> -> vector<2x32xf32>
    %cst_155 = arith.constant dense<0.000000e+00> : vector<2x32xf32>
    %410 = tpu.matmul %404, %337, %cst_155 {dimension_numbers = #tpu.dot_dimension_numbers<[1], [0], [0], [1], [0, 0, 1, 1], [], []>} : vector<2x32xf32>, vector<32x32xf32>, vector<2x32xf32> -> vector<2x32xf32>
    %411 = vector.extract_strided_slice %315 {offsets = [0, 2, 0], sizes = [2, 1, 32], strides = [1, 1, 1]} : vector<2x8x32xf32> to vector<2x1x32xf32>
    %412 = vector.shape_cast %411 : vector<2x1x32xf32> to vector<2x32xf32>
    %413 = arith.addf %412, %408 : vector<2x32xf32>
    %414 = arith.negf %413 : vector<2x32xf32>
    %415 = math.exp %414 : vector<2x32xf32>
    %cst_156 = arith.constant 1.000000e+00 : f32
    %416 = vector.broadcast %cst_156 : f32 to vector<2x32xf32>
    %417 = arith.addf %416, %415 : vector<2x32xf32>
    %418 = arith.divf %416, %417 : vector<2x32xf32>
    %419 = vector.extract_strided_slice %323 {offsets = [0, 2, 0], sizes = [2, 1, 32], strides = [1, 1, 1]} : vector<2x8x32xf32> to vector<2x1x32xf32>
    %420 = vector.shape_cast %419 : vector<2x1x32xf32> to vector<2x32xf32>
    %421 = arith.addf %420, %409 : vector<2x32xf32>
    %422 = arith.negf %421 : vector<2x32xf32>
    %423 = math.exp %422 : vector<2x32xf32>
    %cst_157 = arith.constant 1.000000e+00 : f32
    %424 = vector.broadcast %cst_157 : f32 to vector<2x32xf32>
    %425 = arith.addf %424, %423 : vector<2x32xf32>
    %426 = arith.divf %424, %425 : vector<2x32xf32>
    %427 = vector.extract_strided_slice %331 {offsets = [0, 2, 0], sizes = [2, 1, 32], strides = [1, 1, 1]} : vector<2x8x32xf32> to vector<2x1x32xf32>
    %428 = vector.shape_cast %427 : vector<2x1x32xf32> to vector<2x32xf32>
    %429 = vector.broadcast %338 : vector<1x32xf32> to vector<2x32xf32>
    %430 = arith.addf %410, %429 : vector<2x32xf32>
    %431 = arith.mulf %418, %430 : vector<2x32xf32>
    %432 = arith.addf %428, %431 : vector<2x32xf32>
    %433 = math.tanh %432 : vector<2x32xf32>
    %cst_158 = arith.constant 1.000000e+00 : f32
    %434 = vector.broadcast %cst_158 : f32 to vector<2x32xf32>
    %435 = arith.subf %434, %426 : vector<2x32xf32>
    %436 = arith.mulf %435, %433 : vector<2x32xf32>
    %437 = arith.mulf %426, %404 : vector<2x32xf32>
    %438 = arith.addf %436, %437 : vector<2x32xf32>
    %c0_159 = arith.constant 0 : index
    %c2_160 = arith.constant 2 : index
    %c0_161 = arith.constant 0 : index
    %439 = vector.load %arg9[%c0_159, %c2_160, %c0_161] : memref<2x8x32xf32, #tpu.memory_space<vmem>>, vector<2x1x32xf32>
    %440 = vector.shape_cast %439 : vector<2x1x32xf32> to vector<2x32xf32>
    %441 = vector.shape_cast %438 : vector<2x32xf32> to vector<2x1x32xf32>
    tpu.vector_store %arg9[%c0_159, %c2_160, %c0_161], %441 {strides = array<i32>} : memref<2x8x32xf32, #tpu.memory_space<vmem>>, vector<2x1x32xf32>,
    %cst_162 = arith.constant dense<0.000000e+00> : vector<2x32xf32>
    %442 = tpu.matmul %438, %333, %cst_162 {dimension_numbers = #tpu.dot_dimension_numbers<[1], [0], [0], [1], [0, 0, 1, 1], [], []>} : vector<2x32xf32>, vector<32x32xf32>, vector<2x32xf32> -> vector<2x32xf32>
    %cst_163 = arith.constant dense<0.000000e+00> : vector<2x32xf32>
    %443 = tpu.matmul %438, %335, %cst_163 {dimension_numbers = #tpu.dot_dimension_numbers<[1], [0], [0], [1], [0, 0, 1, 1], [], []>} : vector<2x32xf32>, vector<32x32xf32>, vector<2x32xf32> -> vector<2x32xf32>
    %cst_164 = arith.constant dense<0.000000e+00> : vector<2x32xf32>
    %444 = tpu.matmul %438, %337, %cst_164 {dimension_numbers = #tpu.dot_dimension_numbers<[1], [0], [0], [1], [0, 0, 1, 1], [], []>} : vector<2x32xf32>, vector<32x32xf32>, vector<2x32xf32> -> vector<2x32xf32>
    %445 = vector.extract_strided_slice %315 {offsets = [0, 3, 0], sizes = [2, 1, 32], strides = [1, 1, 1]} : vector<2x8x32xf32> to vector<2x1x32xf32>
    %446 = vector.shape_cast %445 : vector<2x1x32xf32> to vector<2x32xf32>
    %447 = arith.addf %446, %442 : vector<2x32xf32>
    %448 = arith.negf %447 : vector<2x32xf32>
    %449 = math.exp %448 : vector<2x32xf32>
    %cst_165 = arith.constant 1.000000e+00 : f32
    %450 = vector.broadcast %cst_165 : f32 to vector<2x32xf32>
    %451 = arith.addf %450, %449 : vector<2x32xf32>
    %452 = arith.divf %450, %451 : vector<2x32xf32>
    %453 = vector.extract_strided_slice %323 {offsets = [0, 3, 0], sizes = [2, 1, 32], strides = [1, 1, 1]} : vector<2x8x32xf32> to vector<2x1x32xf32>
    %454 = vector.shape_cast %453 : vector<2x1x32xf32> to vector<2x32xf32>
    %455 = arith.addf %454, %443 : vector<2x32xf32>
    %456 = arith.negf %455 : vector<2x32xf32>
    %457 = math.exp %456 : vector<2x32xf32>
    %cst_166 = arith.constant 1.000000e+00 : f32
    %458 = vector.broadcast %cst_166 : f32 to vector<2x32xf32>
    %459 = arith.addf %458, %457 : vector<2x32xf32>
    %460 = arith.divf %458, %459 : vector<2x32xf32>
    %461 = vector.extract_strided_slice %331 {offsets = [0, 3, 0], sizes = [2, 1, 32], strides = [1, 1, 1]} : vector<2x8x32xf32> to vector<2x1x32xf32>
    %462 = vector.shape_cast %461 : vector<2x1x32xf32> to vector<2x32xf32>
    %463 = vector.broadcast %338 : vector<1x32xf32> to vector<2x32xf32>
    %464 = arith.addf %444, %463 : vector<2x32xf32>
    %465 = arith.mulf %452, %464 : vector<2x32xf32>
    %466 = arith.addf %462, %465 : vector<2x32xf32>
    %467 = math.tanh %466 : vector<2x32xf32>
    %cst_167 = arith.constant 1.000000e+00 : f32
    %468 = vector.broadcast %cst_167 : f32 to vector<2x32xf32>
    %469 = arith.subf %468, %460 : vector<2x32xf32>
    %470 = arith.mulf %469, %467 : vector<2x32xf32>
    %471 = arith.mulf %460, %438 : vector<2x32xf32>
    %472 = arith.addf %470, %471 : vector<2x32xf32>
    %c0_168 = arith.constant 0 : index
    %c3_169 = arith.constant 3 : index
    %c0_170 = arith.constant 0 : index
    %473 = vector.load %arg9[%c0_168, %c3_169, %c0_170] : memref<2x8x32xf32, #tpu.memory_space<vmem>>, vector<2x1x32xf32>
    %474 = vector.shape_cast %473 : vector<2x1x32xf32> to vector<2x32xf32>
    %475 = vector.shape_cast %472 : vector<2x32xf32> to vector<2x1x32xf32>
    tpu.vector_store %arg9[%c0_168, %c3_169, %c0_170], %475 {strides = array<i32>} : memref<2x8x32xf32, #tpu.memory_space<vmem>>, vector<2x1x32xf32>,
    %cst_171 = arith.constant dense<0.000000e+00> : vector<2x32xf32>
    %476 = tpu.matmul %472, %333, %cst_171 {dimension_numbers = #tpu.dot_dimension_numbers<[1], [0], [0], [1], [0, 0, 1, 1], [], []>} : vector<2x32xf32>, vector<32x32xf32>, vector<2x32xf32> -> vector<2x32xf32>
    %cst_172 = arith.constant dense<0.000000e+00> : vector<2x32xf32>
    %477 = tpu.matmul %472, %335, %cst_172 {dimension_numbers = #tpu.dot_dimension_numbers<[1], [0], [0], [1], [0, 0, 1, 1], [], []>} : vector<2x32xf32>, vector<32x32xf32>, vector<2x32xf32> -> vector<2x32xf32>
    %cst_173 = arith.constant dense<0.000000e+00> : vector<2x32xf32>
    %478 = tpu.matmul %472, %337, %cst_173 {dimension_numbers = #tpu.dot_dimension_numbers<[1], [0], [0], [1], [0, 0, 1, 1], [], []>} : vector<2x32xf32>, vector<32x32xf32>, vector<2x32xf32> -> vector<2x32xf32>
    %479 = vector.extract_strided_slice %315 {offsets = [0, 4, 0], sizes = [2, 1, 32], strides = [1, 1, 1]} : vector<2x8x32xf32> to vector<2x1x32xf32>
    %480 = vector.shape_cast %479 : vector<2x1x32xf32> to vector<2x32xf32>
    %481 = arith.addf %480, %476 : vector<2x32xf32>
    %482 = arith.negf %481 : vector<2x32xf32>
    %483 = math.exp %482 : vector<2x32xf32>
    %cst_174 = arith.constant 1.000000e+00 : f32
    %484 = vector.broadcast %cst_174 : f32 to vector<2x32xf32>
    %485 = arith.addf %484, %483 : vector<2x32xf32>
    %486 = arith.divf %484, %485 : vector<2x32xf32>
    %487 = vector.extract_strided_slice %323 {offsets = [0, 4, 0], sizes = [2, 1, 32], strides = [1, 1, 1]} : vector<2x8x32xf32> to vector<2x1x32xf32>
    %488 = vector.shape_cast %487 : vector<2x1x32xf32> to vector<2x32xf32>
    %489 = arith.addf %488, %477 : vector<2x32xf32>
    %490 = arith.negf %489 : vector<2x32xf32>
    %491 = math.exp %490 : vector<2x32xf32>
    %cst_175 = arith.constant 1.000000e+00 : f32
    %492 = vector.broadcast %cst_175 : f32 to vector<2x32xf32>
    %493 = arith.addf %492, %491 : vector<2x32xf32>
    %494 = arith.divf %492, %493 : vector<2x32xf32>
    %495 = vector.extract_strided_slice %331 {offsets = [0, 4, 0], sizes = [2, 1, 32], strides = [1, 1, 1]} : vector<2x8x32xf32> to vector<2x1x32xf32>
    %496 = vector.shape_cast %495 : vector<2x1x32xf32> to vector<2x32xf32>
    %497 = vector.broadcast %338 : vector<1x32xf32> to vector<2x32xf32>
    %498 = arith.addf %478, %497 : vector<2x32xf32>
    %499 = arith.mulf %486, %498 : vector<2x32xf32>
    %500 = arith.addf %496, %499 : vector<2x32xf32>
    %501 = math.tanh %500 : vector<2x32xf32>
    %cst_176 = arith.constant 1.000000e+00 : f32
    %502 = vector.broadcast %cst_176 : f32 to vector<2x32xf32>
    %503 = arith.subf %502, %494 : vector<2x32xf32>
    %504 = arith.mulf %503, %501 : vector<2x32xf32>
    %505 = arith.mulf %494, %472 : vector<2x32xf32>
    %506 = arith.addf %504, %505 : vector<2x32xf32>
    %c0_177 = arith.constant 0 : index
    %c4_178 = arith.constant 4 : index
    %c0_179 = arith.constant 0 : index
    %507 = vector.load %arg9[%c0_177, %c4_178, %c0_179] : memref<2x8x32xf32, #tpu.memory_space<vmem>>, vector<2x1x32xf32>
    %508 = vector.shape_cast %507 : vector<2x1x32xf32> to vector<2x32xf32>
    %509 = vector.shape_cast %506 : vector<2x32xf32> to vector<2x1x32xf32>
    tpu.vector_store %arg9[%c0_177, %c4_178, %c0_179], %509 {strides = array<i32>} : memref<2x8x32xf32, #tpu.memory_space<vmem>>, vector<2x1x32xf32>,
    %cst_180 = arith.constant dense<0.000000e+00> : vector<2x32xf32>
    %510 = tpu.matmul %506, %333, %cst_180 {dimension_numbers = #tpu.dot_dimension_numbers<[1], [0], [0], [1], [0, 0, 1, 1], [], []>} : vector<2x32xf32>, vector<32x32xf32>, vector<2x32xf32> -> vector<2x32xf32>
    %cst_181 = arith.constant dense<0.000000e+00> : vector<2x32xf32>
    %511 = tpu.matmul %506, %335, %cst_181 {dimension_numbers = #tpu.dot_dimension_numbers<[1], [0], [0], [1], [0, 0, 1, 1], [], []>} : vector<2x32xf32>, vector<32x32xf32>, vector<2x32xf32> -> vector<2x32xf32>
    %cst_182 = arith.constant dense<0.000000e+00> : vector<2x32xf32>
    %512 = tpu.matmul %506, %337, %cst_182 {dimension_numbers = #tpu.dot_dimension_numbers<[1], [0], [0], [1], [0, 0, 1, 1], [], []>} : vector<2x32xf32>, vector<32x32xf32>, vector<2x32xf32> -> vector<2x32xf32>
    %513 = vector.extract_strided_slice %315 {offsets = [0, 5, 0], sizes = [2, 1, 32], strides = [1, 1, 1]} : vector<2x8x32xf32> to vector<2x1x32xf32>
    %514 = vector.shape_cast %513 : vector<2x1x32xf32> to vector<2x32xf32>
    %515 = arith.addf %514, %510 : vector<2x32xf32>
    %516 = arith.negf %515 : vector<2x32xf32>
    %517 = math.exp %516 : vector<2x32xf32>
    %cst_183 = arith.constant 1.000000e+00 : f32
    %518 = vector.broadcast %cst_183 : f32 to vector<2x32xf32>
    %519 = arith.addf %518, %517 : vector<2x32xf32>
    %520 = arith.divf %518, %519 : vector<2x32xf32>
    %521 = vector.extract_strided_slice %323 {offsets = [0, 5, 0], sizes = [2, 1, 32], strides = [1, 1, 1]} : vector<2x8x32xf32> to vector<2x1x32xf32>
    %522 = vector.shape_cast %521 : vector<2x1x32xf32> to vector<2x32xf32>
    %523 = arith.addf %522, %511 : vector<2x32xf32>
    %524 = arith.negf %523 : vector<2x32xf32>
    %525 = math.exp %524 : vector<2x32xf32>
    %cst_184 = arith.constant 1.000000e+00 : f32
    %526 = vector.broadcast %cst_184 : f32 to vector<2x32xf32>
    %527 = arith.addf %526, %525 : vector<2x32xf32>
    %528 = arith.divf %526, %527 : vector<2x32xf32>
    %529 = vector.extract_strided_slice %331 {offsets = [0, 5, 0], sizes = [2, 1, 32], strides = [1, 1, 1]} : vector<2x8x32xf32> to vector<2x1x32xf32>
    %530 = vector.shape_cast %529 : vector<2x1x32xf32> to vector<2x32xf32>
    %531 = vector.broadcast %338 : vector<1x32xf32> to vector<2x32xf32>
    %532 = arith.addf %512, %531 : vector<2x32xf32>
    %533 = arith.mulf %520, %532 : vector<2x32xf32>
    %534 = arith.addf %530, %533 : vector<2x32xf32>
    %535 = math.tanh %534 : vector<2x32xf32>
    %cst_185 = arith.constant 1.000000e+00 : f32
    %536 = vector.broadcast %cst_185 : f32 to vector<2x32xf32>
    %537 = arith.subf %536, %528 : vector<2x32xf32>
    %538 = arith.mulf %537, %535 : vector<2x32xf32>
    %539 = arith.mulf %528, %506 : vector<2x32xf32>
    %540 = arith.addf %538, %539 : vector<2x32xf32>
    %c0_186 = arith.constant 0 : index
    %c5_187 = arith.constant 5 : index
    %c0_188 = arith.constant 0 : index
    %541 = vector.load %arg9[%c0_186, %c5_187, %c0_188] : memref<2x8x32xf32, #tpu.memory_space<vmem>>, vector<2x1x32xf32>
    %542 = vector.shape_cast %541 : vector<2x1x32xf32> to vector<2x32xf32>
    %543 = vector.shape_cast %540 : vector<2x32xf32> to vector<2x1x32xf32>
    tpu.vector_store %arg9[%c0_186, %c5_187, %c0_188], %543 {strides = array<i32>} : memref<2x8x32xf32, #tpu.memory_space<vmem>>, vector<2x1x32xf32>,
    %cst_189 = arith.constant dense<0.000000e+00> : vector<2x32xf32>
    %544 = tpu.matmul %540, %333, %cst_189 {dimension_numbers = #tpu.dot_dimension_numbers<[1], [0], [0], [1], [0, 0, 1, 1], [], []>} : vector<2x32xf32>, vector<32x32xf32>, vector<2x32xf32> -> vector<2x32xf32>
    %cst_190 = arith.constant dense<0.000000e+00> : vector<2x32xf32>
    %545 = tpu.matmul %540, %335, %cst_190 {dimension_numbers = #tpu.dot_dimension_numbers<[1], [0], [0], [1], [0, 0, 1, 1], [], []>} : vector<2x32xf32>, vector<32x32xf32>, vector<2x32xf32> -> vector<2x32xf32>
    %cst_191 = arith.constant dense<0.000000e+00> : vector<2x32xf32>
    %546 = tpu.matmul %540, %337, %cst_191 {dimension_numbers = #tpu.dot_dimension_numbers<[1], [0], [0], [1], [0, 0, 1, 1], [], []>} : vector<2x32xf32>, vector<32x32xf32>, vector<2x32xf32> -> vector<2x32xf32>
    %547 = vector.extract_strided_slice %315 {offsets = [0, 6, 0], sizes = [2, 1, 32], strides = [1, 1, 1]} : vector<2x8x32xf32> to vector<2x1x32xf32>
    %548 = vector.shape_cast %547 : vector<2x1x32xf32> to vector<2x32xf32>
    %549 = arith.addf %548, %544 : vector<2x32xf32>
    %550 = arith.negf %549 : vector<2x32xf32>
    %551 = math.exp %550 : vector<2x32xf32>
    %cst_192 = arith.constant 1.000000e+00 : f32
    %552 = vector.broadcast %cst_192 : f32 to vector<2x32xf32>
    %553 = arith.addf %552, %551 : vector<2x32xf32>
    %554 = arith.divf %552, %553 : vector<2x32xf32>
    %555 = vector.extract_strided_slice %323 {offsets = [0, 6, 0], sizes = [2, 1, 32], strides = [1, 1, 1]} : vector<2x8x32xf32> to vector<2x1x32xf32>
    %556 = vector.shape_cast %555 : vector<2x1x32xf32> to vector<2x32xf32>
    %557 = arith.addf %556, %545 : vector<2x32xf32>
    %558 = arith.negf %557 : vector<2x32xf32>
    %559 = math.exp %558 : vector<2x32xf32>
    %cst_193 = arith.constant 1.000000e+00 : f32
    %560 = vector.broadcast %cst_193 : f32 to vector<2x32xf32>
    %561 = arith.addf %560, %559 : vector<2x32xf32>
    %562 = arith.divf %560, %561 : vector<2x32xf32>
    %563 = vector.extract_strided_slice %331 {offsets = [0, 6, 0], sizes = [2, 1, 32], strides = [1, 1, 1]} : vector<2x8x32xf32> to vector<2x1x32xf32>
    %564 = vector.shape_cast %563 : vector<2x1x32xf32> to vector<2x32xf32>
    %565 = vector.broadcast %338 : vector<1x32xf32> to vector<2x32xf32>
    %566 = arith.addf %546, %565 : vector<2x32xf32>
    %567 = arith.mulf %554, %566 : vector<2x32xf32>
    %568 = arith.addf %564, %567 : vector<2x32xf32>
    %569 = math.tanh %568 : vector<2x32xf32>
    %cst_194 = arith.constant 1.000000e+00 : f32
    %570 = vector.broadcast %cst_194 : f32 to vector<2x32xf32>
    %571 = arith.subf %570, %562 : vector<2x32xf32>
    %572 = arith.mulf %571, %569 : vector<2x32xf32>
    %573 = arith.mulf %562, %540 : vector<2x32xf32>
    %574 = arith.addf %572, %573 : vector<2x32xf32>
    %c0_195 = arith.constant 0 : index
    %c6_196 = arith.constant 6 : index
    %c0_197 = arith.constant 0 : index
    %575 = vector.load %arg9[%c0_195, %c6_196, %c0_197] : memref<2x8x32xf32, #tpu.memory_space<vmem>>, vector<2x1x32xf32>
    %576 = vector.shape_cast %575 : vector<2x1x32xf32> to vector<2x32xf32>
    %577 = vector.shape_cast %574 : vector<2x32xf32> to vector<2x1x32xf32>
    tpu.vector_store %arg9[%c0_195, %c6_196, %c0_197], %577 {strides = array<i32>} : memref<2x8x32xf32, #tpu.memory_space<vmem>>, vector<2x1x32xf32>,
    %cst_198 = arith.constant dense<0.000000e+00> : vector<2x32xf32>
    %578 = tpu.matmul %574, %333, %cst_198 {dimension_numbers = #tpu.dot_dimension_numbers<[1], [0], [0], [1], [0, 0, 1, 1], [], []>} : vector<2x32xf32>, vector<32x32xf32>, vector<2x32xf32> -> vector<2x32xf32>
    %cst_199 = arith.constant dense<0.000000e+00> : vector<2x32xf32>
    %579 = tpu.matmul %574, %335, %cst_199 {dimension_numbers = #tpu.dot_dimension_numbers<[1], [0], [0], [1], [0, 0, 1, 1], [], []>} : vector<2x32xf32>, vector<32x32xf32>, vector<2x32xf32> -> vector<2x32xf32>
    %cst_200 = arith.constant dense<0.000000e+00> : vector<2x32xf32>
    %580 = tpu.matmul %574, %337, %cst_200 {dimension_numbers = #tpu.dot_dimension_numbers<[1], [0], [0], [1], [0, 0, 1, 1], [], []>} : vector<2x32xf32>, vector<32x32xf32>, vector<2x32xf32> -> vector<2x32xf32>
    %581 = vector.extract_strided_slice %315 {offsets = [0, 7, 0], sizes = [2, 1, 32], strides = [1, 1, 1]} : vector<2x8x32xf32> to vector<2x1x32xf32>
    %582 = vector.shape_cast %581 : vector<2x1x32xf32> to vector<2x32xf32>
    %583 = arith.addf %582, %578 : vector<2x32xf32>
    %584 = arith.negf %583 : vector<2x32xf32>
    %585 = math.exp %584 : vector<2x32xf32>
    %cst_201 = arith.constant 1.000000e+00 : f32
    %586 = vector.broadcast %cst_201 : f32 to vector<2x32xf32>
    %587 = arith.addf %586, %585 : vector<2x32xf32>
    %588 = arith.divf %586, %587 : vector<2x32xf32>
    %589 = vector.extract_strided_slice %323 {offsets = [0, 7, 0], sizes = [2, 1, 32], strides = [1, 1, 1]} : vector<2x8x32xf32> to vector<2x1x32xf32>
    %590 = vector.shape_cast %589 : vector<2x1x32xf32> to vector<2x32xf32>
    %591 = arith.addf %590, %579 : vector<2x32xf32>
    %592 = arith.negf %591 : vector<2x32xf32>
    %593 = math.exp %592 : vector<2x32xf32>
    %cst_202 = arith.constant 1.000000e+00 : f32
    %594 = vector.broadcast %cst_202 : f32 to vector<2x32xf32>
    %595 = arith.addf %594, %593 : vector<2x32xf32>
    %596 = arith.divf %594, %595 : vector<2x32xf32>
    %597 = vector.extract_strided_slice %331 {offsets = [0, 7, 0], sizes = [2, 1, 32], strides = [1, 1, 1]} : vector<2x8x32xf32> to vector<2x1x32xf32>
    %598 = vector.shape_cast %597 : vector<2x1x32xf32> to vector<2x32xf32>
    %599 = vector.broadcast %338 : vector<1x32xf32> to vector<2x32xf32>
    %600 = arith.addf %580, %599 : vector<2x32xf32>
    %601 = arith.mulf %588, %600 : vector<2x32xf32>
    %602 = arith.addf %598, %601 : vector<2x32xf32>
    %603 = math.tanh %602 : vector<2x32xf32>
    %cst_203 = arith.constant 1.000000e+00 : f32
    %604 = vector.broadcast %cst_203 : f32 to vector<2x32xf32>
    %605 = arith.subf %604, %596 : vector<2x32xf32>
    %606 = arith.mulf %605, %603 : vector<2x32xf32>
    %607 = arith.mulf %596, %574 : vector<2x32xf32>
    %608 = arith.addf %606, %607 : vector<2x32xf32>
    %c0_204 = arith.constant 0 : index
    %c7_205 = arith.constant 7 : index
    %c0_206 = arith.constant 0 : index
    %609 = vector.load %arg9[%c0_204, %c7_205, %c0_206] : memref<2x8x32xf32, #tpu.memory_space<vmem>>, vector<2x1x32xf32>
    %610 = vector.shape_cast %609 : vector<2x1x32xf32> to vector<2x32xf32>
    %611 = vector.shape_cast %608 : vector<2x32xf32> to vector<2x1x32xf32>
    tpu.vector_store %arg9[%c0_204, %c7_205, %c0_206], %611 {strides = array<i32>} : memref<2x8x32xf32, #tpu.memory_space<vmem>>, vector<2x1x32xf32>,
    return
  }
}

</mosaic_0001>

<bundles_post_ra>
// kernel: gru_forward.1
= control target key start
LH: loop header
LB: loop body
LE: loop exit
PB: predicated region body
PF: predicated region fallthrough
CT: control target
= control target key end

     0   :  { %vm50_vm0 = vcmask 1043456   ;;  %vm43_vm1 = vcmask 31744   ;;  %v6464_v6 = vmov 0.0   ;;  %s7724_s0 = inlined_call_operand.vmem [shape: f32[2,8,4], index: 0, kind: input, shape index: {}]   ;;  %s7725_s1 = inlined_call_operand.vmem [shape: f32[3,4,32], index: 1, kind: input, shape index: {}]   ;;  %s7726_s2 = inlined_call_operand.vmem [shape: f32[3,32,32], index: 2, kind: input, shape index: {}]   ;;  %s7727_s3 = inlined_call_operand.vmem [shape: f32[3,1,32], index: 3, kind: input, shape index: {}]   ;;  %s7728_s4 = inlined_call_operand.vmem [shape: f32[1,32], index: 4, kind: input, shape index: {}]   ;;  %s7729_s5 = inlined_call_operand.vmem [shape: f32[3,32,32], index: 5, kind: input, shape index: {}]   ;;  %s7730_s6 = inlined_call_operand.vmem [shape: f32[3,32,32], index: 6, kind: input, shape index: {}]   ;;  %s7731_s7 = inlined_call_operand.vmem [shape: f32[3,1,32], index: 7, kind: input, shape index: {}]   ;;  %s7732_s8 = inlined_call_operand.vmem [shape: f32[1,32], index: 8, kind: input, shape index: {}]   ;;  %s7733_s9 = inlined_call_operand.hbm [shape: f32[2,8,32], index: 9, kind: output, shape index: {}]  }
   0x1   :  { %v35_v0 = vld [vmem:[%s7725_s1] sm:$0xf]  ;;  %v5086_v1 = vld [vmem:[%s7725_s1 + $0x4] sm:$0xf]  ;;  %v34_v3 = vld [vmem:[%s7724_s0 + $0x8] sm:$0xff] }
   0x2   :  { %v33_v2 = vld [vmem:[%s7724_s0] sm:$0xff]  ;;  %5514 = vmatprep.subr.msk.mxu0 %vm50_vm0, %v35_v0  ;;  %5519 = vmatprep.subr.msk.mxu1 %vm50_vm0, %v5086_v1  ;;  %v5092_v4 = vld [vmem:[%s7725_s1 + $0x8] sm:$0xf]  ;;  %v6544_v5 = vld [vmem:[%s7726_s2 + $0x18] sm:$0xff] }
   0x3   :  { %5515 = vmatpush3.msk.msra.mxu0 %vm50_vm0, %v35_v0  ;;  %5516 = vmatprep.mubr.msk.f32.mxu0 %vm43_vm1, %v33_v2  ;;  %v6553_v7 = vld [vmem:[%s7726_s2 + $0x10] sm:$0xff] }
   0x4   :  { %5520 = vmatpush3.msk.msra.mxu1 %vm50_vm0, %v5086_v1  ;;  %5521 = vmatprep.mubr.msk.f32.mxu1 %vm43_vm1, %v33_v2 }
   0x5   :  { %5517 = vmatmul.mubr.msk.f32.vlgmr.msra.gmra.mxu0 %vm43_vm1, %v34_v3  ;;  %5522 = vmatmul.mubr.msk.f32.vlgmr.msra.gmra.mxu1 %vm43_vm1, %v34_v3 }
   0x6   :  { %5529 = vmatprep.subr.mxu1 %v6464_v6  ;;  %5524 = vmatprep.subr.msk.mxu0 %vm50_vm0, %v5092_v4 }
   0x7   :  { %14 = vsyncpa [#allocation3], 0  ;;  %5530 = vmatpush3.msra.mxu1 %v6544_v5  ;;  %5525 = vmatpush3.msk.msra.mxu0 %vm50_vm0, %v5092_v4  ;;  %v6562_v8 = vld [vmem:[%s7726_s2 + $0x38] sm:$0xff]  ;;  %v6567_v9 = vld [vmem:[%s7726_s2 + $0x8] sm:$0xff]  ;;  %vm320_vm2 = vcmask 261120   ;;  %vm6465_vm3 = vmmov 0  }
   0x8   :  { %5531 = vmatprep.subr.mxu1 %v6464_v6  ;;  %5526 = vmatprep.mubr.msk.f32.mxu0 %vm43_vm1, %v33_v2  ;;  %v6576_v10 = vld [vmem:[%s7726_s2 + $0x30] sm:$0xff]  ;;  %v6581_v11 = vld [vmem:[%s7726_s2] sm:$0xff]  ;;  %v6590_v12 = vld [vmem:[%s7726_s2 + $0x28] sm:$0xff]  ;;  %v6466_v14 = vmov 1.0   ;;  %vm592_vm4 = vcmask 253952   ;;  %vm598_vm5 = vcmask 1041409  }
   0x9   :  { %5532 = vmatpush3.msra.mxu1 %v6553_v7  ;;  %5540 = vmatprep.subr.mxu0 %v6464_v6  ;;  %v6600_v13 = vld [vmem:[%s7726_s2 + $0x20] sm:$0xff]  ;;  %v6608_v15 = vld [vmem:[%s7726_s2 + $0x58] sm:$0xff]  ;;  %v6618_v16 = vld [vmem:[%s7726_s2 + $0x50] sm:$0xff]  ;;  %vm869_vm6 = vcmask 254977   ;;  %vm1149_vm7 = vcmask 256002   ;;  %vm1430_vm8 = vcmask 257027  }
   0xa   :  { %5527 = vmatmul.mubr.msk.f32.vlgmr.msra.gmra.mxu0 %vm43_vm1, %v34_v3  ;;  %5533 = vmatprep.subr.mxu1 %v6464_v6  ;;  %v6627_v17 = vld [vmem:[%s7726_s2 + $0x48] sm:$0xff]  ;;  %v6637_v18 = vld [vmem:[%s7726_s2 + $0x40] sm:$0xff]  ;;  %vm1711_vm9 = vcmask 258052   ;;  %vm1992_vm10 = vcmask 259077   ;;  %vm2273_vm11 = vcmask 260102   ;;  %vm2554_vm12 = vcmask 261127  }
   0xb   :  { %5541 = vmatpush3.msra.mxu0 %v6562_v8  ;;  %5534 = vmatpush3.msra.mxu1 %v6567_v9  ;;  %v5082_v22 = vld [vmem:[%s7727_s3] ss:$0 sm:$0xff]  ;;  %v5088_v31 = vld [vmem:[%s7727_s3 + $0x1] ss:$0 sm:$0xff]  ;;  %v5094_v56 = vld [vmem:[%s7727_s3 + $0x2] ss:$0 sm:$0xff] }
   0xc   :  { %5542 = vmatprep.subr.mxu0 %v6464_v6  ;;  %5535 = vmatprep.subr.mxu1 %v6464_v6  ;;  %v6686_v51 = vld [vmem:[%s7728_s4] ss:$0 sm:$0xff] }
   0xd   :  { %5543 = vmatpush3.msra.mxu0 %v6576_v10  ;;  %5536 = vmatpush3.msra.mxu1 %v6581_v11 }
   0xe   :  { %5537 = vmatprep.mubr.msk.f32.mxu1 %vm6465_vm3, %v6464_v6  ;;  %5544 = vmatprep.subr.mxu0 %v6464_v6 }
   0xf   :  { %5538 = vmatmul.mubr.msk.f32.vlgmr.msra.gmra.mxu1 %vm320_vm2, %v6466_v14  ;;  %5545 = vmatpush3.msra.mxu0 %v6590_v12 }
  0x10   :  { %5546 = vmatprep.subr.mxu0 %v6464_v6  ;;  %5548 = vmatprep.mubr.msk.f32.mxu0 %vm6465_vm3, %v6464_v6 }
  0x11   :  { %5547 = vmatpush3.msra.mxu0 %v6600_v13  ;;  %5551 = vmatprep.subr.mxu1 %v6464_v6 }
  0x12   :  { %5549 = vmatmul.mubr.msk.f32.vlgmr.msra.gmra.mxu0 %vm320_vm2, %v6466_v14  ;;  %5552 = vmatpush3.msra.mxu1 %v6608_v15 }
  0x13   :  { %5553 = vmatprep.subr.mxu1 %v6464_v6  ;;  %5559 = vmatprep.mubr.msk.f32.mxu1 %vm6465_vm3, %v6464_v6 }
  0x14   :  { %5554 = vmatpush3.msra.mxu1 %v6618_v16  ;;  %5562 = vmatprep.subr.mxu0 %v6464_v6 }
  0x15   :  { %5555 = vmatprep.subr.mxu1 %v6464_v6  ;;  %5563 = vmatpush3.msra.mxu0 %v6544_v5 }
  0x16   :  { %5556 = vmatpush3.msra.mxu1 %v6627_v17  ;;  %5564 = vmatprep.subr.mxu0 %v6464_v6 }
  0x17   :  { %5557 = vmatprep.subr.mxu1 %v6464_v6  ;;  %5565 = vmatpush3.msra.mxu0 %v6553_v7 }
  0x18   :  { %5558 = vmatpush3.msra.mxu1 %v6637_v18  ;;  %5566 = vmatprep.subr.mxu0 %v6464_v6 }
  0x19   :  { %5560 = vmatmul.mubr.msk.f32.vlgmr.msra.gmra.mxu1 %vm320_vm2, %v6466_v14  ;;  %5573 = vmatprep.subr.mxu1 %v6464_v6 }
  0x1a   :  { %5574 = vmatpush3.msra.mxu1 %v6562_v8  ;;  %5567 = vmatpush3.msra.mxu0 %v6567_v9 }
  0x1b   :  { %5575 = vmatprep.subr.mxu1 %v6464_v6  ;;  %5568 = vmatprep.subr.mxu0 %v6464_v6 }
  0x1c   :  { %5576 = vmatpush3.msra.mxu1 %v6576_v10  ;;  %5569 = vmatpush3.msra.mxu0 %v6581_v11 }
  0x1d   :  { %5577 = vmatprep.subr.mxu1 %v6464_v6  ;;  %5570 = vmatprep.mubr.msk.f32.mxu0 %vm6465_vm3, %v6464_v6 }
  0x1e   :  { %5578 = vmatpush3.msra.mxu1 %v6590_v12  ;;  %5581 = vmatprep.mubr.msk.f32.mxu1 %vm6465_vm3, %v6464_v6 }
  0x1f   :  { %5579 = vmatprep.subr.mxu1 %v6464_v6  ;;  %5584 = vmatprep.subr.mxu0 %v6464_v6 }
  0x20   :  { %5580 = vmatpush3.msra.mxu1 %v6600_v13 }
  0x21   :  { %5595 = vmatprep.subr.mxu1 %v6464_v6 }
  0xc5   :  { %v5518_v19 = vpop.f32.mrf.mxu0  ;;  %v5523_v21 = vpop.f32.mrf.mxu1 }
  0xc6   :  { %v6670_v26 = vadd.f32 %v5518_v19, %v5082_v22  ;;  %v6679_v40 = vadd.f32 %v5523_v21, %v5088_v31 }
  0xc7   :  { %v120_v20 = vpop.f32.mrf.mxu0  ;;  %v208_v25 = vpop.f32.mrf.mxu1 }
  0xc8   :  { %v6668_v24 = vadd.f32 %v5082_v22, %v120_v20  ;;  %v6677_v36 = vadd.f32 %v5088_v31, %v208_v25 }
  0xca   :  { %v5528_v23 = vpop.f32.mrf.mxu0 }
  0xcb   :  { %v6694_v63 = vadd.f32 %v5528_v23, %v5094_v56 }
  0xcc   :  { %v296_v27 = vpop.f32.mrf.mxu0 }
  0xcd   :  { %v6692_v60 = vadd.f32 %v5094_v56, %v296_v27 }
  0xcf   :  { %v390_v28 = vpop.f32.mrf.mxu1 }
  0xd0   :  { %v465_v29 = vrot.slane %v390_v28, 1  ;;  %v468_v30 = vadd.f32 %v390_v28, %v6668_v24 }
  0xd1   :  { %v5539_v32 = vpop.f32.mrf.mxu1 }
  0xd2   :  { %v469_v33 = vadd.f32 %v465_v29, %v6670_v26  ;;  %v5108_v34 = vmul.f32 -1.442695, %v468_v30  ;;  %v460_v35 = vpop.f32.mrf.mxu0 }
  0xd3   :  { %v483_v38 = vrot.slane %v460_v35, 1  ;;  %v486_v41 = vadd.f32 %v460_v35, %v6677_v36 }
  0xd4   :  { %6096 = vpow2.f32 %v5108_v34  ;;  %v5109_v37 = vmul.f32 -1.442695, %v469_v33  ;;  %v5550_v39 = vpop.f32.mrf.mxu0 }
  0xd5   :  { %v487_v42 = vadd.f32 %v483_v38, %v6679_v40  ;;  %v5110_v44 = vmul.f32 -1.442695, %v486_v41 }
  0xd6   :  { %6098 = vpow2.f32 %v5109_v37 }
  0xd7   :  { %v5111_v46 = vmul.f32 -1.442695, %v487_v42  ;;  %6100 = vpow2.f32 %v5110_v44 }
  0xd9   :  { %v572_v43 = vpop.f32.mrf.mxu1  ;;  %6102 = vpow2.f32 %v5111_v46 }
  0xda   :  { %v573_v53 = vadd.f32 %v6686_v51, %v572_v43 }
  0xdb   :  { %v5561_v45 = vpop.f32.mrf.mxu1 }
  0xdc   :  { %v577_v58 = vrot.slane %v573_v53, 1 }
  0xe1   :  { %v6097_v47 = vpop.eup %6096 }
  0xe2   :  { %v476_v48 = vadd.f32 1.0, %v6097_v47 }
  0xe3   :  { %v6099_v49 = vpop.eup %6098 }
  0xe4   :  { %v477_v50 = vadd.f32 1.0, %v6099_v49  ;;  %6104 = vrcp.f32 %v476_v48  ;;  %v6101_v52 = vpop.eup %6100 }
  0xe5   :  { %v494_v55 = vadd.f32 1.0, %v6101_v52 }
  0xe6   :  { %6106 = vrcp.f32 %v477_v50  ;;  %v6103_v54 = vpop.eup %6102 }
  0xe7   :  { %v495_v57 = vadd.f32 1.0, %v6103_v54  ;;  %6108 = vrcp.f32 %v494_v55 }
  0xe9   :  { %6110 = vrcp.f32 %v495_v57 }
  0xf1   :  { %v6105_v59 = vpop.eup %6104 }
  0xf2   :  { %v580_v61 = vmul.f32 %v6105_v59, %v573_v53 }
  0xf3   :  { %v6107_v62 = vpop.eup %6106 }
  0xf4   :  { %v581_v0 = vmul.f32 %v6107_v62, %v577_v58  ;;  %v582_v1 = vadd.f32 %v580_v61, %v6692_v60  ;;  %v6109_v3 = vpop.eup %6108 }
  0xf5   :  { %v586_v19 = vsub.f32 1.0, %v6109_v3 }
  0xf6   :  { %v583_v2 = vadd.f32 %v581_v0, %v6694_v63  ;;  %6112 = vtanh.f32 %v582_v1  ;;  %v6111_v4 = vpop.eup %6110 }
  0xf7   :  { %v587_v21 = vsub.f32 1.0, %v6111_v4 }
  0xf8   :  { %6114 = vtanh.f32 %v583_v2 }
 0x103   :  { %v6113_v20 = vpop.eup %6112 }
 0x104   :  { %v588_v22 = vmul.f32 %v6113_v20, %v586_v19 }
 0x105   :  { %v6115_v25 = vpop.eup %6114 }
 0x106   :  { %v589_v27 = vmul.f32 %v6115_v25, %v587_v21  ;;  %v6698_v28 = vadd.f32 %v6109_v3, %v588_v22 }
 0x108   :  { %v6700_v23 = vadd.f32 %v6111_v4, %v589_v27  ;;  %593 = vst.msk [vmem:[#allocation2] sm:$0x1] %vm592_vm4, %v6698_v28  ;;  %v862_v22 = vrot.slane %v6698_v28, 7 }
 0x10a   :  { %594 = vst.msk [vmem:[#allocation2 + $0x8] sm:$0x1] %vm592_vm4, %v6700_v23  ;;  %v597_v29 = vrot.slane %v6700_v23, 7 }
 0x10c   :  { %v599_v30 = vsel %vm598_vm5, %v597_v29, %v6698_v28 }
 0x10d   :  { %5571 = vmatmul.mubr.msk.f32.vlgmr.msra.gmra.mxu0 %vm320_vm2, %v599_v30  ;;  %5582 = vmatmul.mubr.msk.f32.vlgmr.msra.gmra.mxu1 %vm320_vm2, %v599_v30 }
 0x10e   :  { %5585 = vmatpush3.msra.mxu0 %v6608_v15  ;;  %5592 = vmatprep.mubr.msk.f32.mxu0 %vm6465_vm3, %v6464_v6 }
 0x10f   :  { %5586 = vmatprep.subr.mxu0 %v6464_v6  ;;  %5596 = vmatpush3.msra.mxu1 %v6544_v5 }
 0x110   :  { %5587 = vmatpush3.msra.mxu0 %v6618_v16  ;;  %5597 = vmatprep.subr.mxu1 %v6464_v6 }
 0x111   :  { %5588 = vmatprep.subr.mxu0 %v6464_v6  ;;  %5598 = vmatpush3.msra.mxu1 %v6553_v7 }
 0x112   :  { %5589 = vmatpush3.msra.mxu0 %v6627_v17  ;;  %5599 = vmatprep.subr.mxu1 %v6464_v6 }
 0x113   :  { %5590 = vmatprep.subr.mxu0 %v6464_v6  ;;  %5600 = vmatpush3.msra.mxu1 %v6567_v9 }
 0x114   :  { %5591 = vmatpush3.msra.mxu0 %v6637_v18  ;;  %5601 = vmatprep.subr.mxu1 %v6464_v6 }
 0x115   :  { %5593 = vmatmul.mubr.msk.f32.vlgmr.msra.gmra.mxu0 %vm320_vm2, %v599_v30  ;;  %5606 = vmatprep.subr.mxu0 %v6464_v6 }
 0x116   :  { %5607 = vmatpush3.msra.mxu0 %v6562_v8  ;;  %5602 = vmatpush3.msra.mxu1 %v6581_v11 }
 0x117   :  { %5608 = vmatprep.subr.mxu0 %v6464_v6  ;;  %5603 = vmatprep.mubr.msk.f32.mxu1 %vm6465_vm3, %v6464_v6 }
 0x118   :  { %5609 = vmatpush3.msra.mxu0 %v6576_v10  ;;  %5614 = vmatprep.mubr.msk.f32.mxu0 %vm6465_vm3, %v6464_v6 }
 0x119   :  { %5610 = vmatprep.subr.mxu0 %v6464_v6  ;;  %5617 = vmatprep.subr.mxu1 %v6464_v6 }
 0x11a   :  { %5611 = vmatpush3.msra.mxu0 %v6590_v12 }
 0x11b   :  { %5612 = vmatprep.subr.mxu0 %v6464_v6 }
 0x11c   :  { %5613 = vmatpush3.msra.mxu0 %v6600_v13 }
 0x11d   :  { %5628 = vmatprep.subr.mxu0 %v6464_v6 }
 0x1cd   :  { %v668_v31 = vpop.f32.mrf.mxu0  ;;  %v738_v32 = vpop.f32.mrf.mxu1 }
 0x1ce   :  { %v743_v33 = vrot.slane %v668_v31, 7  ;;  %v747_v34 = vadd.f32 %v668_v31, %v6670_v26  ;;  %v761_v42 = vrot.slane %v738_v32, 7  ;;  %v765_v43 = vadd.f32 %v738_v32, %v6679_v40 }
 0x1cf   :  { %v5572_v35 = vpop.f32.mrf.mxu0  ;;  %v5583_v37 = vpop.f32.mrf.mxu1 }
 0x1d0   :  { %v746_v38 = vadd.f32 %v743_v33, %v6668_v24  ;;  %v5117_v39 = vmul.f32 -1.442695, %v747_v34  ;;  %v764_v45 = vadd.f32 %v761_v42, %v6677_v36  ;;  %v5119_v47 = vmul.f32 -1.442695, %v765_v43 }
 0x1d2   :  { %v5116_v41 = vmul.f32 -1.442695, %v746_v38  ;;  %6116 = vpow2.f32 %v5117_v39  ;;  %v5118_v48 = vmul.f32 -1.442695, %v764_v45 }
 0x1d4   :  { %6118 = vpow2.f32 %v5116_v41 }
 0x1d5   :  { %v844_v44 = vpop.f32.mrf.mxu0  ;;  %6120 = vpow2.f32 %v5119_v47 }
 0x1d6   :  { %6122 = vpow2.f32 %v5118_v48  ;;  %v845_v57 = vadd.f32 %v6686_v51, %v844_v44 }
 0x1d7   :  { %v5594_v46 = vpop.f32.mrf.mxu0 }
 0x1d8   :  { %v849_v61 = vrot.slane %v845_v57, 7 }
 0x1df   :  { %v6117_v49 = vpop.eup %6116 }
 0x1e0   :  { %v755_v50 = vadd.f32 1.0, %v6117_v49 }
 0x1e1   :  { %v6119_v52 = vpop.eup %6118 }
 0x1e2   :  { %v754_v53 = vadd.f32 1.0, %v6119_v52  ;;  %6124 = vrcp.f32 %v755_v50  ;;  %v6121_v54 = vpop.eup %6120 }
 0x1e3   :  { %v6123_v55 = vpop.eup %6122  ;;  %v773_v56 = vadd.f32 1.0, %v6121_v54 }
 0x1e4   :  { %6126 = vrcp.f32 %v754_v53  ;;  %v772_v58 = vadd.f32 1.0, %v6123_v55 }
 0x1e5   :  { %6128 = vrcp.f32 %v773_v56 }
 0x1e6   :  { %6130 = vrcp.f32 %v772_v58 }
 0x1ef   :  { %v6125_v59 = vpop.eup %6124 }
 0x1f0   :  { %v853_v62 = vmul.f32 %v6125_v59, %v845_v57 }
 0x1f1   :  { %v6127_v0 = vpop.eup %6126 }
 0x1f2   :  { %v852_v1 = vmul.f32 %v6127_v0, %v849_v61  ;;  %v855_v2 = vadd.f32 %v853_v62, %v6694_v63  ;;  %v6129_v4 = vpop.eup %6128 }
 0x1f3   :  { %v6131_v19 = vpop.eup %6130  ;;  %v859_v20 = vsub.f32 1.0, %v6129_v4  ;;  %v866_v30 = vmul.f32 %v6129_v4, %v597_v29 }
 0x1f4   :  { %v854_v3 = vadd.f32 %v852_v1, %v6692_v60  ;;  %6132 = vtanh.f32 %v855_v2  ;;  %v858_v25 = vsub.f32 1.0, %v6131_v19  ;;  %v865_v33 = vmul.f32 %v6131_v19, %v862_v22 }
 0x1f6   :  { %6134 = vtanh.f32 %v854_v3 }
 0x201   :  { %v6133_v21 = vpop.eup %6132 }
 0x202   :  { %v861_v27 = vmul.f32 %v6133_v21, %v859_v20 }
 0x203   :  { %v6135_v31 = vpop.eup %6134 }
 0x204   :  { %v860_v32 = vmul.f32 %v6135_v31, %v858_v25  ;;  %v6754_v34 = vadd.f32 %v866_v30, %v861_v27 }
 0x206   :  { %v6756_v35 = vadd.f32 %v865_v33, %v860_v32  ;;  %871 = vst.msk [vmem:[#allocation2 + $0x8] sm:$0x2] %vm869_vm6, %v6754_v34 }
 0x208   :  { %870 = vst.msk [vmem:[#allocation2] sm:$0x2] %vm869_vm6, %v6756_v35  ;;  %v874_v28 = vrot.slane %v6756_v35, 1  ;;  %v1141_v33 = vrot.slane %v6756_v35, 7 }
 0x20a   :  { %v875_v23 = vsel %vm598_vm5, %v6754_v34, %v874_v28 }
 0x20b   :  { %5604 = vmatmul.mubr.msk.f32.vlgmr.msra.gmra.mxu1 %vm320_vm2, %v875_v23  ;;  %5615 = vmatmul.mubr.msk.f32.vlgmr.msra.gmra.mxu0 %vm320_vm2, %v875_v23 }
 0x20c   :  { %5618 = vmatpush3.msra.mxu1 %v6608_v15  ;;  %5625 = vmatprep.mubr.msk.f32.mxu1 %vm6465_vm3, %v6464_v6 }
 0x20d   :  { %5619 = vmatprep.subr.mxu1 %v6464_v6  ;;  %5629 = vmatpush3.msra.mxu0 %v6544_v5 }
 0x20e   :  { %5620 = vmatpush3.msra.mxu1 %v6618_v16  ;;  %5630 = vmatprep.subr.mxu0 %v6464_v6 }
 0x20f   :  { %5621 = vmatprep.subr.mxu1 %v6464_v6  ;;  %5631 = vmatpush3.msra.mxu0 %v6553_v7 }
 0x210   :  { %5622 = vmatpush3.msra.mxu1 %v6627_v17  ;;  %5632 = vmatprep.subr.mxu0 %v6464_v6 }
 0x211   :  { %5623 = vmatprep.subr.mxu1 %v6464_v6  ;;  %5633 = vmatpush3.msra.mxu0 %v6567_v9 }
 0x212   :  { %5624 = vmatpush3.msra.mxu1 %v6637_v18  ;;  %5634 = vmatprep.subr.mxu0 %v6464_v6 }
 0x213   :  { %5626 = vmatmul.mubr.msk.f32.vlgmr.msra.gmra.mxu1 %vm320_vm2, %v875_v23  ;;  %5639 = vmatprep.subr.mxu1 %v6464_v6  ;;  %v1142_v23 = vrot.slane %v6754_v34, 7 }
 0x214   :  { %5640 = vmatpush3.msra.mxu1 %v6562_v8  ;;  %5635 = vmatpush3.msra.mxu0 %v6581_v11 }
 0x215   :  { %5641 = vmatprep.subr.mxu1 %v6464_v6  ;;  %5636 = vmatprep.mubr.msk.f32.mxu0 %vm6465_vm3, %v6464_v6 }
 0x216   :  { %5642 = vmatpush3.msra.mxu1 %v6576_v10  ;;  %5647 = vmatprep.mubr.msk.f32.mxu1 %vm6465_vm3, %v6464_v6 }
 0x217   :  { %5643 = vmatprep.subr.mxu1 %v6464_v6  ;;  %5650 = vmatprep.subr.mxu0 %v6464_v6 }
 0x218   :  { %5644 = vmatpush3.msra.mxu1 %v6590_v12 }
 0x219   :  { %5645 = vmatprep.subr.mxu1 %v6464_v6 }
 0x21a   :  { %5646 = vmatpush3.msra.mxu1 %v6600_v13 }
 0x21b   :  { %5661 = vmatprep.subr.mxu1 %v6464_v6 }
 0x2cb   :  { %v944_v29 = vpop.f32.mrf.mxu1  ;;  %v1014_v37 = vpop.f32.mrf.mxu0 }
 0x2cc   :  { %v1019_v38 = vrot.slane %v944_v29, 6  ;;  %v1020_v39 = vrot.slane %v944_v29, 7  ;;  %v1038_v47 = vrot.slane %v1014_v37, 6  ;;  %v1039_v48 = vrot.slane %v1014_v37, 7 }
 0x2cd   :  { %v5605_v41 = vpop.f32.mrf.mxu1  ;;  %v5616_v42 = vpop.f32.mrf.mxu0 }
 0x2ce   :  { %v1023_v43 = vadd.f32 %v1019_v38, %v6668_v24  ;;  %v1024_v44 = vadd.f32 %v1020_v39, %v6670_v26  ;;  %v1042_v50 = vadd.f32 %v1038_v47, %v6677_v36  ;;  %v1043_v52 = vadd.f32 %v1039_v48, %v6679_v40 }
 0x2d0   :  { %v5123_v45 = vmul.f32 -1.442695, %v1023_v43  ;;  %v5124_v46 = vmul.f32 -1.442695, %v1024_v44  ;;  %v5125_v54 = vmul.f32 -1.442695, %v1042_v50 }
 0x2d1   :  { %v5126_v55 = vmul.f32 -1.442695, %v1043_v52 }
 0x2d2   :  { %6136 = vpow2.f32 %v5123_v45 }
 0x2d3   :  { %6138 = vpow2.f32 %v5124_v46  ;;  %v1122_v49 = vpop.f32.mrf.mxu1 }
 0x2d4   :  { %6140 = vpow2.f32 %v5125_v54  ;;  %v1123_v0 = vadd.f32 %v6686_v51, %v1122_v49 }
 0x2d5   :  { %v5627_v53 = vpop.f32.mrf.mxu1  ;;  %6142 = vpow2.f32 %v5126_v55 }
 0x2d6   :  { %v1127_v3 = vrot.slane %v1123_v0, 6  ;;  %v1128_v19 = vrot.slane %v1123_v0, 7 }
 0x2df   :  { %v6137_v56 = vpop.eup %6136 }
 0x2e0   :  { %v6139_v57 = vpop.eup %6138  ;;  %v1031_v58 = vadd.f32 1.0, %v6137_v56 }
 0x2e1   :  { %v1032_v59 = vadd.f32 1.0, %v6139_v57  ;;  %v6141_v61 = vpop.eup %6140 }
 0x2e2   :  { %6144 = vrcp.f32 %v1031_v58  ;;  %v6143_v62 = vpop.eup %6142  ;;  %v1050_v1 = vadd.f32 1.0, %v6141_v61 }
 0x2e3   :  { %6146 = vrcp.f32 %v1032_v59  ;;  %v1051_v2 = vadd.f32 1.0, %v6143_v62 }
 0x2e4   :  { %6148 = vrcp.f32 %v1050_v1 }
 0x2e5   :  { %6150 = vrcp.f32 %v1051_v2 }
 0x2ef   :  { %v6145_v4 = vpop.eup %6144 }
 0x2f0   :  { %v6147_v20 = vpop.eup %6146  ;;  %v1131_v21 = vmul.f32 %v6145_v4, %v1127_v3 }
 0x2f1   :  { %v1132_v22 = vmul.f32 %v6147_v20, %v1128_v19  ;;  %v6149_v30 = vpop.eup %6148 }
 0x2f2   :  { %v1133_v25 = vadd.f32 %v1131_v21, %v6692_v60  ;;  %v6151_v31 = vpop.eup %6150  ;;  %v1137_v32 = vsub.f32 1.0, %v6149_v30  ;;  %v1145_v39 = vmul.f32 %v6149_v30, %v1141_v33 }
 0x2f3   :  { %v1134_v27 = vadd.f32 %v1132_v22, %v6694_v63  ;;  %v1138_v29 = vsub.f32 1.0, %v6151_v31  ;;  %v1146_v42 = vmul.f32 %v6151_v31, %v1142_v23 }
 0x2f4   :  { %6152 = vtanh.f32 %v1133_v25 }
 0x2f5   :  { %6154 = vtanh.f32 %v1134_v27 }
 0x301   :  { %v6153_v28 = vpop.eup %6152 }
 0x302   :  { %v6155_v37 = vpop.eup %6154  ;;  %v1139_v38 = vmul.f32 %v6153_v28, %v1137_v32 }
 0x303   :  { %v1140_v41 = vmul.f32 %v6155_v37, %v1138_v29 }
 0x304   :  { %v6807_v43 = vadd.f32 %v1145_v39, %v1139_v38 }
 0x305   :  { %v6809_v44 = vadd.f32 %v1146_v42, %v1140_v41 }
 0x306   :  { %1150 = vst.msk [vmem:[#allocation2] sm:$0x4] %vm1149_vm7, %v6807_v43  ;;  %v1154_v45 = vrot.slane %v6807_v43, 2 }
 0x307   :  { %1151 = vst.msk [vmem:[#allocation2 + $0x8] sm:$0x4] %vm1149_vm7, %v6809_v44  ;;  %v1155_v34 = vrot.slane %v6809_v44, 1 }
 0x309   :  { %v1156_v35 = vsel %vm598_vm5, %v1155_v34, %v1154_v45  ;;  %v1422_v45 = vrot.slane %v6807_v43, 7 }
 0x30a   :  { %5637 = vmatmul.mubr.msk.f32.vlgmr.msra.gmra.mxu0 %vm320_vm2, %v1156_v35  ;;  %5648 = vmatmul.mubr.msk.f32.vlgmr.msra.gmra.mxu1 %vm320_vm2, %v1156_v35 }
 0x30b   :  { %5651 = vmatpush3.msra.mxu0 %v6608_v15  ;;  %5658 = vmatprep.mubr.msk.f32.mxu0 %vm6465_vm3, %v6464_v6 }
 0x30c   :  { %5652 = vmatprep.subr.mxu0 %v6464_v6  ;;  %5662 = vmatpush3.msra.mxu1 %v6544_v5 }
 0x30d   :  { %5653 = vmatpush3.msra.mxu0 %v6618_v16  ;;  %5663 = vmatprep.subr.mxu1 %v6464_v6 }
 0x30e   :  { %5654 = vmatprep.subr.mxu0 %v6464_v6  ;;  %5664 = vmatpush3.msra.mxu1 %v6553_v7 }
 0x30f   :  { %5655 = vmatpush3.msra.mxu0 %v6627_v17  ;;  %5665 = vmatprep.subr.mxu1 %v6464_v6 }
 0x310   :  { %5656 = vmatprep.subr.mxu0 %v6464_v6  ;;  %5666 = vmatpush3.msra.mxu1 %v6567_v9 }
 0x311   :  { %5657 = vmatpush3.msra.mxu0 %v6637_v18  ;;  %5667 = vmatprep.subr.mxu1 %v6464_v6 }
 0x312   :  { %5659 = vmatmul.mubr.msk.f32.vlgmr.msra.gmra.mxu0 %vm320_vm2, %v1156_v35  ;;  %5672 = vmatprep.subr.mxu0 %v6464_v6 }
 0x313   :  { %5673 = vmatpush3.msra.mxu0 %v6562_v8  ;;  %5668 = vmatpush3.msra.mxu1 %v6581_v11 }
 0x314   :  { %5674 = vmatprep.subr.mxu0 %v6464_v6  ;;  %5669 = vmatprep.mubr.msk.f32.mxu1 %vm6465_vm3, %v6464_v6 }
 0x315   :  { %5675 = vmatpush3.msra.mxu0 %v6576_v10  ;;  %5680 = vmatprep.mubr.msk.f32.mxu0 %vm6465_vm3, %v6464_v6 }
 0x316   :  { %5676 = vmatprep.subr.mxu0 %v6464_v6  ;;  %5683 = vmatprep.subr.mxu1 %v6464_v6 }
 0x317   :  { %5677 = vmatpush3.msra.mxu0 %v6590_v12 }
 0x318   :  { %5678 = vmatprep.subr.mxu0 %v6464_v6 }
 0x319   :  { %5679 = vmatpush3.msra.mxu0 %v6600_v13 }
 0x31a   :  { %5694 = vmatprep.subr.mxu0 %v6464_v6 }
 0x3ca   :  { %v1225_v46 = vpop.f32.mrf.mxu0  ;;  %v1295_v47 = vpop.f32.mrf.mxu1 }
 0x3cb   :  { %v1300_v48 = vrot.slane %v1225_v46, 5  ;;  %v1301_v49 = vrot.slane %v1225_v46, 6  ;;  %v1319_v57 = vrot.slane %v1295_v47, 5  ;;  %v1320_v58 = vrot.slane %v1295_v47, 6 }
 0x3cc   :  { %v5638_v50 = vpop.f32.mrf.mxu0  ;;  %v5649_v52 = vpop.f32.mrf.mxu1  ;;  %v1423_v46 = vrot.slane %v6809_v44, 7 }
 0x3cd   :  { %v1304_v53 = vadd.f32 %v1300_v48, %v6668_v24  ;;  %v1305_v54 = vadd.f32 %v1301_v49, %v6670_v26  ;;  %v1323_v61 = vadd.f32 %v1319_v57, %v6677_v36  ;;  %v1324_v62 = vadd.f32 %v1320_v58, %v6679_v40 }
 0x3cf   :  { %v5130_v55 = vmul.f32 -1.442695, %v1304_v53  ;;  %v5131_v56 = vmul.f32 -1.442695, %v1305_v54  ;;  %v5132_v1 = vmul.f32 -1.442695, %v1323_v61 }
 0x3d0   :  { %v5133_v2 = vmul.f32 -1.442695, %v1324_v62 }
 0x3d1   :  { %6156 = vpow2.f32 %v5130_v55 }
 0x3d2   :  { %6158 = vpow2.f32 %v5131_v56  ;;  %v1403_v59 = vpop.f32.mrf.mxu0 }
 0x3d3   :  { %6160 = vpow2.f32 %v5132_v1  ;;  %v1404_v25 = vadd.f32 %v6686_v51, %v1403_v59 }
 0x3d4   :  { %v5660_v0 = vpop.f32.mrf.mxu0  ;;  %6162 = vpow2.f32 %v5133_v2 }
 0x3d5   :  { %v1408_v31 = vrot.slane %v1404_v25, 5  ;;  %v1409_v33 = vrot.slane %v1404_v25, 6 }
 0x3de   :  { %v6157_v3 = vpop.eup %6156 }
 0x3df   :  { %v6159_v4 = vpop.eup %6158  ;;  %v1312_v19 = vadd.f32 1.0, %v6157_v3 }
 0x3e0   :  { %v1313_v20 = vadd.f32 1.0, %v6159_v4  ;;  %v6161_v21 = vpop.eup %6160 }
 0x3e1   :  { %6164 = vrcp.f32 %v1312_v19  ;;  %v6163_v22 = vpop.eup %6162  ;;  %v1331_v27 = vadd.f32 1.0, %v6161_v21 }
 0x3e2   :  { %6166 = vrcp.f32 %v1313_v20  ;;  %v1332_v30 = vadd.f32 1.0, %v6163_v22 }
 0x3e3   :  { %6168 = vrcp.f32 %v1331_v27 }
 0x3e4   :  { %6170 = vrcp.f32 %v1332_v30 }
 0x3ee   :  { %v6165_v32 = vpop.eup %6164 }
 0x3ef   :  { %v6167_v28 = vpop.eup %6166  ;;  %v1412_v23 = vmul.f32 %v6165_v32, %v1408_v31 }
 0x3f0   :  { %v1413_v29 = vmul.f32 %v6167_v28, %v1409_v33  ;;  %v6169_v39 = vpop.eup %6168 }
 0x3f1   :  { %v1414_v37 = vadd.f32 %v1412_v23, %v6692_v60  ;;  %v6171_v41 = vpop.eup %6170  ;;  %v1418_v42 = vsub.f32 1.0, %v6169_v39  ;;  %v1426_v49 = vmul.f32 %v6169_v39, %v1422_v45 }
 0x3f2   :  { %v1415_v38 = vadd.f32 %v1413_v29, %v6694_v63  ;;  %v1419_v35 = vsub.f32 1.0, %v6171_v41  ;;  %v1427_v52 = vmul.f32 %v6171_v41, %v1423_v46 }
 0x3f3   :  { %6172 = vtanh.f32 %v1414_v37 }
 0x3f4   :  { %6174 = vtanh.f32 %v1415_v38 }
 0x400   :  { %v6173_v34 = vpop.eup %6172 }
 0x401   :  { %v6175_v47 = vpop.eup %6174  ;;  %v1420_v48 = vmul.f32 %v6173_v34, %v1418_v42 }
 0x402   :  { %v1421_v50 = vmul.f32 %v6175_v47, %v1419_v35 }
 0x403   :  { %v6860_v53 = vadd.f32 %v1426_v49, %v1420_v48 }
 0x404   :  { %v6862_v54 = vadd.f32 %v1427_v52, %v1421_v50 }
 0x405   :  { %1431 = vst.msk [vmem:[#allocation2] sm:$0x8] %vm1430_vm8, %v6860_v53  ;;  %v1435_v55 = vrot.slane %v6860_v53, 3  ;;  %v1703_v34 = vrot.slane %v6860_v53, 7 }
 0x406   :  { %1432 = vst.msk [vmem:[#allocation2 + $0x8] sm:$0x8] %vm1430_vm8, %v6862_v54  ;;  %v1436_v43 = vrot.slane %v6862_v54, 2  ;;  %v1704_v47 = vrot.slane %v6862_v54, 7 }
 0x408   :  { %v1437_v44 = vsel %vm598_vm5, %v1436_v43, %v1435_v55 }
 0x409   :  { %5670 = vmatmul.mubr.msk.f32.vlgmr.msra.gmra.mxu1 %vm320_vm2, %v1437_v44  ;;  %5681 = vmatmul.mubr.msk.f32.vlgmr.msra.gmra.mxu0 %vm320_vm2, %v1437_v44 }
 0x40a   :  { %5684 = vmatpush3.msra.mxu1 %v6608_v15  ;;  %5691 = vmatprep.mubr.msk.f32.mxu1 %vm6465_vm3, %v6464_v6 }
 0x40b   :  { %5685 = vmatprep.subr.mxu1 %v6464_v6  ;;  %5695 = vmatpush3.msra.mxu0 %v6544_v5 }
 0x40c   :  { %5686 = vmatpush3.msra.mxu1 %v6618_v16  ;;  %5696 = vmatprep.subr.mxu0 %v6464_v6 }
 0x40d   :  { %5687 = vmatprep.subr.mxu1 %v6464_v6  ;;  %5697 = vmatpush3.msra.mxu0 %v6553_v7 }
 0x40e   :  { %5688 = vmatpush3.msra.mxu1 %v6627_v17  ;;  %5698 = vmatprep.subr.mxu0 %v6464_v6 }
 0x40f   :  { %5689 = vmatprep.subr.mxu1 %v6464_v6  ;;  %5699 = vmatpush3.msra.mxu0 %v6567_v9 }
 0x410   :  { %5690 = vmatpush3.msra.mxu1 %v6637_v18  ;;  %5700 = vmatprep.subr.mxu0 %v6464_v6 }
 0x411   :  { %5692 = vmatmul.mubr.msk.f32.vlgmr.msra.gmra.mxu1 %vm320_vm2, %v1437_v44  ;;  %5705 = vmatprep.subr.mxu1 %v6464_v6 }
 0x412   :  { %5706 = vmatpush3.msra.mxu1 %v6562_v8  ;;  %5701 = vmatpush3.msra.mxu0 %v6581_v11 }
 0x413   :  { %5707 = vmatprep.subr.mxu1 %v6464_v6  ;;  %5702 = vmatprep.mubr.msk.f32.mxu0 %vm6465_vm3, %v6464_v6 }
 0x414   :  { %5708 = vmatpush3.msra.mxu1 %v6576_v10  ;;  %5713 = vmatprep.mubr.msk.f32.mxu1 %vm6465_vm3, %v6464_v6 }
 0x415   :  { %5709 = vmatprep.subr.mxu1 %v6464_v6  ;;  %5716 = vmatprep.subr.mxu0 %v6464_v6 }
 0x416   :  { %5710 = vmatpush3.msra.mxu1 %v6590_v12 }
 0x417   :  { %5711 = vmatprep.subr.mxu1 %v6464_v6 }
 0x418   :  { %5712 = vmatpush3.msra.mxu1 %v6600_v13 }
 0x419   :  { %5727 = vmatprep.subr.mxu1 %v6464_v6 }
 0x4c9   :  { %v1506_v5 = vpop.f32.mrf.mxu1  ;;  %v1576_v7 = vpop.f32.mrf.mxu0 }
 0x4ca   :  { %v1581_v8 = vrot.slane %v1506_v5, 4  ;;  %v1582_v9 = vrot.slane %v1506_v5, 5  ;;  %v1600_v61 = vrot.slane %v1576_v7, 4  ;;  %v1601_v12 = vrot.slane %v1576_v7, 5  ;;  %v6933_v7 = vld [vmem:[%s7726_s2 + $0x18] sm:$0xff] }
 0x4cb   :  { %v5671_v10 = vpop.f32.mrf.mxu1  ;;  %v5682_v11 = vpop.f32.mrf.mxu0 }
 0x4cc   :  { %v1585_v56 = vadd.f32 %v1581_v8, %v6668_v24  ;;  %v1586_v57 = vadd.f32 %v1582_v9, %v6670_v26  ;;  %v1604_v13 = vadd.f32 %v1600_v61, %v6677_v36  ;;  %v1605_v0 = vadd.f32 %v1601_v12, %v6679_v40  ;;  %v6967_v8 = vld [vmem:[%s7726_s2] sm:$0xff]  ;;  %v6986_v9 = vld [vmem:[%s7726_s2 + $0x28] sm:$0xff] }
 0x4cd   :  { %v6993_v10 = vld [vmem:[%s7726_s2 + $0x20] sm:$0xff] }
 0x4ce   :  { %v5137_v58 = vmul.f32 -1.442695, %v1585_v56  ;;  %v5138_v59 = vmul.f32 -1.442695, %v1586_v57  ;;  %v5139_v2 = vmul.f32 -1.442695, %v1604_v13 }
 0x4cf   :  { %v5140_v3 = vmul.f32 -1.442695, %v1605_v0 }
 0x4d0   :  { %6176 = vpow2.f32 %v5137_v58 }
 0x4d1   :  { %6178 = vpow2.f32 %v5138_v59  ;;  %v1684_v62 = vpop.f32.mrf.mxu1 }
 0x4d2   :  { %6180 = vpow2.f32 %v5139_v2  ;;  %v1685_v27 = vadd.f32 %v6686_v51, %v1684_v62 }
 0x4d3   :  { %v5693_v1 = vpop.f32.mrf.mxu1  ;;  %6182 = vpow2.f32 %v5140_v3 }
 0x4d4   :  { %v1689_v32 = vrot.slane %v1685_v27, 4  ;;  %v1690_v28 = vrot.slane %v1685_v27, 5 }
 0x4dd   :  { %v6177_v4 = vpop.eup %6176 }
 0x4de   :  { %v6179_v19 = vpop.eup %6178  ;;  %v1593_v20 = vadd.f32 1.0, %v6177_v4 }
 0x4df   :  { %v1594_v21 = vadd.f32 1.0, %v6179_v19  ;;  %v6181_v22 = vpop.eup %6180 }
 0x4e0   :  { %6184 = vrcp.f32 %v1593_v20  ;;  %v6183_v25 = vpop.eup %6182  ;;  %v1612_v30 = vadd.f32 1.0, %v6181_v22 }
 0x4e1   :  { %6186 = vrcp.f32 %v1594_v21  ;;  %v1613_v31 = vadd.f32 1.0, %v6183_v25 }
 0x4e2   :  { %6188 = vrcp.f32 %v1612_v30 }
 0x4e3   :  { %6190 = vrcp.f32 %v1613_v31 }
 0x4ed   :  { %v6185_v33 = vpop.eup %6184 }
 0x4ee   :  { %v6187_v23 = vpop.eup %6186  ;;  %v1693_v29 = vmul.f32 %v6185_v33, %v1689_v32 }
 0x4ef   :  { %v1694_v37 = vmul.f32 %v6187_v23, %v1690_v28  ;;  %v6189_v41 = vpop.eup %6188 }
 0x4f0   :  { %v1695_v38 = vadd.f32 %v1693_v29, %v6692_v60  ;;  %v6191_v42 = vpop.eup %6190  ;;  %v1699_v45 = vsub.f32 1.0, %v6189_v41  ;;  %v1707_v50 = vmul.f32 %v6189_v41, %v1703_v34 }
 0x4f1   :  { %v1696_v39 = vadd.f32 %v1694_v37, %v6694_v63  ;;  %v1700_v46 = vsub.f32 1.0, %v6191_v42  ;;  %v1708_v55 = vmul.f32 %v6191_v42, %v1704_v47 }
 0x4f2   :  { %6192 = vtanh.f32 %v1695_v38 }
 0x4f3   :  { %6194 = vtanh.f32 %v1696_v39 }
 0x4ff   :  { %v6193_v35 = vpop.eup %6192 }
 0x500   :  { %v6195_v48 = vpop.eup %6194  ;;  %v1701_v49 = vmul.f32 %v6193_v35, %v1699_v45 }
 0x501   :  { %v1702_v52 = vmul.f32 %v6195_v48, %v1700_v46 }
 0x502   :  { %v6913_v43 = vadd.f32 %v1707_v50, %v1701_v49 }
 0x503   :  { %v6915_v44 = vadd.f32 %v1708_v55, %v1702_v52 }
 0x504   :  { %1712 = vst.msk [vmem:[#allocation2] sm:$0x10] %vm1711_vm9, %v6913_v43  ;;  %v1716_v5 = vrot.slane %v6913_v43, 4 }
 0x505   :  { %1713 = vst.msk [vmem:[#allocation2 + $0x8] sm:$0x10] %vm1711_vm9, %v6915_v44  ;;  %v1717_v53 = vrot.slane %v6915_v44, 3  ;;  %v1985_v52 = vrot.slane %v6915_v44, 7 }
 0x507   :  { %v1718_v54 = vsel %vm598_vm5, %v1717_v53, %v1716_v5 }
 0x508   :  { %5703 = vmatmul.mubr.msk.f32.vlgmr.msra.gmra.mxu0 %vm320_vm2, %v1718_v54  ;;  %5714 = vmatmul.mubr.msk.f32.vlgmr.msra.gmra.mxu1 %vm320_vm2, %v1718_v54 }
 0x509   :  { %5717 = vmatpush3.msra.mxu0 %v6608_v15  ;;  %5724 = vmatprep.mubr.msk.f32.mxu0 %vm6465_vm3, %v6464_v6  ;;  %v6942_v15 = vld [vmem:[%s7726_s2 + $0x10] sm:$0xff] }
 0x50a   :  { %5718 = vmatprep.subr.mxu0 %v6464_v6  ;;  %5728 = vmatpush3.msra.mxu1 %v6933_v7 }
 0x50b   :  { %5719 = vmatpush3.msra.mxu0 %v6618_v16  ;;  %5729 = vmatprep.subr.mxu1 %v6464_v6  ;;  %v6951_v16 = vld [vmem:[%s7726_s2 + $0x8] sm:$0xff] }
 0x50c   :  { %5720 = vmatprep.subr.mxu0 %v6464_v6  ;;  %5730 = vmatpush3.msra.mxu1 %v6942_v15 }
 0x50d   :  { %5721 = vmatpush3.msra.mxu0 %v6627_v17  ;;  %5731 = vmatprep.subr.mxu1 %v6464_v6  ;;  %v6961_v17 = vld [vmem:[%s7726_s2 + $0x38] sm:$0xff] }
 0x50e   :  { %5722 = vmatprep.subr.mxu0 %v6464_v6  ;;  %5732 = vmatpush3.msra.mxu1 %v6951_v16 }
 0x50f   :  { %5723 = vmatpush3.msra.mxu0 %v6637_v18  ;;  %5733 = vmatprep.subr.mxu1 %v6464_v6  ;;  %v6976_v18 = vld [vmem:[%s7726_s2 + $0x30] sm:$0xff] }
 0x510   :  { %5725 = vmatmul.mubr.msk.f32.vlgmr.msra.gmra.mxu0 %vm320_vm2, %v1718_v54  ;;  %5738 = vmatprep.subr.mxu0 %v6464_v6 }
 0x511   :  { %5739 = vmatpush3.msra.mxu0 %v6961_v17  ;;  %5734 = vmatpush3.msra.mxu1 %v6967_v8 }
 0x512   :  { %5740 = vmatprep.subr.mxu0 %v6464_v6  ;;  %5735 = vmatprep.mubr.msk.f32.mxu1 %vm6465_vm3, %v6464_v6 }
 0x513   :  { %5741 = vmatpush3.msra.mxu0 %v6976_v18  ;;  %5746 = vmatprep.mubr.msk.f32.mxu0 %vm6465_vm3, %v6464_v6 }
 0x514   :  { %5742 = vmatprep.subr.mxu0 %v6464_v6  ;;  %5749 = vmatprep.subr.mxu1 %v6464_v6 }
 0x515   :  { %5743 = vmatpush3.msra.mxu0 %v6986_v9 }
 0x516   :  { %5744 = vmatprep.subr.mxu0 %v6464_v6 }
 0x517   :  { %5745 = vmatpush3.msra.mxu0 %v6993_v10 }
 0x518   :  { %5760 = vmatprep.subr.mxu0 %v6464_v6 }
 0x5c8   :  { %v1787_v11 = vpop.f32.mrf.mxu0  ;;  %v1857_v56 = vpop.f32.mrf.mxu1 }
 0x5c9   :  { %v1862_v57 = vrot.slane %v1787_v11, 3  ;;  %v1863_v58 = vrot.slane %v1787_v11, 4  ;;  %v1881_v1 = vrot.slane %v1857_v56, 3  ;;  %v1882_v2 = vrot.slane %v1857_v56, 4 }
 0x5ca   :  { %v5704_v59 = vpop.f32.mrf.mxu0  ;;  %v5715_v61 = vpop.f32.mrf.mxu1 }
 0x5cb   :  { %v1866_v12 = vadd.f32 %v1862_v57, %v6668_v24  ;;  %v1867_v62 = vadd.f32 %v1863_v58, %v6670_v26  ;;  %v1885_v4 = vadd.f32 %v1881_v1, %v6677_v36  ;;  %v1886_v19 = vadd.f32 %v1882_v2, %v6679_v40  ;;  %v7022_v59 = vld [vmem:[%s7726_s2 + $0x58] sm:$0xff]  ;;  %v7032_v61 = vld [vmem:[%s7726_s2 + $0x50] sm:$0xff] }
 0x5cd   :  { %v5144_v13 = vmul.f32 -1.442695, %v1866_v12  ;;  %v5145_v0 = vmul.f32 -1.442695, %v1867_v62  ;;  %v5146_v21 = vmul.f32 -1.442695, %v1885_v4 }
 0x5ce   :  { %v5147_v22 = vmul.f32 -1.442695, %v1886_v19  ;;  %v7041_v12 = vld [vmem:[%s7726_s2 + $0x48] sm:$0xff] }
 0x5cf   :  { %6196 = vpow2.f32 %v5144_v13 }
 0x5d0   :  { %6198 = vpow2.f32 %v5145_v0  ;;  %v1965_v3 = vpop.f32.mrf.mxu0 }
 0x5d1   :  { %6200 = vpow2.f32 %v5146_v21  ;;  %v1966_v28 = vadd.f32 %v6686_v51, %v1965_v3  ;;  %v1984_v51 = vrot.slane %v6913_v43, 7 }
 0x5d2   :  { %v5726_v20 = vpop.f32.mrf.mxu0  ;;  %6202 = vpow2.f32 %v5147_v22 }
 0x5d3   :  { %v1970_v37 = vrot.slane %v1966_v28, 3  ;;  %v1971_v39 = vrot.slane %v1966_v28, 4  ;;  %v7076_v28 = vld [vmem:[%s7728_s4] ss:$0 sm:$0xff] }
 0x5dc   :  { %v6197_v25 = vpop.eup %6196 }
 0x5dd   :  { %v6199_v27 = vpop.eup %6198  ;;  %v1874_v30 = vadd.f32 1.0, %v6197_v25 }
 0x5de   :  { %v1875_v31 = vadd.f32 1.0, %v6199_v27  ;;  %v6201_v32 = vpop.eup %6200 }
 0x5df   :  { %6204 = vrcp.f32 %v1874_v30  ;;  %v6203_v33 = vpop.eup %6202  ;;  %v1893_v23 = vadd.f32 1.0, %v6201_v32 }
 0x5e0   :  { %6206 = vrcp.f32 %v1875_v31  ;;  %v1894_v29 = vadd.f32 1.0, %v6203_v33 }
 0x5e1   :  { %6208 = vrcp.f32 %v1893_v23 }
 0x5e2   :  { %6210 = vrcp.f32 %v1894_v29 }
 0x5ec   :  { %v6205_v38 = vpop.eup %6204 }
 0x5ed   :  { %v6207_v41 = vpop.eup %6206  ;;  %v1974_v42 = vmul.f32 %v6205_v38, %v1970_v37 }
 0x5ee   :  { %v1975_v45 = vmul.f32 %v6207_v41, %v1971_v39  ;;  %v6209_v46 = vpop.eup %6208 }
 0x5ef   :  { %v1976_v34 = vadd.f32 %v1974_v42, %v6692_v60  ;;  %v6211_v47 = vpop.eup %6210  ;;  %v1980_v48 = vsub.f32 1.0, %v6209_v46  ;;  %v1988_v53 = vmul.f32 %v6209_v46, %v1984_v51 }
 0x5f0   :  { %v1977_v35 = vadd.f32 %v1975_v45, %v6694_v63  ;;  %v1981_v50 = vsub.f32 1.0, %v6211_v47  ;;  %v1989_v11 = vmul.f32 %v6211_v47, %v1985_v52 }
 0x5f1   :  { %6212 = vtanh.f32 %v1976_v34 }
 0x5f2   :  { %6214 = vtanh.f32 %v1977_v35 }
 0x5fe   :  { %v6213_v49 = vpop.eup %6212 }
 0x5ff   :  { %v6215_v55 = vpop.eup %6214  ;;  %v1982_v5 = vmul.f32 %v6213_v49, %v1980_v48 }
 0x600   :  { %v1983_v54 = vmul.f32 %v6215_v55, %v1981_v50 }
 0x601   :  { %v7006_v56 = vadd.f32 %v1988_v53, %v1982_v5 }
 0x602   :  { %v7008_v57 = vadd.f32 %v1989_v11, %v1983_v54 }
 0x603   :  { %1993 = vst.msk [vmem:[#allocation2] sm:$0x20] %vm1992_vm10, %v7006_v56  ;;  %v1997_v58 = vrot.slane %v7006_v56, 5  ;;  %v2265_v49 = vrot.slane %v7006_v56, 7 }
 0x604   :  { %1994 = vst.msk [vmem:[#allocation2 + $0x8] sm:$0x20] %vm1992_vm10, %v7008_v57  ;;  %v1998_v43 = vrot.slane %v7008_v57, 4  ;;  %v2266_v55 = vrot.slane %v7008_v57, 7 }
 0x606   :  { %v1999_v44 = vsel %vm598_vm5, %v1998_v43, %v1997_v58 }
 0x607   :  { %5736 = vmatmul.mubr.msk.f32.vlgmr.msra.gmra.mxu1 %vm320_vm2, %v1999_v44  ;;  %5747 = vmatmul.mubr.msk.f32.vlgmr.msra.gmra.mxu0 %vm320_vm2, %v1999_v44 }
 0x608   :  { %5750 = vmatpush3.msra.mxu1 %v7022_v59  ;;  %5757 = vmatprep.mubr.msk.f32.mxu1 %vm6465_vm3, %v6464_v6 }
 0x609   :  { %5751 = vmatprep.subr.mxu1 %v6464_v6  ;;  %5761 = vmatpush3.msra.mxu0 %v6933_v7  ;;  %v7050_v7 = vld [vmem:[%s7726_s2 + $0x40] sm:$0xff] }
 0x60a   :  { %5752 = vmatpush3.msra.mxu1 %v7032_v61  ;;  %5762 = vmatprep.subr.mxu0 %v6464_v6 }
 0x60b   :  { %5753 = vmatprep.subr.mxu1 %v6464_v6  ;;  %5763 = vmatpush3.msra.mxu0 %v6942_v15 }
 0x60c   :  { %5754 = vmatpush3.msra.mxu1 %v7041_v12  ;;  %5764 = vmatprep.subr.mxu0 %v6464_v6 }
 0x60d   :  { %5755 = vmatprep.subr.mxu1 %v6464_v6  ;;  %5765 = vmatpush3.msra.mxu0 %v6951_v16 }
 0x60e   :  { %5756 = vmatpush3.msra.mxu1 %v7050_v7  ;;  %5766 = vmatprep.subr.mxu0 %v6464_v6 }
 0x60f   :  { %5758 = vmatmul.mubr.msk.f32.vlgmr.msra.gmra.mxu1 %vm320_vm2, %v1999_v44  ;;  %5771 = vmatprep.subr.mxu1 %v6464_v6 }
 0x610   :  { %5772 = vmatpush3.msra.mxu1 %v6961_v17  ;;  %5767 = vmatpush3.msra.mxu0 %v6967_v8 }
 0x611   :  { %5773 = vmatprep.subr.mxu1 %v6464_v6  ;;  %5768 = vmatprep.mubr.msk.f32.mxu0 %vm6465_vm3, %v6464_v6 }
 0x612   :  { %5774 = vmatpush3.msra.mxu1 %v6976_v18  ;;  %5779 = vmatprep.mubr.msk.f32.mxu1 %vm6465_vm3, %v6464_v6 }
 0x613   :  { %5775 = vmatprep.subr.mxu1 %v6464_v6  ;;  %5782 = vmatprep.subr.mxu0 %v6464_v6 }
 0x614   :  { %5776 = vmatpush3.msra.mxu1 %v6986_v9 }
 0x615   :  { %5777 = vmatprep.subr.mxu1 %v6464_v6 }
 0x616   :  { %5778 = vmatpush3.msra.mxu1 %v6993_v10 }
 0x6c7   :  { %v2068_v15 = vpop.f32.mrf.mxu1  ;;  %v2138_v16 = vpop.f32.mrf.mxu0 }
 0x6c8   :  { %v2143_v17 = vrot.slane %v2068_v15, 2  ;;  %v2144_v8 = vrot.slane %v2068_v15, 3  ;;  %v2162_v3 = vrot.slane %v2138_v16, 2  ;;  %v2163_v4 = vrot.slane %v2138_v16, 3  ;;  %v5169_v16 = vld [vmem:[%s7729_s5 + $0x38] sm:$0xff] }
 0x6c9   :  { %v5737_v62 = vpop.f32.mrf.mxu1  ;;  %v5748_v13 = vpop.f32.mrf.mxu0 }
 0x6ca   :  { %v2147_v18 = vadd.f32 %v2143_v17, %v6668_v24  ;;  %v2148_v0 = vadd.f32 %v2144_v8, %v6670_v26  ;;  %v2166_v19 = vadd.f32 %v2162_v3, %v6677_v36  ;;  %v2167_v10 = vadd.f32 %v2163_v4, %v6679_v40  ;;  %v5167_v17 = vld [vmem:[%s7729_s5 + $0x28] sm:$0xff]  ;;  %v2559_v8 = vld [vmem:[%s7729_s5] sm:$0xff]  ;;  %v7133_v13 = vld [vmem:[%s7729_s5 + $0x58] sm:$0xff] }
 0x6cb   :  { %v5166_v62 = vld [vmem:[%s7729_s5 + $0x20] sm:$0xff] }
 0x6cc   :  { %v5151_v1 = vmul.f32 -1.442695, %v2147_v18  ;;  %v5152_v2 = vmul.f32 -1.442695, %v2148_v0  ;;  %v5153_v21 = vmul.f32 -1.442695, %v2166_v19 }
 0x6cd   :  { %v5154_v22 = vmul.f32 -1.442695, %v2167_v10 }
 0x6ce   :  { %6216 = vpow2.f32 %v5151_v1 }
 0x6cf   :  { %6218 = vpow2.f32 %v5152_v2  ;;  %v2246_v9 = vpop.f32.mrf.mxu1 }
 0x6d0   :  { %6220 = vpow2.f32 %v5153_v21  ;;  %v2247_v23 = vadd.f32 %v7076_v28, %v2246_v9 }
 0x6d1   :  { %v5759_v20 = vpop.f32.mrf.mxu1  ;;  %6222 = vpow2.f32 %v5154_v22 }
 0x6d2   :  { %v2251_v38 = vrot.slane %v2247_v23, 2  ;;  %v2252_v41 = vrot.slane %v2247_v23, 3 }
 0x6db   :  { %v6217_v25 = vpop.eup %6216 }
 0x6dc   :  { %v6219_v27 = vpop.eup %6218  ;;  %v2155_v30 = vadd.f32 1.0, %v6217_v25 }
 0x6dd   :  { %v2156_v31 = vadd.f32 1.0, %v6219_v27  ;;  %v6221_v32 = vpop.eup %6220 }
 0x6de   :  { %6224 = vrcp.f32 %v2155_v30  ;;  %v6223_v33 = vpop.eup %6222  ;;  %v2174_v29 = vadd.f32 1.0, %v6221_v32 }
 0x6df   :  { %6226 = vrcp.f32 %v2156_v31  ;;  %v2175_v37 = vadd.f32 1.0, %v6223_v33 }
 0x6e0   :  { %6228 = vrcp.f32 %v2174_v29 }
 0x6e1   :  { %6230 = vrcp.f32 %v2175_v37 }
 0x6eb   :  { %v6225_v39 = vpop.eup %6224 }
 0x6ec   :  { %v6227_v42 = vpop.eup %6226  ;;  %v2255_v45 = vmul.f32 %v6225_v39, %v2251_v38 }
 0x6ed   :  { %v2256_v34 = vmul.f32 %v6227_v42, %v2252_v41  ;;  %v6229_v47 = vpop.eup %6228 }
 0x6ee   :  { %v2257_v35 = vadd.f32 %v2255_v45, %v6692_v60  ;;  %v6231_v48 = vpop.eup %6230  ;;  %v2261_v51 = vsub.f32 1.0, %v6229_v47  ;;  %v2269_v54 = vmul.f32 %v6229_v47, %v2265_v49 }
 0x6ef   :  { %v2258_v46 = vadd.f32 %v2256_v34, %v6694_v63  ;;  %v2262_v52 = vsub.f32 1.0, %v6231_v48  ;;  %v2270_v58 = vmul.f32 %v6231_v48, %v2266_v55 }
 0x6f0   :  { %6232 = vtanh.f32 %v2257_v35 }
 0x6f1   :  { %6234 = vtanh.f32 %v2258_v46 }
 0x6fd   :  { %v6233_v50 = vpop.eup %6232 }
 0x6fe   :  { %v6235_v5 = vpop.eup %6234  ;;  %v2263_v53 = vmul.f32 %v6233_v50, %v2261_v51 }
 0x6ff   :  { %v2264_v11 = vmul.f32 %v6235_v5, %v2262_v52 }
 0x700   :  { %v7083_v43 = vadd.f32 %v2269_v54, %v2263_v53 }
 0x701   :  { %v7085_v44 = vadd.f32 %v2270_v58, %v2264_v11 }
 0x702   :  { %2274 = vst.msk [vmem:[#allocation2] sm:$0x40] %vm2273_vm11, %v7083_v43  ;;  %v2278_v15 = vrot.slane %v7083_v43, 6 }
 0x703   :  { %2275 = vst.msk [vmem:[#allocation2 + $0x8] sm:$0x40] %vm2273_vm11, %v7085_v44  ;;  %v2279_v56 = vrot.slane %v7085_v44, 5  ;;  %v2547_v55 = vrot.slane %v7085_v44, 7 }
 0x705   :  { %v2280_v57 = vsel %vm598_vm5, %v2279_v56, %v2278_v15 }
 0x706   :  { %5769 = vmatmul.mubr.msk.f32.vlgmr.msra.gmra.mxu0 %vm320_vm2, %v2280_v57  ;;  %5780 = vmatmul.mubr.msk.f32.vlgmr.msra.gmra.mxu1 %vm320_vm2, %v2280_v57 }
 0x707   :  { %5783 = vmatpush3.msra.mxu0 %v7022_v59  ;;  %5790 = vmatprep.mubr.msk.f32.mxu0 %vm6465_vm3, %v6464_v6  ;;  %v2562_v59 = vld [vmem:[%s7729_s5 + $0x18] sm:$0xff] }
 0x708   :  { %5784 = vmatprep.subr.mxu0 %v6464_v6  ;;  %5793 = vmatprep.subr.mxu1 %v2562_v59 }
 0x709   :  { %5785 = vmatpush3.msra.mxu0 %v7032_v61  ;;  %v2561_v61 = vld [vmem:[%s7729_s5 + $0x10] sm:$0xff]  ;;  %5794 = vmatpush3.msra.mxu1 %v2562_v59 }
 0x70a   :  { %5786 = vmatprep.subr.mxu0 %v6464_v6  ;;  %5795 = vmatprep.subr.mxu1 %v2561_v61  ;;  %v7165_v59 = vld [vmem:[%s7730_s6 + $0x10] sm:$0xff] }
 0x70b   :  { %5787 = vmatpush3.msra.mxu0 %v7041_v12  ;;  %v5168_v12 = vld [vmem:[%s7729_s5 + $0x30] sm:$0xff]  ;;  %5796 = vmatpush3.msra.mxu1 %v2561_v61  ;;  %v7175_v61 = vld [vmem:[%s7730_s6 + $0x8] sm:$0xff] }
 0x70c   :  { %5788 = vmatprep.subr.mxu0 %v6464_v6 }
 0x70d   :  { %5789 = vmatpush3.msra.mxu0 %v7050_v7  ;;  %v2560_v7 = vld [vmem:[%s7729_s5 + $0x8] sm:$0xff] }
 0x70e   :  { %5791 = vmatmul.mubr.msk.f32.vlgmr.msra.gmra.mxu0 %vm320_vm2, %v2280_v57  ;;  %5804 = vmatprep.subr.mxu0 %v5169_v16  ;;  %v5176_v57 = vld [vmem:[%s7729_s5 + $0x50] sm:$0xff] }
 0x70f   :  { %5805 = vmatpush3.msra.mxu0 %v5169_v16  ;;  %5797 = vmatprep.subr.mxu1 %v2560_v7  ;;  %v5175_v16 = vld [vmem:[%s7729_s5 + $0x48] sm:$0xff] }
 0x710   :  { %5806 = vmatprep.subr.mxu0 %v5168_v12  ;;  %5798 = vmatpush3.msra.mxu1 %v2560_v7  ;;  %v7185_v7 = vld [vmem:[%s7730_s6] sm:$0xff] }
 0x711   :  { %5807 = vmatpush3.msra.mxu0 %v5168_v12  ;;  %5799 = vmatprep.subr.mxu1 %v2559_v8  ;;  %v5174_v12 = vld [vmem:[%s7729_s5 + $0x40] sm:$0xff] }
 0x712   :  { %5808 = vmatprep.subr.mxu0 %v5167_v17  ;;  %5800 = vmatpush3.msra.mxu1 %v2559_v8  ;;  %v7203_v8 = vld [vmem:[%s7730_s6 + $0x58] sm:$0xff] }
 0x713   :  { %5809 = vmatpush3.msra.mxu0 %v5167_v17  ;;  %5815 = vmatprep.subr.mxu1 %v7133_v13  ;;  %v7195_v17 = vld [vmem:[%s7730_s6 + $0x38] sm:$0xff] }
 0x714   :  { %5810 = vmatprep.subr.mxu0 %v5166_v62 }
 0x715   :  { %5811 = vmatpush3.msra.mxu0 %v5166_v62  ;;  %v7209_v62 = vld [vmem:[%s7730_s6 + $0x30] sm:$0xff] }
 0x716   :  { %5826 = vmatprep.subr.mxu0 %v6464_v6 }
 0x7c6   :  { %v2349_v18 = vpop.f32.mrf.mxu0  ;;  %v2419_v0 = vpop.f32.mrf.mxu1 }
 0x7c7   :  { %v2424_v1 = vrot.slane %v2349_v18, 1  ;;  %v2425_v2 = vrot.slane %v2349_v18, 2  ;;  %v2443_v21 = vrot.slane %v2419_v0, 1  ;;  %v2444_v22 = vrot.slane %v2419_v0, 2  ;;  %v7224_v18 = vld [vmem:[%s7730_s6 + $0x28] sm:$0xff] }
 0x7c8   :  { %v5770_v3 = vpop.f32.mrf.mxu0  ;;  %v5781_v4 = vpop.f32.mrf.mxu1  ;;  %v7232_v0 = vld [vmem:[%s7730_s6 + $0x48] sm:$0xff] }
 0x7c9   :  { %v2428_v9 = vadd.f32 %v2424_v1, %v6668_v24  ;;  %v2429_v19 = vadd.f32 %v2425_v2, %v6670_v26  ;;  %v2447_v27 = vadd.f32 %v2443_v21, %v6677_v36  ;;  %v2448_v30 = vadd.f32 %v2444_v22, %v6679_v40  ;;  %v7238_v1 = vld [vmem:[%s7730_s6 + $0x20] sm:$0xff] }
 0x7ca   :  { %v7246_v2 = vld [vmem:[%s7730_s6 + $0x40] sm:$0xff] }
 0x7cb   :  { %v5158_v10 = vmul.f32 -1.442695, %v2428_v9  ;;  %v5159_v20 = vmul.f32 -1.442695, %v2429_v19  ;;  %v5160_v32 = vmul.f32 -1.442695, %v2447_v27 }
 0x7cc   :  { %v5161_v33 = vmul.f32 -1.442695, %v2448_v30  ;;  %v5163_v9 = vld [vmem:[%s7731_s7] ss:$0 sm:$0xff] }
 0x7cd   :  { %6236 = vpow2.f32 %v5158_v10 }
 0x7ce   :  { %6238 = vpow2.f32 %v5159_v20  ;;  %v2527_v25 = vpop.f32.mrf.mxu0 }
 0x7cf   :  { %6240 = vpow2.f32 %v5160_v32  ;;  %v2528_v39 = vadd.f32 %v7076_v28, %v2527_v25  ;;  %v2546_v28 = vrot.slane %v7083_v43, 7  ;;  %v7151_v43 = vld [vmem:[%s7730_s6 + $0x18] sm:$0xff] }
 0x7d0   :  { %v5792_v31 = vpop.f32.mrf.mxu0  ;;  %6242 = vpow2.f32 %v5161_v33 }
 0x7d1   :  { %v2532_v36 = vrot.slane %v2528_v39, 1  ;;  %v2533_v40 = vrot.slane %v2528_v39, 2 }
 0x7da   :  { %v6237_v23 = vpop.eup %6236 }
 0x7db   :  { %v6239_v24 = vpop.eup %6238  ;;  %v2436_v29 = vadd.f32 1.0, %v6237_v23  ;;  %v5171_v23 = vld [vmem:[%s7731_s7 + $0x1] ss:$0 sm:$0xff] }
 0x7dc   :  { %v2437_v26 = vadd.f32 1.0, %v6239_v24  ;;  %v6241_v37 = vpop.eup %6240 }
 0x7dd   :  { %6244 = vrcp.f32 %v2436_v29  ;;  %v6243_v38 = vpop.eup %6242  ;;  %v2455_v41 = vadd.f32 1.0, %v6241_v37 }
 0x7de   :  { %6246 = vrcp.f32 %v2437_v26  ;;  %v2456_v42 = vadd.f32 1.0, %v6243_v38 }
 0x7df   :  { %6248 = vrcp.f32 %v2455_v41 }
 0x7e0   :  { %6250 = vrcp.f32 %v2456_v42 }
 0x7ea   :  { %v6245_v45 = vpop.eup %6244 }
 0x7eb   :  { %v6247_v34 = vpop.eup %6246  ;;  %v2536_v35 = vmul.f32 %v6245_v45, %v2532_v36 }
 0x7ec   :  { %v2537_v46 = vmul.f32 %v6247_v34, %v2533_v40  ;;  %v6249_v51 = vpop.eup %6248 }
 0x7ed   :  { %v2538_v47 = vadd.f32 %v2536_v35, %v6692_v60  ;;  %v6251_v49 = vpop.eup %6250  ;;  %v2542_v50 = vsub.f32 1.0, %v6249_v51  ;;  %v2550_v54 = vmul.f32 %v6249_v51, %v2546_v28  ;;  %v7302_v51 = vld [vmem:[%s7732_s8] ss:$0 sm:$0xff] }
 0x7ee   :  { %v2539_v48 = vadd.f32 %v2537_v46, %v6694_v63  ;;  %v2543_v5 = vsub.f32 1.0, %v6251_v49  ;;  %v2551_v58 = vmul.f32 %v6251_v49, %v2547_v55 }
 0x7ef   :  { %6252 = vtanh.f32 %v2538_v47 }
 0x7f0   :  { %6254 = vtanh.f32 %v2539_v48 }
 0x7fc   :  { %v6253_v52 = vpop.eup %6252 }
 0x7fd   :  { %v6255_v53 = vpop.eup %6254  ;;  %v2544_v11 = vmul.f32 %v6253_v52, %v2542_v50 }
 0x7fe   :  { %v2545_v15 = vmul.f32 %v6255_v53, %v2543_v5 }
 0x7ff   :  { %v2552_v60 = vadd.f32 %v2550_v54, %v2544_v11  ;;  %v5179_v54 = vld [vmem:[%s7731_s7 + $0x2] ss:$0 sm:$0xff] }
 0x800   :  { %v2553_v56 = vadd.f32 %v2551_v58, %v2545_v15 }
 0x801   :  { %2555 = vst.msk [vmem:[#allocation2] sm:$0x80] %vm2554_vm12, %v2552_v60 }
 0x802   :  { %2556 = vst.msk [vmem:[#allocation2 + $0x8] sm:$0x80] %vm2554_vm12, %v2553_v56 }
 0x808   :  { %v2557_v63 = vld [vmem:[#allocation2] sm:$0xff] }
 0x809   :  { %5801 = vmatprep.mubr.msk.f32.mxu1 %vm320_vm2, %v2557_v63  ;;  %5812 = vmatprep.mubr.msk.f32.mxu0 %vm320_vm2, %v2557_v63  ;;  %v2558_v44 = vld [vmem:[#allocation2 + $0x8] sm:$0xff] }
 0x80a   :  { %5802 = vmatmul.mubr.msk.f32.vlgmr.msra.gmra.mxu1 %vm320_vm2, %v2558_v44  ;;  %5813 = vmatmul.mubr.msk.f32.vlgmr.msra.gmra.mxu0 %vm320_vm2, %v2558_v44 }
 0x80b   :  { %5816 = vmatpush3.msra.mxu1 %v7133_v13  ;;  %5827 = vmatpush3.msra.mxu0 %v7151_v43  ;;  %v7218_v13 = vld [vmem:[%s7730_s6 + $0x50] sm:$0xff] }
 0x80c   :  { %5817 = vmatprep.subr.mxu1 %v5176_v57  ;;  %5823 = vmatprep.mubr.msk.f32.mxu1 %vm320_vm2, %v2557_v63 }
 0x80d   :  { %5828 = vmatprep.subr.mxu0 %v6464_v6  ;;  %5818 = vmatpush3.msra.mxu1 %v5176_v57 }
 0x80e   :  { %5829 = vmatpush3.msra.mxu0 %v7165_v59  ;;  %5819 = vmatprep.subr.mxu1 %v5175_v16 }
 0x80f   :  { %5830 = vmatprep.subr.mxu0 %v6464_v6  ;;  %5820 = vmatpush3.msra.mxu1 %v5175_v16 }
 0x810   :  { %5831 = vmatpush3.msra.mxu0 %v7175_v61  ;;  %5821 = vmatprep.subr.mxu1 %v5174_v12 }
 0x811   :  { %5832 = vmatprep.subr.mxu0 %v6464_v6  ;;  %5822 = vmatpush3.msra.mxu1 %v5174_v12 }
 0x812   :  { %5833 = vmatpush3.msra.mxu0 %v7185_v7  ;;  %5834 = vmatprep.mubr.msk.f32.mxu0 %vm6465_vm3, %v6464_v6 }
 0x813   :  { %5824 = vmatmul.mubr.msk.f32.vlgmr.msra.gmra.mxu1 %vm320_vm2, %v2558_v44  ;;  %5835 = vmatmul.mubr.msk.f32.vlgmr.msra.gmra.mxu0 %vm320_vm2, %v6466_v14 }
 0x814   :  { %5837 = vmatprep.subr.mxu1 %v6464_v6  ;;  %5845 = vmatprep.mubr.msk.f32.mxu1 %vm6465_vm3, %v6464_v6 }
 0x815   :  { %5838 = vmatpush3.msra.mxu1 %v7195_v17  ;;  %5848 = vmatprep.subr.mxu0 %v6464_v6 }
 0x816   :  { %5839 = vmatprep.subr.mxu1 %v6464_v6  ;;  %5849 = vmatpush3.msra.mxu0 %v7203_v8 }
 0x817   :  { %5840 = vmatpush3.msra.mxu1 %v7209_v62  ;;  %5850 = vmatprep.subr.mxu0 %v6464_v6 }
 0x818   :  { %5841 = vmatprep.subr.mxu1 %v6464_v6  ;;  %5851 = vmatpush3.msra.mxu0 %v7218_v13 }
 0x819   :  { %5842 = vmatpush3.msra.mxu1 %v7224_v18  ;;  %5852 = vmatprep.subr.mxu0 %v6464_v6 }
 0x81a   :  { %5843 = vmatprep.subr.mxu1 %v6464_v6  ;;  %5853 = vmatpush3.msra.mxu0 %v7232_v0 }
 0x81b   :  { %5844 = vmatpush3.msra.mxu1 %v7238_v1  ;;  %5854 = vmatprep.subr.mxu0 %v6464_v6 }
 0x81c   :  { %5846 = vmatmul.mubr.msk.f32.vlgmr.msra.gmra.mxu1 %vm320_vm2, %v6466_v14  ;;  %5855 = vmatpush3.msra.mxu0 %v7246_v2 }
 0x81d   :  { %5856 = vmatprep.mubr.msk.f32.mxu0 %vm6465_vm3, %v6464_v6  ;;  %5859 = vmatprep.subr.mxu1 %v6464_v6 }
 0x81e   :  { %5857 = vmatmul.mubr.msk.f32.vlgmr.msra.gmra.mxu0 %vm320_vm2, %v6466_v14  ;;  %5860 = vmatpush3.msra.mxu1 %v7151_v43 }
 0x81f   :  { %5870 = vmatprep.subr.mxu0 %v6464_v6  ;;  %5861 = vmatprep.subr.mxu1 %v6464_v6 }
 0x820   :  { %5871 = vmatpush3.msra.mxu0 %v7195_v17  ;;  %5862 = vmatpush3.msra.mxu1 %v7165_v59 }
 0x821   :  { %5872 = vmatprep.subr.mxu0 %v6464_v6  ;;  %5863 = vmatprep.subr.mxu1 %v6464_v6 }
 0x822   :  { %5873 = vmatpush3.msra.mxu0 %v7209_v62  ;;  %5864 = vmatpush3.msra.mxu1 %v7175_v61 }
 0x823   :  { %5874 = vmatprep.subr.mxu0 %v6464_v6  ;;  %5865 = vmatprep.subr.mxu1 %v6464_v6 }
 0x824   :  { %5875 = vmatpush3.msra.mxu0 %v7224_v18  ;;  %5866 = vmatpush3.msra.mxu1 %v7185_v7 }
 0x825   :  { %5876 = vmatprep.subr.mxu0 %v6464_v6  ;;  %5867 = vmatprep.mubr.msk.f32.mxu1 %vm6465_vm3, %v6464_v6 }
 0x826   :  { %5877 = vmatpush3.msra.mxu0 %v7238_v1  ;;  %5878 = vmatprep.mubr.msk.f32.mxu0 %vm6465_vm3, %v6464_v6 }
 0x827   :  { %5881 = vmatprep.subr.mxu1 %v6464_v6  ;;  %5892 = vmatprep.subr.mxu0 %v6464_v6 }
 0x8ca   :  { %v5803_v14 = vpop.f32.mrf.mxu1  ;;  %v5814_v3 = vpop.f32.mrf.mxu0 }
 0x8cb   :  { %v7286_v21 = vadd.f32 %v5803_v14, %v5163_v9  ;;  %v7295_v37 = vadd.f32 %v5814_v3, %v5171_v23 }
 0x8cc   :  { %v2642_v4 = vpop.f32.mrf.mxu1  ;;  %v2730_v19 = vpop.f32.mrf.mxu0 }
 0x8cd   :  { %v7284_v10 = vadd.f32 %v5163_v9, %v2642_v4  ;;  %v7293_v29 = vadd.f32 %v5171_v23, %v2730_v19 }
 0x8d3   :  { %v2908_v20 = vpop.f32.mrf.mxu0  ;;  %v5825_v30 = vpop.f32.mrf.mxu1 }
 0x8d4   :  { %v2983_v22 = vrot.slane %v2908_v20, 1  ;;  %v2986_v25 = vadd.f32 %v2908_v20, %v7284_v10  ;;  %v7310_v60 = vadd.f32 %v5825_v30, %v5179_v54 }
 0x8d5   :  { %v5836_v27 = vpop.f32.mrf.mxu0  ;;  %v2818_v24 = vpop.f32.mrf.mxu1 }
 0x8d6   :  { %v2987_v31 = vadd.f32 %v2983_v22, %v7286_v21  ;;  %v5192_v32 = vmul.f32 -1.442695, %v2986_v25  ;;  %v7308_v11 = vadd.f32 %v5179_v54, %v2818_v24 }
 0x8d8   :  { %6256 = vpow2.f32 %v5192_v32  ;;  %v5193_v33 = vmul.f32 -1.442695, %v2987_v31 }
 0x8da   :  { %6258 = vpow2.f32 %v5193_v33 }
 0x8dc   :  { %v2978_v26 = vpop.f32.mrf.mxu1 }
 0x8dd   :  { %v3001_v38 = vrot.slane %v2978_v26, 1  ;;  %v3004_v39 = vadd.f32 %v2978_v26, %v7293_v29 }
 0x8de   :  { %v5847_v41 = vpop.f32.mrf.mxu1  ;;  %v3090_v42 = vpop.f32.mrf.mxu0 }
 0x8df   :  { %v3005_v36 = vadd.f32 %v3001_v38, %v7295_v37  ;;  %v5194_v45 = vmul.f32 -1.442695, %v3004_v39  ;;  %v3091_v28 = vadd.f32 %v7302_v51, %v3090_v42 }
 0x8e0   :  { %v5858_v40 = vpop.f32.mrf.mxu0 }
 0x8e1   :  { %v5195_v34 = vmul.f32 -1.442695, %v3005_v36  ;;  %6260 = vpow2.f32 %v5194_v45  ;;  %v3095_v5 = vrot.slane %v3091_v28, 1 }
 0x8e3   :  { %6262 = vpow2.f32 %v5195_v34 }
 0x8e5   :  { %v6257_v35 = vpop.eup %6256 }
 0x8e6   :  { %v2994_v46 = vadd.f32 1.0, %v6257_v35 }
 0x8e7   :  { %v6259_v47 = vpop.eup %6258 }
 0x8e8   :  { %v2995_v48 = vadd.f32 1.0, %v6259_v47  ;;  %6264 = vrcp.f32 %v2994_v46 }
 0x8ea   :  { %6266 = vrcp.f32 %v2995_v48 }
 0x8ee   :  { %v6261_v49 = vpop.eup %6260 }
 0x8ef   :  { %v3012_v52 = vadd.f32 1.0, %v6261_v49 }
 0x8f0   :  { %v6263_v50 = vpop.eup %6262 }
 0x8f1   :  { %v3013_v55 = vadd.f32 1.0, %v6263_v50  ;;  %6268 = vrcp.f32 %v3012_v52 }
 0x8f3   :  { %6270 = vrcp.f32 %v3013_v55 }
 0x8f5   :  { %v6265_v53 = vpop.eup %6264 }
 0x8f6   :  { %v3098_v58 = vmul.f32 %v6265_v53, %v3091_v28 }
 0x8f7   :  { %v6267_v15 = vpop.eup %6266 }
 0x8f8   :  { %v3099_v56 = vmul.f32 %v6267_v15, %v3095_v5  ;;  %v3100_v63 = vadd.f32 %v3098_v58, %v7308_v11 }
 0x8fa   :  { %v3101_v44 = vadd.f32 %v3099_v56, %v7310_v60  ;;  %6272 = vtanh.f32 %v3100_v63 }
 0x8fc   :  { %6274 = vtanh.f32 %v3101_v44 }
 0x8fe   :  { %v6269_v57 = vpop.eup %6268 }
 0x8ff   :  { %v3104_v12 = vsub.f32 1.0, %v6269_v57 }
 0x900   :  { %v6271_v16 = vpop.eup %6270 }
 0x901   :  { %v3105_v3 = vsub.f32 1.0, %v6271_v16 }
 0x907   :  { %v6273_v14 = vpop.eup %6272 }
 0x908   :  { %v3106_v4 = vmul.f32 %v6273_v14, %v3104_v12 }
 0x909   :  { %v6275_v9 = vpop.eup %6274 }
 0x90a   :  { %v3107_v19 = vmul.f32 %v6275_v9, %v3105_v3  ;;  %v7314_v20 = vadd.f32 %v6269_v57, %v3106_v4 }
 0x90c   :  { %v7316_v22 = vadd.f32 %v6271_v16, %v3107_v19  ;;  %3110 = vst.msk [vmem:[#allocation2] sm:$0x1] %vm592_vm4, %v7314_v20  ;;  %v3378_v3 = vrot.slane %v7314_v20, 7 }
 0x90e   :  { %3111 = vst.msk [vmem:[#allocation2 + $0x8] sm:$0x1] %vm592_vm4, %v7316_v22  ;;  %v3114_v25 = vrot.slane %v7316_v22, 7 }
 0x910   :  { %v3115_v27 = vsel %vm598_vm5, %v3114_v25, %v7314_v20 }
 0x911   :  { %5868 = vmatmul.mubr.msk.f32.vlgmr.msra.gmra.mxu1 %vm320_vm2, %v3115_v27  ;;  %5879 = vmatmul.mubr.msk.f32.vlgmr.msra.gmra.mxu0 %vm320_vm2, %v3115_v27 }
 0x912   :  { %5882 = vmatpush3.msra.mxu1 %v7203_v8  ;;  %5889 = vmatprep.mubr.msk.f32.mxu1 %vm6465_vm3, %v6464_v6 }
 0x913   :  { %5883 = vmatprep.subr.mxu1 %v6464_v6  ;;  %5893 = vmatpush3.msra.mxu0 %v7151_v43 }
 0x914   :  { %5884 = vmatpush3.msra.mxu1 %v7218_v13  ;;  %5894 = vmatprep.subr.mxu0 %v6464_v6 }
 0x915   :  { %5885 = vmatprep.subr.mxu1 %v6464_v6  ;;  %5895 = vmatpush3.msra.mxu0 %v7165_v59 }
 0x916   :  { %5886 = vmatpush3.msra.mxu1 %v7232_v0  ;;  %5896 = vmatprep.subr.mxu0 %v6464_v6 }
 0x917   :  { %5887 = vmatprep.subr.mxu1 %v6464_v6  ;;  %5897 = vmatpush3.msra.mxu0 %v7175_v61 }
 0x918   :  { %5888 = vmatpush3.msra.mxu1 %v7246_v2  ;;  %5898 = vmatprep.subr.mxu0 %v6464_v6 }
 0x919   :  { %5890 = vmatmul.mubr.msk.f32.vlgmr.msra.gmra.mxu1 %vm320_vm2, %v3115_v27  ;;  %5903 = vmatprep.subr.mxu1 %v6464_v6 }
 0x91a   :  { %5904 = vmatpush3.msra.mxu1 %v7195_v17  ;;  %5899 = vmatpush3.msra.mxu0 %v7185_v7 }
 0x91b   :  { %5905 = vmatprep.subr.mxu1 %v6464_v6  ;;  %5900 = vmatprep.mubr.msk.f32.mxu0 %vm6465_vm3, %v6464_v6 }
 0x91c   :  { %5906 = vmatpush3.msra.mxu1 %v7209_v62  ;;  %5911 = vmatprep.mubr.msk.f32.mxu1 %vm6465_vm3, %v6464_v6 }
 0x91d   :  { %5907 = vmatprep.subr.mxu1 %v6464_v6  ;;  %5914 = vmatprep.subr.mxu0 %v6464_v6 }
 0x91e   :  { %5908 = vmatpush3.msra.mxu1 %v7224_v18 }
 0x91f   :  { %5909 = vmatprep.subr.mxu1 %v6464_v6 }
 0x920   :  { %5910 = vmatpush3.msra.mxu1 %v7238_v1 }
 0x921   :  { %5925 = vmatprep.subr.mxu1 %v6464_v6 }
 0x9d1   :  { %v3184_v30 = vpop.f32.mrf.mxu1  ;;  %v3254_v31 = vpop.f32.mrf.mxu0 }
 0x9d2   :  { %v3259_v32 = vrot.slane %v3184_v30, 7  ;;  %v3263_v33 = vadd.f32 %v3184_v30, %v7286_v21  ;;  %v3277_v41 = vrot.slane %v3254_v31, 7  ;;  %v3281_v42 = vadd.f32 %v3254_v31, %v7295_v37 }
 0x9d3   :  { %v5869_v23 = vpop.f32.mrf.mxu1  ;;  %v5880_v24 = vpop.f32.mrf.mxu0 }
 0x9d4   :  { %v3262_v26 = vadd.f32 %v3259_v32, %v7284_v10  ;;  %v5201_v38 = vmul.f32 -1.442695, %v3263_v33  ;;  %v3280_v45 = vadd.f32 %v3277_v41, %v7293_v29  ;;  %v5203_v34 = vmul.f32 -1.442695, %v3281_v42 }
 0x9d6   :  { %v5200_v39 = vmul.f32 -1.442695, %v3262_v26  ;;  %6276 = vpow2.f32 %v5201_v38  ;;  %v5202_v35 = vmul.f32 -1.442695, %v3280_v45 }
 0x9d8   :  { %6278 = vpow2.f32 %v5200_v39 }
 0x9d9   :  { %v3360_v36 = vpop.f32.mrf.mxu1  ;;  %6280 = vpow2.f32 %v5203_v34 }
 0x9da   :  { %6282 = vpow2.f32 %v5202_v35  ;;  %v3361_v55 = vadd.f32 %v7302_v51, %v3360_v36 }
 0x9db   :  { %v5891_v40 = vpop.f32.mrf.mxu1 }
 0x9dc   :  { %v3365_v54 = vrot.slane %v3361_v55, 7 }
 0x9e3   :  { %v6277_v46 = vpop.eup %6276 }
 0x9e4   :  { %v3271_v47 = vadd.f32 1.0, %v6277_v46 }
 0x9e5   :  { %v6279_v48 = vpop.eup %6278 }
 0x9e6   :  { %v3270_v49 = vadd.f32 1.0, %v6279_v48  ;;  %6284 = vrcp.f32 %v3271_v47  ;;  %v6281_v28 = vpop.eup %6280 }
 0x9e7   :  { %v6283_v50 = vpop.eup %6282  ;;  %v3289_v52 = vadd.f32 1.0, %v6281_v28 }
 0x9e8   :  { %6286 = vrcp.f32 %v3270_v49  ;;  %v3288_v5 = vadd.f32 1.0, %v6283_v50 }
 0x9e9   :  { %6288 = vrcp.f32 %v3289_v52 }
 0x9ea   :  { %6290 = vrcp.f32 %v3288_v5 }
 0x9f3   :  { %v6285_v53 = vpop.eup %6284 }
 0x9f4   :  { %v3369_v58 = vmul.f32 %v6285_v53, %v3361_v55 }
 0x9f5   :  { %v6287_v15 = vpop.eup %6286 }
 0x9f6   :  { %v3368_v56 = vmul.f32 %v6287_v15, %v3365_v54  ;;  %v3371_v63 = vadd.f32 %v3369_v58, %v7310_v60  ;;  %v6289_v57 = vpop.eup %6288 }
 0x9f7   :  { %v6291_v16 = vpop.eup %6290  ;;  %v3375_v12 = vsub.f32 1.0, %v6289_v57  ;;  %v3382_v19 = vmul.f32 %v6289_v57, %v3114_v25 }
 0x9f8   :  { %v3370_v44 = vadd.f32 %v3368_v56, %v7308_v11  ;;  %6292 = vtanh.f32 %v3371_v63  ;;  %v3374_v4 = vsub.f32 1.0, %v6291_v16  ;;  %v3381_v31 = vmul.f32 %v6291_v16, %v3378_v3 }
 0x9fa   :  { %6294 = vtanh.f32 %v3370_v44 }
 0xa05   :  { %v6293_v14 = vpop.eup %6292 }
 0xa06   :  { %v3377_v9 = vmul.f32 %v6293_v14, %v3375_v12 }
 0xa07   :  { %v6295_v27 = vpop.eup %6294 }
 0xa08   :  { %v3376_v30 = vmul.f32 %v6295_v27, %v3374_v4  ;;  %v7370_v32 = vadd.f32 %v3382_v19, %v3377_v9 }
 0xa0a   :  { %v7372_v33 = vadd.f32 %v3381_v31, %v3376_v30  ;;  %3386 = vst.msk [vmem:[#allocation2 + $0x8] sm:$0x2] %vm869_vm6, %v7370_v32 }
 0xa0c   :  { %3385 = vst.msk [vmem:[#allocation2] sm:$0x2] %vm869_vm6, %v7372_v33  ;;  %v3389_v20 = vrot.slane %v7372_v33, 1  ;;  %v3656_v30 = vrot.slane %v7372_v33, 7 }
 0xa0e   :  { %v3390_v23 = vsel %vm598_vm5, %v7370_v32, %v3389_v20  ;;  %v3657_v20 = vrot.slane %v7370_v32, 7 }
 0xa0f   :  { %5901 = vmatmul.mubr.msk.f32.vlgmr.msra.gmra.mxu0 %vm320_vm2, %v3390_v23  ;;  %5912 = vmatmul.mubr.msk.f32.vlgmr.msra.gmra.mxu1 %vm320_vm2, %v3390_v23 }
 0xa10   :  { %5915 = vmatpush3.msra.mxu0 %v7203_v8  ;;  %5922 = vmatprep.mubr.msk.f32.mxu0 %vm6465_vm3, %v6464_v6 }
 0xa11   :  { %5916 = vmatprep.subr.mxu0 %v6464_v6  ;;  %5926 = vmatpush3.msra.mxu1 %v7151_v43 }
 0xa12   :  { %5917 = vmatpush3.msra.mxu0 %v7218_v13  ;;  %5927 = vmatprep.subr.mxu1 %v6464_v6 }
 0xa13   :  { %5918 = vmatprep.subr.mxu0 %v6464_v6  ;;  %5928 = vmatpush3.msra.mxu1 %v7165_v59 }
 0xa14   :  { %5919 = vmatpush3.msra.mxu0 %v7232_v0  ;;  %5929 = vmatprep.subr.mxu1 %v6464_v6 }
 0xa15   :  { %5920 = vmatprep.subr.mxu0 %v6464_v6  ;;  %5930 = vmatpush3.msra.mxu1 %v7175_v61 }
 0xa16   :  { %5921 = vmatpush3.msra.mxu0 %v7246_v2  ;;  %5931 = vmatprep.subr.mxu1 %v6464_v6 }
 0xa17   :  { %5923 = vmatmul.mubr.msk.f32.vlgmr.msra.gmra.mxu0 %vm320_vm2, %v3390_v23  ;;  %5936 = vmatprep.subr.mxu0 %v6464_v6 }
 0xa18   :  { %5937 = vmatpush3.msra.mxu0 %v7195_v17  ;;  %5932 = vmatpush3.msra.mxu1 %v7185_v7 }
 0xa19   :  { %5938 = vmatprep.subr.mxu0 %v6464_v6  ;;  %5933 = vmatprep.mubr.msk.f32.mxu1 %vm6465_vm3, %v6464_v6 }
 0xa1a   :  { %5939 = vmatpush3.msra.mxu0 %v7209_v62  ;;  %5944 = vmatprep.mubr.msk.f32.mxu0 %vm6465_vm3, %v6464_v6 }
 0xa1b   :  { %5940 = vmatprep.subr.mxu0 %v6464_v6  ;;  %5947 = vmatprep.subr.mxu1 %v6464_v6 }
 0xa1c   :  { %5941 = vmatpush3.msra.mxu0 %v7224_v18 }
 0xa1d   :  { %5942 = vmatprep.subr.mxu0 %v6464_v6 }
 0xa1e   :  { %5943 = vmatpush3.msra.mxu0 %v7238_v1 }
 0xa1f   :  { %5958 = vmatprep.subr.mxu0 %v6464_v6 }
 0xacf   :  { %v3459_v22 = vpop.f32.mrf.mxu0  ;;  %v3529_v25 = vpop.f32.mrf.mxu1 }
 0xad0   :  { %v3534_v24 = vrot.slane %v3459_v22, 6  ;;  %v3535_v26 = vrot.slane %v3459_v22, 7  ;;  %v3553_v40 = vrot.slane %v3529_v25, 6  ;;  %v3554_v34 = vrot.slane %v3529_v25, 7 }
 0xad1   :  { %v5902_v38 = vpop.f32.mrf.mxu0  ;;  %v5913_v39 = vpop.f32.mrf.mxu1 }
 0xad2   :  { %v3538_v41 = vadd.f32 %v3534_v24, %v7284_v10  ;;  %v3539_v42 = vadd.f32 %v3535_v26, %v7286_v21  ;;  %v3557_v46 = vadd.f32 %v3553_v40, %v7293_v29  ;;  %v3558_v47 = vadd.f32 %v3554_v34, %v7295_v37 }
 0xad4   :  { %v5207_v36 = vmul.f32 -1.442695, %v3538_v41  ;;  %v5208_v45 = vmul.f32 -1.442695, %v3539_v42  ;;  %v5209_v49 = vmul.f32 -1.442695, %v3557_v46 }
 0xad5   :  { %v5210_v28 = vmul.f32 -1.442695, %v3558_v47 }
 0xad6   :  { %6296 = vpow2.f32 %v5207_v36 }
 0xad7   :  { %6298 = vpow2.f32 %v5208_v45  ;;  %v3637_v35 = vpop.f32.mrf.mxu0 }
 0xad8   :  { %6300 = vpow2.f32 %v5209_v49  ;;  %v3638_v58 = vadd.f32 %v7302_v51, %v3637_v35 }
 0xad9   :  { %v5924_v48 = vpop.f32.mrf.mxu0  ;;  %6302 = vpow2.f32 %v5210_v28 }
 0xada   :  { %v3642_v63 = vrot.slane %v3638_v58, 6  ;;  %v3643_v57 = vrot.slane %v3638_v58, 7 }
 0xae3   :  { %v6297_v50 = vpop.eup %6296 }
 0xae4   :  { %v6299_v52 = vpop.eup %6298  ;;  %v3546_v55 = vadd.f32 1.0, %v6297_v50 }
 0xae5   :  { %v3547_v5 = vadd.f32 1.0, %v6299_v52  ;;  %v6301_v53 = vpop.eup %6300 }
 0xae6   :  { %6304 = vrcp.f32 %v3546_v55  ;;  %v6303_v54 = vpop.eup %6302  ;;  %v3565_v15 = vadd.f32 1.0, %v6301_v53 }
 0xae7   :  { %6306 = vrcp.f32 %v3547_v5  ;;  %v3566_v56 = vadd.f32 1.0, %v6303_v54 }
 0xae8   :  { %6308 = vrcp.f32 %v3565_v15 }
 0xae9   :  { %6310 = vrcp.f32 %v3566_v56 }
 0xaf3   :  { %v6305_v44 = vpop.eup %6304 }
 0xaf4   :  { %v6307_v16 = vpop.eup %6306  ;;  %v3646_v12 = vmul.f32 %v6305_v44, %v3642_v63 }
 0xaf5   :  { %v3647_v14 = vmul.f32 %v6307_v16, %v3643_v57  ;;  %v6309_v9 = vpop.eup %6308 }
 0xaf6   :  { %v3648_v3 = vadd.f32 %v3646_v12, %v7308_v11  ;;  %v6311_v19 = vpop.eup %6310  ;;  %v3652_v27 = vsub.f32 1.0, %v6309_v9  ;;  %v3660_v24 = vmul.f32 %v6309_v9, %v3656_v30 }
 0xaf7   :  { %v3649_v4 = vadd.f32 %v3647_v14, %v7310_v60  ;;  %v3653_v23 = vsub.f32 1.0, %v6311_v19  ;;  %v3661_v38 = vmul.f32 %v6311_v19, %v3657_v20 }
 0xaf8   :  { %6312 = vtanh.f32 %v3648_v3 }
 0xaf9   :  { %6314 = vtanh.f32 %v3649_v4 }
 0xb05   :  { %v6313_v31 = vpop.eup %6312 }
 0xb06   :  { %v6315_v22 = vpop.eup %6314  ;;  %v3654_v25 = vmul.f32 %v6313_v31, %v3652_v27 }
 0xb07   :  { %v3655_v26 = vmul.f32 %v6315_v22, %v3653_v23 }
 0xb08   :  { %v7423_v39 = vadd.f32 %v3660_v24, %v3654_v25 }
 0xb09   :  { %v7425_v41 = vadd.f32 %v3661_v38, %v3655_v26 }
 0xb0a   :  { %3664 = vst.msk [vmem:[#allocation2] sm:$0x4] %vm1149_vm7, %v7423_v39  ;;  %v3668_v42 = vrot.slane %v7423_v39, 2  ;;  %v3936_v38 = vrot.slane %v7423_v39, 7 }
 0xb0b   :  { %3665 = vst.msk [vmem:[#allocation2 + $0x8] sm:$0x4] %vm1149_vm7, %v7425_v41  ;;  %v3669_v32 = vrot.slane %v7425_v41, 1 }
 0xb0d   :  { %v3670_v33 = vsel %vm598_vm5, %v3669_v32, %v3668_v42 }
 0xb0e   :  { %5934 = vmatmul.mubr.msk.f32.vlgmr.msra.gmra.mxu1 %vm320_vm2, %v3670_v33  ;;  %5945 = vmatmul.mubr.msk.f32.vlgmr.msra.gmra.mxu0 %vm320_vm2, %v3670_v33 }
 0xb0f   :  { %5948 = vmatpush3.msra.mxu1 %v7203_v8  ;;  %5955 = vmatprep.mubr.msk.f32.mxu1 %vm6465_vm3, %v6464_v6 }
 0xb10   :  { %5949 = vmatprep.subr.mxu1 %v6464_v6  ;;  %5959 = vmatpush3.msra.mxu0 %v7151_v43 }
 0xb11   :  { %5950 = vmatpush3.msra.mxu1 %v7218_v13  ;;  %5960 = vmatprep.subr.mxu0 %v6464_v6 }
 0xb12   :  { %5951 = vmatprep.subr.mxu1 %v6464_v6  ;;  %5961 = vmatpush3.msra.mxu0 %v7165_v59 }
 0xb13   :  { %5952 = vmatpush3.msra.mxu1 %v7232_v0  ;;  %5962 = vmatprep.subr.mxu0 %v6464_v6 }
 0xb14   :  { %5953 = vmatprep.subr.mxu1 %v6464_v6  ;;  %5963 = vmatpush3.msra.mxu0 %v7175_v61 }
 0xb15   :  { %5954 = vmatpush3.msra.mxu1 %v7246_v2  ;;  %5964 = vmatprep.subr.mxu0 %v6464_v6 }
 0xb16   :  { %5956 = vmatmul.mubr.msk.f32.vlgmr.msra.gmra.mxu1 %vm320_vm2, %v3670_v33  ;;  %5969 = vmatprep.subr.mxu1 %v6464_v6  ;;  %v3937_v33 = vrot.slane %v7425_v41, 7 }
 0xb17   :  { %5970 = vmatpush3.msra.mxu1 %v7195_v17  ;;  %5965 = vmatpush3.msra.mxu0 %v7185_v7 }
 0xb18   :  { %5971 = vmatprep.subr.mxu1 %v6464_v6  ;;  %5966 = vmatprep.mubr.msk.f32.mxu0 %vm6465_vm3, %v6464_v6 }
 0xb19   :  { %5972 = vmatpush3.msra.mxu1 %v7209_v62  ;;  %5977 = vmatprep.mubr.msk.f32.mxu1 %vm6465_vm3, %v6464_v6 }
 0xb1a   :  { %5973 = vmatprep.subr.mxu1 %v6464_v6  ;;  %5980 = vmatprep.subr.mxu0 %v6464_v6 }
 0xb1b   :  { %5974 = vmatpush3.msra.mxu1 %v7224_v18 }
 0xb1c   :  { %5975 = vmatprep.subr.mxu1 %v6464_v6 }
 0xb1d   :  { %5976 = vmatpush3.msra.mxu1 %v7238_v1 }
 0xb1e   :  { %5991 = vmatprep.subr.mxu1 %v6464_v6 }
 0xbce   :  { %v3739_v36 = vpop.f32.mrf.mxu1  ;;  %v3809_v45 = vpop.f32.mrf.mxu0 }
 0xbcf   :  { %v3814_v40 = vrot.slane %v3739_v36, 5  ;;  %v3815_v34 = vrot.slane %v3739_v36, 6  ;;  %v3833_v50 = vrot.slane %v3809_v45, 5  ;;  %v3834_v52 = vrot.slane %v3809_v45, 6 }
 0xbd0   :  { %v5935_v35 = vpop.f32.mrf.mxu1  ;;  %v5946_v46 = vpop.f32.mrf.mxu0 }
 0xbd1   :  { %v3818_v47 = vadd.f32 %v3814_v40, %v7284_v10  ;;  %v3819_v48 = vadd.f32 %v3815_v34, %v7286_v21  ;;  %v3837_v5 = vadd.f32 %v3833_v50, %v7293_v29  ;;  %v3838_v53 = vadd.f32 %v3834_v52, %v7295_v37 }
 0xbd3   :  { %v5214_v49 = vmul.f32 -1.442695, %v3818_v47  ;;  %v5215_v28 = vmul.f32 -1.442695, %v3819_v48  ;;  %v5216_v58 = vmul.f32 -1.442695, %v3837_v5 }
 0xbd4   :  { %v5217_v15 = vmul.f32 -1.442695, %v3838_v53 }
 0xbd5   :  { %6316 = vpow2.f32 %v5214_v49 }
 0xbd6   :  { %6318 = vpow2.f32 %v5215_v28  ;;  %v3917_v55 = vpop.f32.mrf.mxu1 }
 0xbd7   :  { %6320 = vpow2.f32 %v5216_v58  ;;  %v3918_v14 = vadd.f32 %v7302_v51, %v3917_v55 }
 0xbd8   :  { %v5957_v54 = vpop.f32.mrf.mxu1  ;;  %6322 = vpow2.f32 %v5217_v15 }
 0xbd9   :  { %v3922_v9 = vrot.slane %v3918_v14, 5  ;;  %v3923_v27 = vrot.slane %v3918_v14, 6 }
 0xbe2   :  { %v6317_v56 = vpop.eup %6316 }
 0xbe3   :  { %v6319_v63 = vpop.eup %6318  ;;  %v3826_v44 = vadd.f32 1.0, %v6317_v56 }
 0xbe4   :  { %v3827_v57 = vadd.f32 1.0, %v6319_v63  ;;  %v6321_v16 = vpop.eup %6320 }
 0xbe5   :  { %6324 = vrcp.f32 %v3826_v44  ;;  %v6323_v12 = vpop.eup %6322  ;;  %v3845_v3 = vadd.f32 1.0, %v6321_v16 }
 0xbe6   :  { %6326 = vrcp.f32 %v3827_v57  ;;  %v3846_v4 = vadd.f32 1.0, %v6323_v12 }
 0xbe7   :  { %6328 = vrcp.f32 %v3845_v3 }
 0xbe8   :  { %6330 = vrcp.f32 %v3846_v4 }
 0xbf2   :  { %v6325_v19 = vpop.eup %6324 }
 0xbf3   :  { %v6327_v30 = vpop.eup %6326  ;;  %v3926_v31 = vmul.f32 %v6325_v19, %v3922_v9 }
 0xbf4   :  { %v3927_v20 = vmul.f32 %v6327_v30, %v3923_v27  ;;  %v6329_v25 = vpop.eup %6328 }
 0xbf5   :  { %v3928_v23 = vadd.f32 %v3926_v31, %v7308_v11  ;;  %v6331_v24 = vpop.eup %6330  ;;  %v3932_v26 = vsub.f32 1.0, %v6329_v25  ;;  %v3940_v40 = vmul.f32 %v6329_v25, %v3936_v38 }
 0xbf6   :  { %v3929_v22 = vadd.f32 %v3927_v20, %v7310_v60  ;;  %v3933_v32 = vsub.f32 1.0, %v6331_v24  ;;  %v3941_v35 = vmul.f32 %v6331_v24, %v3937_v33 }
 0xbf7   :  { %6332 = vtanh.f32 %v3928_v23 }
 0xbf8   :  { %6334 = vtanh.f32 %v3929_v22 }
 0xc04   :  { %v6333_v42 = vpop.eup %6332 }
 0xc05   :  { %v6335_v36 = vpop.eup %6334  ;;  %v3934_v45 = vmul.f32 %v6333_v42, %v3932_v26 }
 0xc06   :  { %v3935_v34 = vmul.f32 %v6335_v36, %v3933_v32 }
 0xc07   :  { %v7476_v46 = vadd.f32 %v3940_v40, %v3934_v45 }
 0xc08   :  { %v7478_v47 = vadd.f32 %v3941_v35, %v3935_v34 }
 0xc09   :  { %3944 = vst.msk [vmem:[#allocation2] sm:$0x8] %vm1430_vm8, %v7476_v46  ;;  %v3948_v48 = vrot.slane %v7476_v46, 3  ;;  %v4216_v36 = vrot.slane %v7476_v46, 7 }
 0xc0a   :  { %3945 = vst.msk [vmem:[#allocation2 + $0x8] sm:$0x8] %vm1430_vm8, %v7478_v47  ;;  %v3949_v39 = vrot.slane %v7478_v47, 2  ;;  %v4217_v34 = vrot.slane %v7478_v47, 7 }
 0xc0c   :  { %v3950_v41 = vsel %vm598_vm5, %v3949_v39, %v3948_v48 }
 0xc0d   :  { %5967 = vmatmul.mubr.msk.f32.vlgmr.msra.gmra.mxu0 %vm320_vm2, %v3950_v41  ;;  %5978 = vmatmul.mubr.msk.f32.vlgmr.msra.gmra.mxu1 %vm320_vm2, %v3950_v41 }
 0xc0e   :  { %5981 = vmatpush3.msra.mxu0 %v7203_v8  ;;  %5988 = vmatprep.mubr.msk.f32.mxu0 %vm6465_vm3, %v6464_v6 }
 0xc0f   :  { %5982 = vmatprep.subr.mxu0 %v6464_v6  ;;  %5992 = vmatpush3.msra.mxu1 %v7151_v43 }
 0xc10   :  { %5983 = vmatpush3.msra.mxu0 %v7218_v13  ;;  %5993 = vmatprep.subr.mxu1 %v6464_v6 }
 0xc11   :  { %5984 = vmatprep.subr.mxu0 %v6464_v6  ;;  %5994 = vmatpush3.msra.mxu1 %v7165_v59 }
 0xc12   :  { %5985 = vmatpush3.msra.mxu0 %v7232_v0  ;;  %5995 = vmatprep.subr.mxu1 %v6464_v6 }
 0xc13   :  { %5986 = vmatprep.subr.mxu0 %v6464_v6  ;;  %5996 = vmatpush3.msra.mxu1 %v7175_v61 }
 0xc14   :  { %5987 = vmatpush3.msra.mxu0 %v7246_v2  ;;  %5997 = vmatprep.subr.mxu1 %v6464_v6 }
 0xc15   :  { %5989 = vmatmul.mubr.msk.f32.vlgmr.msra.gmra.mxu0 %vm320_vm2, %v3950_v41  ;;  %6002 = vmatprep.subr.mxu0 %v6464_v6 }
 0xc16   :  { %6003 = vmatpush3.msra.mxu0 %v7195_v17  ;;  %5998 = vmatpush3.msra.mxu1 %v7185_v7 }
 0xc17   :  { %6004 = vmatprep.subr.mxu0 %v6464_v6  ;;  %5999 = vmatprep.mubr.msk.f32.mxu1 %vm6465_vm3, %v6464_v6 }
 0xc18   :  { %6005 = vmatpush3.msra.mxu0 %v7209_v62  ;;  %6010 = vmatprep.mubr.msk.f32.mxu0 %vm6465_vm3, %v6464_v6 }
 0xc19   :  { %6006 = vmatprep.subr.mxu0 %v6464_v6  ;;  %6013 = vmatprep.subr.mxu1 %v6464_v6 }
 0xc1a   :  { %6007 = vmatpush3.msra.mxu0 %v7224_v18 }
 0xc1b   :  { %6008 = vmatprep.subr.mxu0 %v6464_v6 }
 0xc1c   :  { %6009 = vmatpush3.msra.mxu0 %v7238_v1 }
 0xc1d   :  { %6024 = vmatprep.subr.mxu0 %v6464_v6 }
 0xccd   :  { %v4019_v43 = vpop.f32.mrf.mxu0  ;;  %v4089_v59 = vpop.f32.mrf.mxu1 }
 0xcce   :  { %v4094_v61 = vrot.slane %v4019_v43, 4  ;;  %v4095_v7 = vrot.slane %v4019_v43, 5  ;;  %v4113_v53 = vrot.slane %v4089_v59, 4  ;;  %v4114_v54 = vrot.slane %v4089_v59, 5 }
 0xccf   :  { %v5968_v49 = vpop.f32.mrf.mxu0  ;;  %v5979_v28 = vpop.f32.mrf.mxu1 }
 0xcd0   :  { %v4098_v50 = vadd.f32 %v4094_v61, %v7284_v10  ;;  %v4099_v52 = vadd.f32 %v4095_v7, %v7286_v21  ;;  %v4117_v15 = vadd.f32 %v4113_v53, %v7293_v29  ;;  %v4118_v56 = vadd.f32 %v4114_v54, %v7295_v37  ;;  %v7549_v49 = vld [vmem:[%s7730_s6 + $0x18] sm:$0xff] }
 0xcd2   :  { %v5221_v55 = vmul.f32 -1.442695, %v4098_v50  ;;  %v5222_v5 = vmul.f32 -1.442695, %v4099_v52  ;;  %v5223_v44 = vmul.f32 -1.442695, %v4117_v15 }
 0xcd3   :  { %v5224_v57 = vmul.f32 -1.442695, %v4118_v56 }
 0xcd4   :  { %6336 = vpow2.f32 %v5221_v55 }
 0xcd5   :  { %6338 = vpow2.f32 %v5222_v5  ;;  %v4197_v58 = vpop.f32.mrf.mxu0 }
 0xcd6   :  { %6340 = vpow2.f32 %v5223_v44  ;;  %v4198_v19 = vadd.f32 %v7302_v51, %v4197_v58 }
 0xcd7   :  { %v5990_v63 = vpop.f32.mrf.mxu0  ;;  %6342 = vpow2.f32 %v5224_v57 }
 0xcd8   :  { %v4202_v31 = vrot.slane %v4198_v19, 4  ;;  %v4203_v23 = vrot.slane %v4198_v19, 5 }
 0xce1   :  { %v6337_v16 = vpop.eup %6336 }
 0xce2   :  { %v6339_v12 = vpop.eup %6338  ;;  %v4106_v14 = vadd.f32 1.0, %v6337_v16 }
 0xce3   :  { %v4107_v3 = vadd.f32 1.0, %v6339_v12  ;;  %v6341_v4 = vpop.eup %6340 }
 0xce4   :  { %6344 = vrcp.f32 %v4106_v14  ;;  %v6343_v9 = vpop.eup %6342  ;;  %v4125_v27 = vadd.f32 1.0, %v6341_v4 }
 0xce5   :  { %6346 = vrcp.f32 %v4107_v3  ;;  %v4126_v30 = vadd.f32 1.0, %v6343_v9 }
 0xce6   :  { %6348 = vrcp.f32 %v4125_v27 }
 0xce7   :  { %6350 = vrcp.f32 %v4126_v30 }
 0xcf1   :  { %v6345_v20 = vpop.eup %6344 }
 0xcf2   :  { %v6347_v22 = vpop.eup %6346  ;;  %v4206_v25 = vmul.f32 %v6345_v20, %v4202_v31 }
 0xcf3   :  { %v4207_v24 = vmul.f32 %v6347_v22, %v4203_v23  ;;  %v6349_v42 = vpop.eup %6348 }
 0xcf4   :  { %v4208_v26 = vadd.f32 %v4206_v25, %v7308_v11  ;;  %v6351_v32 = vpop.eup %6350  ;;  %v4212_v33 = vsub.f32 1.0, %v6349_v42  ;;  %v4220_v39 = vmul.f32 %v6349_v42, %v4216_v36 }
 0xcf5   :  { %v4209_v38 = vadd.f32 %v4207_v24, %v7310_v60  ;;  %v4213_v40 = vsub.f32 1.0, %v6351_v32  ;;  %v4221_v43 = vmul.f32 %v6351_v32, %v4217_v34 }
 0xcf6   :  { %6352 = vtanh.f32 %v4208_v26 }
 0xcf7   :  { %6354 = vtanh.f32 %v4209_v38 }
 0xd03   :  { %v6353_v45 = vpop.eup %6352 }
 0xd04   :  { %v6355_v35 = vpop.eup %6354  ;;  %v4214_v48 = vmul.f32 %v6353_v45, %v4212_v33 }
 0xd05   :  { %v4215_v41 = vmul.f32 %v6355_v35, %v4213_v40 }
 0xd06   :  { %v7529_v59 = vadd.f32 %v4220_v39, %v4214_v48 }
 0xd07   :  { %v7531_v61 = vadd.f32 %v4221_v43, %v4215_v41 }
 0xd08   :  { %4224 = vst.msk [vmem:[#allocation2] sm:$0x10] %vm1711_vm9, %v7529_v59  ;;  %v4228_v7 = vrot.slane %v7529_v59, 4 }
 0xd09   :  { %4225 = vst.msk [vmem:[#allocation2 + $0x8] sm:$0x10] %vm1711_vm9, %v7531_v61  ;;  %v4229_v46 = vrot.slane %v7531_v61, 3  ;;  %v4497_v40 = vrot.slane %v7531_v61, 7 }
 0xd0b   :  { %v4230_v47 = vsel %vm598_vm5, %v4229_v46, %v4228_v7 }
 0xd0c   :  { %6000 = vmatmul.mubr.msk.f32.vlgmr.msra.gmra.mxu1 %vm320_vm2, %v4230_v47  ;;  %6011 = vmatmul.mubr.msk.f32.vlgmr.msra.gmra.mxu0 %vm320_vm2, %v4230_v47 }
 0xd0d   :  { %6014 = vmatpush3.msra.mxu1 %v7203_v8  ;;  %6021 = vmatprep.mubr.msk.f32.mxu1 %vm6465_vm3, %v6464_v6  ;;  %v7558_v8 = vld [vmem:[%s7730_s6 + $0x10] sm:$0xff] }
 0xd0e   :  { %6015 = vmatprep.subr.mxu1 %v6464_v6  ;;  %6025 = vmatpush3.msra.mxu0 %v7549_v49 }
 0xd0f   :  { %6016 = vmatpush3.msra.mxu1 %v7218_v13  ;;  %6026 = vmatprep.subr.mxu0 %v6464_v6  ;;  %v7567_v13 = vld [vmem:[%s7730_s6 + $0x8] sm:$0xff] }
 0xd10   :  { %6017 = vmatprep.subr.mxu1 %v6464_v6  ;;  %6027 = vmatpush3.msra.mxu0 %v7558_v8 }
 0xd11   :  { %6018 = vmatpush3.msra.mxu1 %v7232_v0  ;;  %6028 = vmatprep.subr.mxu0 %v6464_v6  ;;  %v7578_v0 = vld [vmem:[%s7730_s6] sm:$0xff] }
 0xd12   :  { %6019 = vmatprep.subr.mxu1 %v6464_v6  ;;  %6029 = vmatpush3.msra.mxu0 %v7567_v13 }
 0xd13   :  { %6020 = vmatpush3.msra.mxu1 %v7246_v2  ;;  %6030 = vmatprep.subr.mxu0 %v6464_v6 }
 0xd14   :  { %6022 = vmatmul.mubr.msk.f32.vlgmr.msra.gmra.mxu1 %vm320_vm2, %v4230_v47  ;;  %6035 = vmatprep.subr.mxu1 %v6464_v6  ;;  %v7618_v47 = vld [vmem:[%s7730_s6 + $0x58] sm:$0xff] }
 0xd15   :  { %6036 = vmatpush3.msra.mxu1 %v7195_v17  ;;  %6031 = vmatpush3.msra.mxu0 %v7578_v0 }
 0xd16   :  { %6037 = vmatprep.subr.mxu1 %v6464_v6  ;;  %6032 = vmatprep.mubr.msk.f32.mxu0 %vm6465_vm3, %v6464_v6 }
 0xd17   :  { %6038 = vmatpush3.msra.mxu1 %v7209_v62  ;;  %6043 = vmatprep.mubr.msk.f32.mxu1 %vm6465_vm3, %v6464_v6 }
 0xd18   :  { %6039 = vmatprep.subr.mxu1 %v6464_v6  ;;  %6046 = vmatprep.subr.mxu0 %v6464_v6 }
 0xd19   :  { %6040 = vmatpush3.msra.mxu1 %v7224_v18 }
 0xd1a   :  { %6041 = vmatprep.subr.mxu1 %v6464_v6 }
 0xd1b   :  { %6042 = vmatpush3.msra.mxu1 %v7238_v1 }
 0xd1c   :  { %6057 = vmatprep.subr.mxu1 %v6464_v6 }
 0xdcc   :  { %v4299_v17 = vpop.f32.mrf.mxu1  ;;  %v4369_v2 = vpop.f32.mrf.mxu0 }
 0xdcd   :  { %v4374_v28 = vrot.slane %v4299_v17, 3  ;;  %v4375_v50 = vrot.slane %v4299_v17, 4  ;;  %v4393_v58 = vrot.slane %v4369_v2, 3  ;;  %v4394_v18 = vrot.slane %v4369_v2, 4  ;;  %v7628_v17 = vld [vmem:[%s7730_s6 + $0x50] sm:$0xff]  ;;  %v7637_v2 = vld [vmem:[%s7730_s6 + $0x48] sm:$0xff] }
 0xdce   :  { %v6001_v62 = vpop.f32.mrf.mxu1  ;;  %v6012_v52 = vpop.f32.mrf.mxu0 }
 0xdcf   :  { %v4378_v55 = vadd.f32 %v4374_v28, %v7284_v10  ;;  %v4379_v5 = vadd.f32 %v4375_v50, %v7286_v21  ;;  %v4397_v1 = vadd.f32 %v4393_v58, %v7293_v29  ;;  %v4398_v56 = vadd.f32 %v4394_v18, %v7295_v37  ;;  %v6440_v28 = vld [vmem:[%s7730_s6 + $0x20] sm:$0xff] }
 0xdd1   :  { %v5228_v53 = vmul.f32 -1.442695, %v4378_v55  ;;  %v5229_v54 = vmul.f32 -1.442695, %v4379_v5  ;;  %v5230_v44 = vmul.f32 -1.442695, %v4397_v1 }
 0xdd2   :  { %v5231_v57 = vmul.f32 -1.442695, %v4398_v56 }
 0xdd3   :  { %6356 = vpow2.f32 %v5228_v53 }
 0xdd4   :  { %6358 = vpow2.f32 %v5229_v54  ;;  %v4477_v15 = vpop.f32.mrf.mxu1 }
 0xdd5   :  { %6360 = vpow2.f32 %v5230_v44  ;;  %v4478_v19 = vadd.f32 %v7302_v51, %v4477_v15  ;;  %v4496_v51 = vrot.slane %v7529_v59, 7 }
 0xdd6   :  { %v6023_v63 = vpop.f32.mrf.mxu1  ;;  %6362 = vpow2.f32 %v5231_v57 }
 0xdd7   :  { %v4482_v31 = vrot.slane %v4478_v19, 3  ;;  %v4483_v23 = vrot.slane %v4478_v19, 4 }
 0xde0   :  { %v6357_v16 = vpop.eup %6356 }
 0xde1   :  { %v6359_v12 = vpop.eup %6358  ;;  %v4386_v14 = vadd.f32 1.0, %v6357_v16 }
 0xde2   :  { %v4387_v3 = vadd.f32 1.0, %v6359_v12  ;;  %v6361_v4 = vpop.eup %6360 }
 0xde3   :  { %6364 = vrcp.f32 %v4386_v14  ;;  %v6363_v9 = vpop.eup %6362  ;;  %v4405_v27 = vadd.f32 1.0, %v6361_v4 }
 0xde4   :  { %6366 = vrcp.f32 %v4387_v3  ;;  %v4406_v30 = vadd.f32 1.0, %v6363_v9 }
 0xde5   :  { %6368 = vrcp.f32 %v4405_v27 }
 0xde6   :  { %6370 = vrcp.f32 %v4406_v30 }
 0xdf0   :  { %v6365_v20 = vpop.eup %6364 }
 0xdf1   :  { %v6367_v22 = vpop.eup %6366  ;;  %v4486_v25 = vmul.f32 %v6365_v20, %v4482_v31  ;;  %v7680_v31 = vld [vmem:[%s7732_s8] ss:$0 sm:$0xff]  ;;  %s6467_s8 = smov [#allocation2]  }
 0xdf2   :  { %v4487_v24 = vmul.f32 %v6367_v22, %v4483_v23  ;;  %v6369_v42 = vpop.eup %6368  ;;  %s5071_s4 = sshll.u32 %s6467_s8, 4  ;;  %s5072_s4 = int_to_ptr.vmem [resolvable:$true] %s5071_s4 }
 0xdf3   :  { %v4488_v26 = vadd.f32 %v4486_v25, %v7308_v11  ;;  %v6371_v32 = vpop.eup %6370  ;;  %v4492_v33 = vsub.f32 1.0, %v6369_v42  ;;  %v4500_v48 = vmul.f32 %v6369_v42, %v4496_v51  ;;  %s6442_s26 = scalar_lea.vmem %s5072_s4, 256  ;;  %p6447_p1 = scmp.lt.s32.totalorder %s5072_s4, %s5072_s4 }
 0xdf4   :  { %v4489_v38 = vadd.f32 %v4487_v24, %v7310_v60  ;;  %v4493_v45 = vsub.f32 1.0, %v6371_v32  ;;  %v4501_v41 = vmul.f32 %v6371_v32, %v4497_v40  ;;  %p6443_p0 = scmp.ne.s32.totalorder %s5072_s4, %s6442_s26  ;;  %p6448_p2 = scmp.lt.s32.totalorder %s6442_s26, %s6442_s26 }
 0xdf5   :  { %6372 = vtanh.f32 %v4488_v26 }
 0xdf6   :  { %6374 = vtanh.f32 %v4489_v38  ;;  %p6449_p3 = por %p6448_p2, %p6447_p1 }
 0xdf8   :  { %p6450_p4 = pnand %p6449_p3, %p6443_p0 }
 0xe02   :  { %v6373_v36 = vpop.eup %6372 }
 0xe03   :  { %v6375_v34 = vpop.eup %6374  ;;  %v4494_v35 = vmul.f32 %v6373_v36, %v4492_v33 }
 0xe04   :  { %v4495_v39 = vmul.f32 %v6375_v34, %v4493_v45 }
 0xe05   :  { %v7602_v43 = vadd.f32 %v4500_v48, %v4494_v35 }
 0xe06   :  { %v7604_v7 = vadd.f32 %v4501_v41, %v4495_v39 }
 0xe07   :  { %4504 = vst.msk [vmem:[#allocation2] sm:$0x20] %vm1992_vm10, %v7602_v43  ;;  %v4508_v46 = vrot.slane %v7602_v43, 5  ;;  %v4776_v34 = vrot.slane %v7602_v43, 7 }
 0xe08   :  { %4505 = vst.msk [vmem:[#allocation2 + $0x8] sm:$0x20] %vm1992_vm10, %v7604_v7  ;;  %v4509_v59 = vrot.slane %v7604_v7, 4  ;;  %v4777_v39 = vrot.slane %v7604_v7, 7 }
 0xe0a   :  { %v4510_v61 = vsel %vm598_vm5, %v4509_v59, %v4508_v46 }
 0xe0b   :  { %6033 = vmatmul.mubr.msk.f32.vlgmr.msra.gmra.mxu0 %vm320_vm2, %v4510_v61  ;;  %6044 = vmatmul.mubr.msk.f32.vlgmr.msra.gmra.mxu1 %vm320_vm2, %v4510_v61 }
 0xe0c   :  { %6047 = vmatpush3.msra.mxu0 %v7618_v47  ;;  %6054 = vmatprep.mubr.msk.f32.mxu0 %vm6465_vm3, %v6464_v6 }
 0xe0d   :  { %6048 = vmatprep.subr.mxu0 %v6464_v6  ;;  %6058 = vmatpush3.msra.mxu1 %v7549_v49  ;;  %v7646_v49 = vld [vmem:[%s7730_s6 + $0x40] sm:$0xff] }
 0xe0e   :  { %6049 = vmatpush3.msra.mxu0 %v7628_v17  ;;  %6059 = vmatprep.subr.mxu1 %v6464_v6 }
 0xe0f   :  { %6050 = vmatprep.subr.mxu0 %v6464_v6  ;;  %6060 = vmatpush3.msra.mxu1 %v7558_v8  ;;  %v6437_v8 = vld [vmem:[%s7730_s6 + $0x38] sm:$0xff] }
 0xe10   :  { %6051 = vmatpush3.msra.mxu0 %v7637_v2  ;;  %6061 = vmatprep.subr.mxu1 %v6464_v6 }
 0xe11   :  { %6052 = vmatprep.subr.mxu0 %v6464_v6  ;;  %6062 = vmatpush3.msra.mxu1 %v7567_v13  ;;  %v6438_v13 = vld [vmem:[%s7730_s6 + $0x30] sm:$0xff] }
 0xe12   :  { %6053 = vmatpush3.msra.mxu0 %v7646_v49  ;;  %6063 = vmatprep.subr.mxu1 %v6464_v6 }
 0xe13   :  { %6055 = vmatmul.mubr.msk.f32.vlgmr.msra.gmra.mxu0 %vm320_vm2, %v4510_v61  ;;  %6068 = vmatprep.subr.mxu0 %v6464_v6 }
 0xe14   :  { %6069 = vmatpush3.msra.mxu0 %v6437_v8  ;;  %6064 = vmatpush3.msra.mxu1 %v7578_v0  ;;  %v6439_v0 = vld [vmem:[%s7730_s6 + $0x28] sm:$0xff] }
 0xe15   :  { %6070 = vmatprep.subr.mxu0 %v6464_v6  ;;  %6065 = vmatprep.mubr.msk.f32.mxu1 %vm6465_vm3, %v6464_v6 }
 0xe16   :  { %6071 = vmatpush3.msra.mxu0 %v6438_v13  ;;  %6076 = vmatprep.mubr.msk.f32.mxu0 %vm6465_vm3, %v6464_v6 }
 0xe17   :  { %6072 = vmatprep.subr.mxu0 %v6464_v6  ;;  %6079 = vmatprep.subr.mxu1 %v6464_v6 }
 0xe18   :  { %6073 = vmatpush3.msra.mxu0 %v6439_v0 }
 0xe19   :  { %6074 = vmatprep.subr.mxu0 %v6464_v6 }
 0xe1a   :  { %6075 = vmatpush3.msra.mxu0 %v6440_v28 }
 0xecb   :  { %v4579_v50 = vpop.f32.mrf.mxu0  ;;  %v4649_v62 = vpop.f32.mrf.mxu1 }
 0xecc   :  { %v4654_v52 = vrot.slane %v4579_v50, 2  ;;  %v4655_v55 = vrot.slane %v4579_v50, 3  ;;  %v4673_v1 = vrot.slane %v4649_v62, 2  ;;  %v4674_v56 = vrot.slane %v4649_v62, 3 }
 0xecd   :  { %v6034_v5 = vpop.f32.mrf.mxu0  ;;  %v6045_v53 = vpop.f32.mrf.mxu1 }
 0xece   :  { %v4658_v54 = vadd.f32 %v4654_v52, %v7284_v10  ;;  %v4659_v58 = vadd.f32 %v4655_v55, %v7286_v21  ;;  %v4677_v44 = vadd.f32 %v4673_v1, %v7293_v29  ;;  %v4678_v57 = vadd.f32 %v4674_v56, %v7295_v37 }
 0xed0   :  { %v5235_v18 = vmul.f32 -1.442695, %v4658_v54  ;;  %v5236_v15 = vmul.f32 -1.442695, %v4659_v58  ;;  %v5237_v12 = vmul.f32 -1.442695, %v4677_v44 }
 0xed1   :  { %v5238_v14 = vmul.f32 -1.442695, %v4678_v57 }
 0xed2   :  { %6376 = vpow2.f32 %v5235_v18 }
 0xed3   :  { %6378 = vpow2.f32 %v5236_v15  ;;  %v4757_v63 = vpop.f32.mrf.mxu0 }
 0xed4   :  { %6380 = vpow2.f32 %v5237_v12  ;;  %v4758_v20 = vadd.f32 %v7680_v31, %v4757_v63 }
 0xed5   :  { %v6056_v16 = vpop.f32.mrf.mxu0  ;;  %6382 = vpow2.f32 %v5238_v14 }
 0xed6   :  { %v4762_v25 = vrot.slane %v4758_v20, 2  ;;  %v4763_v26 = vrot.slane %v4758_v20, 3 }
 0xedf   :  { %v6377_v3 = vpop.eup %6376 }
 0xee0   :  { %v6379_v4 = vpop.eup %6378  ;;  %v4666_v9 = vadd.f32 1.0, %v6377_v3 }
 0xee1   :  { %v4667_v19 = vadd.f32 1.0, %v6379_v4  ;;  %v6381_v27 = vpop.eup %6380 }
 0xee2   :  { %6384 = vrcp.f32 %v4666_v9  ;;  %v6383_v30 = vpop.eup %6382  ;;  %v4685_v23 = vadd.f32 1.0, %v6381_v27 }
 0xee3   :  { %6386 = vrcp.f32 %v4667_v19  ;;  %v4686_v22 = vadd.f32 1.0, %v6383_v30 }
 0xee4   :  { %6388 = vrcp.f32 %v4685_v23 }
 0xee5   :  { %6390 = vrcp.f32 %v4686_v22 }
 0xeef   :  { %v6385_v24 = vpop.eup %6384 }
 0xef0   :  { %v6387_v38 = vpop.eup %6386  ;;  %v4766_v42 = vmul.f32 %v6385_v24, %v4762_v25 }
 0xef1   :  { %v4767_v32 = vmul.f32 %v6387_v38, %v4763_v26  ;;  %v6389_v36 = vpop.eup %6388 }
 0xef2   :  { %v4768_v33 = vadd.f32 %v4766_v42, %v7308_v11  ;;  %v6391_v45 = vpop.eup %6390  ;;  %v4772_v40 = vsub.f32 1.0, %v6389_v36  ;;  %v4780_v59 = vmul.f32 %v6389_v36, %v4776_v34 }
 0xef3   :  { %v4769_v51 = vadd.f32 %v4767_v32, %v7310_v60  ;;  %v4773_v48 = vsub.f32 1.0, %v6391_v45  ;;  %v4781_v8 = vmul.f32 %v6391_v45, %v4777_v39 }
 0xef4   :  { %6392 = vtanh.f32 %v4768_v33 }
 0xef5   :  { %6394 = vtanh.f32 %v4769_v51 }
 0xf01   :  { %v6393_v35 = vpop.eup %6392 }
 0xf02   :  { %v6395_v41 = vpop.eup %6394  ;;  %v4774_v46 = vmul.f32 %v6393_v35, %v4772_v40 }
 0xf03   :  { %v4775_v61 = vmul.f32 %v6395_v41, %v4773_v48 }
 0xf04   :  { %v7687_v13 = vadd.f32 %v4780_v59, %v4774_v46 }
 0xf05   :  { %v7689_v0 = vadd.f32 %v4781_v8, %v4775_v61 }
 0xf06   :  { %4784 = vst.msk [vmem:[#allocation2] sm:$0x40] %vm2273_vm11, %v7687_v13  ;;  %v4788_v28 = vrot.slane %v7687_v13, 6 }
 0xf07   :  { %4785 = vst.msk [vmem:[#allocation2 + $0x8] sm:$0x40] %vm2273_vm11, %v7689_v0  ;;  %v4789_v43 = vrot.slane %v7689_v0, 5  ;;  %v5057_v38 = vrot.slane %v7689_v0, 7 }
 0xf09   :  { %v4790_v7 = vsel %vm598_vm5, %v4789_v43, %v4788_v28 }
 0xf0a   :  { %6066 = vmatmul.mubr.msk.f32.vlgmr.msra.gmra.mxu1 %vm320_vm2, %v4790_v7  ;;  %6077 = vmatmul.mubr.msk.f32.vlgmr.msra.gmra.mxu0 %vm320_vm2, %v4790_v7 }
 0xf0b   :  { %6080 = vmatpush3.msra.mxu1 %v7618_v47  ;;  %6087 = vmatprep.mubr.msk.f32.mxu1 %vm6465_vm3, %v6464_v6 }
 0xf0c   :  { %6081 = vmatprep.subr.mxu1 %v6464_v6 }
 0xf0d   :  { %6082 = vmatpush3.msra.mxu1 %v7628_v17 }
 0xf0e   :  { %6083 = vmatprep.subr.mxu1 %v6464_v6 }
 0xf0f   :  { %6084 = vmatpush3.msra.mxu1 %v7637_v2 }
 0xf10   :  { %6085 = vmatprep.subr.mxu1 %v6464_v6 }
 0xf11   :  { %6086 = vmatpush3.msra.mxu1 %v7646_v49 }
 0xf12   :  { %6088 = vmatmul.mubr.msk.f32.vlgmr.msra.gmra.mxu1 %vm320_vm2, %v4790_v7 }
 0xfca   :  { %v4859_v50 = vpop.f32.mrf.mxu1  ;;  %v4929_v62 = vpop.f32.mrf.mxu0 }
 0xfcb   :  { %v4934_v47 = vrot.slane %v4859_v50, 1  ;;  %v4935_v52 = vrot.slane %v4859_v50, 2  ;;  %v4953_v18 = vrot.slane %v4929_v62, 1  ;;  %v4954_v2 = vrot.slane %v4929_v62, 2 }
 0xfcc   :  { %v6067_v55 = vpop.f32.mrf.mxu1  ;;  %v6078_v5 = vpop.f32.mrf.mxu0 }
 0xfcd   :  { %v4938_v53 = vadd.f32 %v4934_v47, %v7284_v10  ;;  %v4939_v17 = vadd.f32 %v4935_v52, %v7286_v21  ;;  %v4957_v49 = vadd.f32 %v4953_v18, %v7293_v29  ;;  %v4958_v15 = vadd.f32 %v4954_v2, %v7295_v37 }
 0xfcf   :  { %v5242_v54 = vmul.f32 -1.442695, %v4938_v53  ;;  %v5243_v58 = vmul.f32 -1.442695, %v4939_v17  ;;  %v5244_v56 = vmul.f32 -1.442695, %v4957_v49 }
 0xfd0   :  { %v5245_v63 = vmul.f32 -1.442695, %v4958_v15 }
 0xfd1   :  { %6396 = vpow2.f32 %v5242_v54 }
 0xfd2   :  { %6398 = vpow2.f32 %v5243_v58  ;;  %v5037_v6 = vpop.f32.mrf.mxu1 }
 0xfd3   :  { %6400 = vpow2.f32 %v5244_v56  ;;  %v5038_v14 = vadd.f32 %v7680_v31, %v5037_v6  ;;  %v5056_v31 = vrot.slane %v7687_v13, 7 }
 0xfd4   :  { %v6089_v1 = vpop.f32.mrf.mxu1  ;;  %6402 = vpow2.f32 %v5245_v63 }
 0xfd5   :  { %v5042_v29 = vrot.slane %v5038_v14, 1  ;;  %v5043_v37 = vrot.slane %v5038_v14, 2 }
 0xfde   :  { %v6397_v44 = vpop.eup %6396 }
 0xfdf   :  { %v6399_v10 = vpop.eup %6398  ;;  %v4946_v57 = vadd.f32 1.0, %v6397_v44 }
 0xfe0   :  { %v4947_v21 = vadd.f32 1.0, %v6399_v10  ;;  %v6401_v16 = vpop.eup %6400 }
 0xfe1   :  { %6404 = vrcp.f32 %v4946_v57  ;;  %v6403_v12 = vpop.eup %6402  ;;  %v4965_v3 = vadd.f32 1.0, %v6401_v16 }
 0xfe2   :  { %6406 = vrcp.f32 %v4947_v21  ;;  %v4966_v4 = vadd.f32 1.0, %v6403_v12 }
 0xfe3   :  { %6408 = vrcp.f32 %v4965_v3 }
 0xfe4   :  { %6410 = vrcp.f32 %v4966_v4 }
 0xfee   :  { %v6405_v9 = vpop.eup %6404 }
 0xfef   :  { %v6407_v19 = vpop.eup %6406  ;;  %v5046_v27 = vmul.f32 %v6405_v9, %v5042_v29 }
 0xff0   :  { %v5047_v30 = vmul.f32 %v6407_v19, %v5043_v37  ;;  %v6409_v22 = vpop.eup %6408 }
 0xff1   :  { %v5048_v20 = vadd.f32 %v5046_v27, %v7308_v11  ;;  %v6411_v25 = vpop.eup %6410  ;;  %v5052_v24 = vsub.f32 1.0, %v6409_v22  ;;  %v5060_v33 = vmul.f32 %v6409_v22, %v5056_v31 }
 0xff2   :  { %v5049_v23 = vadd.f32 %v5047_v30, %v7310_v60  ;;  %v5053_v42 = vsub.f32 1.0, %v6411_v25  ;;  %v5061_v36 = vmul.f32 %v6411_v25, %v5057_v38 }
 0xff3   :  { %6412 = vtanh.f32 %v5048_v20 }
 0xff4   :  { %6414 = vtanh.f32 %v5049_v23 }
0x1000   :  { %v6413_v26 = vpop.eup %6412 }
0x1001   :  { %v6415_v32 = vpop.eup %6414  ;;  %v5054_v51 = vmul.f32 %v6413_v26, %v5052_v24 }
0x1002   :  { %v5055_v11 = vmul.f32 %v6415_v32, %v5053_v42 }
0x1003   :  { %v5062_v45 = vadd.f32 %v5060_v33, %v5054_v51 }
0x1004   :  { %v5063_v60 = vadd.f32 %v5061_v36, %v5055_v11 }
0x1005   :  { %5064 = vst.msk [vmem:[#allocation2] sm:$0x80] %vm2554_vm12, %v5062_v45 }
0x1006   :  { %5065 = vst.msk [vmem:[#allocation2 + $0x8] sm:$0x80] %vm2554_vm12, %v5063_v60 }
0x1007   :  { %6453 = shalt.err (!%p6450_p4)
}
0x1008   :  { %s6468_s27 = smov 128   ;;  %s6469_s7 = smov 8  }
0x1009   :  { %5077 = dma.vmem_to_hbm [thread:$0]  %s5072_s4, 256, %s7733_s9, [#allocation3], %s6468_s27, %s6468_s27, %s6469_s7  }
0x100a   :  { %6462 = dma.done.wait [#allocation3], 256  }
0x100b   :  { %6463 = vsyncadd [#allocation3], 4294967040 }
0x100c   :  { %5081 = vsyncpa [#allocation3], 1 }

</bundles_post_ra>
